<compile_context>
chip_gen: v6e
topology: v6e:2x2x1
jax: 0.10.0
libtpu: 0.0.40
codegen_flags: <defaults>
</compile_context>

<pallas_src>
import jax
import jax.numpy as jnp
from jax.experimental import pallas as pl
from jax.experimental.pallas import tpu as pltpu

# ------------------------- model dimensions (small, synthetic) -------------------------
B = 2        # batch
T_SRC = 8    # source sequence length
T_TGT = 6    # target sequence length
V_SRC = 24   # source vocab size
V_TGT = 28   # target vocab size
E = 16       # embed size
H = 32       # hidden size
L = 2        # num GRU layers

# ------------------------- packed-slab row layout (static Python ints) -----------------
R_ENC_FUSED = 0                       # (2H, 9H) encoder block-diag fused weights
R_DEC_FUSED = R_ENC_FUSED + 2 * H     # (2H, 9H) decoder fused weights
R_B_ENC = R_DEC_FUSED + 2 * H         # (1, 9H)  [b_hh0 | b_hh1 | b_ih1] encoder
R_B_DEC = R_B_ENC + 1                 # (1, 9H)  decoder
R_B_GI0E = R_B_DEC + 1                # (1, 3H)  encoder layer-0 input-gate bias (emb folded)
R_B_GI0D = R_B_GI0E + 1               # (1, 3H)  decoder layer-0 input-gate bias (emb folded)
R_OUT_B = R_B_GI0D + 1                # (1, V_TGT) output bias (lane-padded)
R_W_XGI0 = 136                        # (128, 3H) x -> layer-0 gates (emb folded, row-padded)
R_W_YGI0 = R_W_XGI0 + 128             # (128, 3H) y -> layer-0 gates (emb folded, row-padded)
R_W_CTX = R_W_YGI0 + 128              # (H, 3H)  ctx -> decoder layer-0 gates
R_OUT_W = R_W_CTX + H                 # (H, V_TGT) output weights (lane-padded)
R_WKV = R_OUT_W + H                   # (H, 1)   folded W_k @ w_v
PARAM_ROWS = R_WKV + H                # 488
PARAM_COLS = 9 * H                    # 288

D_X = 0                               # data-slab rows 0:16   lanes 0:V_SRC
D_Y = T_SRC * B                       # rows 16:28            lanes 0:V_TGT
D_MASK = D_Y + T_TGT * B              # rows 28:30            lanes 0:T_SRC (1 valid / 0 masked)
DATA_ROWS = 32
DATA_COLS = 128

OUT_ROWS = T_TGT * B + L * B          # 16: logits rows 0:12, hidden rows 12:16
OUT_COLS = 128


def _gru_gates(gi, gh, h):
    """One GRU cell update given input gates gi (B,3H), hidden gates gh (B,3H)."""
    r = jax.nn.sigmoid(gi[:, 0:H] + gh[:, 0:H])
    z = jax.nn.sigmoid(gi[:, H:2 * H] + gh[:, H:2 * H])
    n = jnp.tanh(gi[:, 2 * H:3 * H] + r * gh[:, 2 * H:3 * H])
    return (1.0 - z) * n + z * h


def _stacked_gru(gi0_fn, h0, h1, w_fused, b_fused, steps):
    """Two stacked GRU layers, wavefronted (layer-1 step t interleaved with layer-0 step t+1).

    gi0_fn(t) -> (B, 3H) precomputed layer-0 input gates for step t (bias included).
    w_fused : (2H, 9H) block-diagonal-ish fused weights; per tick the single matmul
              [h0_{t-1} | h1_{t-2}] @ w_fused yields [gh0 | gh1 | gi1].
    b_fused : (1, 9H) = [b_hh0 | b_hh1 | b_ih1].
    Fully unrolled (steps is a small static int). Serial MXU chain length = steps+1.
    """
    b_f = jnp.broadcast_to(b_fused, (B, 9 * H))      # hoisted broadcast
    outs1 = []
    for tt in range(steps + 1):
        lhs = jnp.concatenate([h0, h1], axis=1)                               # (B, 2H)
        fused = jnp.dot(lhs, w_fused, preferred_element_type=jnp.float32) + b_f  # (B, 9H)
        if tt >= 1:          # layer-1 step tt-1: input = layer-0 output at step tt-1 (= h0 now)
            h1 = _gru_gates(fused[:, 6 * H:9 * H], fused[:, 3 * H:6 * H], h1)
            outs1.append(h1)
        if tt < steps:       # layer-0 step tt
            h0 = _gru_gates(gi0_fn(tt), fused[:, 0:3 * H], h0)
    return outs1, h0, h1


def encdec_kernel(data_ref, p_ref, out_ref):
    f32 = jnp.float32

    # ---------------- unpack packed slabs (static slices) ----------------
    x_pad = data_ref[D_X:D_X + T_SRC * B, :]                    # (16,128) lanes >= V_SRC are 0
    y_pad = data_ref[D_Y:D_Y + T_TGT * B, :]                    # (12,128) lanes >= V_TGT are 0
    mask = data_ref[D_MASK:D_MASK + B, 0:T_SRC]                 # (B, T_SRC) 1 valid / 0 masked

    w_enc_fused = p_ref[R_ENC_FUSED:R_ENC_FUSED + 2 * H, 0:9 * H]
    w_dec_fused = p_ref[R_DEC_FUSED:R_DEC_FUSED + 2 * H, 0:9 * H]
    b_enc_fused = p_ref[R_B_ENC:R_B_ENC + 1, 0:9 * H]
    b_dec_fused = p_ref[R_B_DEC:R_B_DEC + 1, 0:9 * H]
    b_gi0_e = p_ref[R_B_GI0E:R_B_GI0E + 1, 0:3 * H]
    b_gi0_d = p_ref[R_B_GI0D:R_B_GI0D + 1, 0:3 * H]
    out_b = p_ref[R_OUT_B:R_OUT_B + 1, 0:128]                   # lanes >= V_TGT are 0
    w_xgi0 = p_ref[R_W_XGI0:R_W_XGI0 + 128, 0:3 * H]            # rows >= V_SRC are 0
    w_ygi0 = p_ref[R_W_YGI0:R_W_YGI0 + 128, 0:3 * H]            # rows >= V_TGT are 0
    w_ctx = p_ref[R_W_CTX:R_W_CTX + H, 0:3 * H]
    out_w = p_ref[R_OUT_W:R_OUT_W + H, 0:128]                   # lanes >= V_TGT are 0
    wkv = p_ref[R_WKV:R_WKV + H, 0:128]                         # lane 0 = W_k @ w_v, rest 0

    # -------- batched, time-independent input-gate matmuls (embedding folded in) --------
    gi_e0_all = jnp.dot(x_pad, w_xgi0, preferred_element_type=f32) + b_gi0_e   # (T_SRC*B, 3H)
    gi_d0y_all = jnp.dot(y_pad, w_ygi0, preferred_element_type=f32)            # (T_TGT*B, 3H)

    h_zero = jnp.zeros((B, H), f32)

    # ------------------------------- Encoder (wavefronted) -------------------------------
    enc_steps, h_enc0, h_enc1 = _stacked_gru(
        lambda t: gi_e0_all[t * B:(t + 1) * B, :],
        h_zero, h_zero, w_enc_fused, b_enc_fused, T_SRC)
    enc_flat = jnp.concatenate(enc_steps, axis=0)                # (T_SRC*B, H)

    # ---------------- Additive attention (step-independent, W_q cancels) ----------------
    # scores[b,t] = enc_out[t,b,:] @ (W_k @ w_v); one lane-dense matmul, then tiny relayout.
    score_full = jnp.dot(enc_flat, wkv, preferred_element_type=f32)   # (T_SRC*B, 128), lane 0
    scores = jnp.concatenate(
        [score_full[t * B:(t + 1) * B, 0:1] for t in range(T_SRC)], axis=1)   # (B, T_SRC)
    masked = jnp.where(mask > 0.5, scores, -1.0e9)               # value replacement (ref semantics)
    m = jnp.max(masked, axis=-1, keepdims=True)
    ex = jnp.exp(masked - m)
    attn = ex / jnp.sum(ex, axis=-1, keepdims=True)              # (B, T_SRC)
    # context: tree-summed FMA over the per-step encoder states (depth 3 instead of 8)
    terms = [attn[:, t:t + 1] * enc_steps[t] for t in range(T_SRC)]
    while len(terms) > 1:
        nxt = []
        for i in range(0, len(terms), 2):
            nxt.append(terms[i] + terms[i + 1] if i + 1 < len(terms) else terms[i])
        terms = nxt
    ctx = terms[0]                                               # (B, H)

    # ------------------------------- Decoder (wavefronted) -------------------------------
    gi_ctx = jnp.dot(ctx, w_ctx, preferred_element_type=f32) + b_gi0_d        # (B, 3H), constant
    dec_steps, hd0, hd1 = _stacked_gru(
        lambda t: gi_d0y_all[t * B:(t + 1) * B, :] + gi_ctx,
        h_enc0, h_enc1, w_dec_fused, b_dec_fused, T_TGT)
    dec_flat = jnp.concatenate(dec_steps, axis=0)                # (T_TGT*B, H)

    # --------------- output projection + lane-dense packed stores ---------------
    logits_full = jnp.dot(dec_flat, out_w, preferred_element_type=f32) + out_b  # (12, 128)
    hidden = jnp.concatenate([hd0, hd1], axis=0)                 # (L*B, H)
    hidden_full = jnp.concatenate(
        [hidden, jnp.zeros((L * B, 128 - H), f32)], axis=1)      # (L*B, 128)
    out_ref[0:T_TGT * B, :] = logits_full
    out_ref[T_TGT * B:T_TGT * B + L * B, :] = hidden_full


# ------------------------------------ wrapper / packing ------------------------------------
def init_params(key):
    """Deterministic synthetic parameters, stored in `x @ W` layout (in_features, out_features).

    GRU gate order along the 3H axis is [r | z | n] (PyTorch convention)."""
    shapes = [
        (V_SRC, E), (1, E),                                        # encoder embedding
        (E, 3 * H), (H, 3 * H), (1, 3 * H), (1, 3 * H),            # encoder GRU layer 0
        (H, 3 * H), (H, 3 * H), (1, 3 * H), (1, 3 * H),            # encoder GRU layer 1
        (V_TGT, E), (1, E),                                        # decoder embedding
        (E + H, 3 * H), (H, 3 * H), (1, 3 * H), (1, 3 * H),        # decoder GRU layer 0
        (H, 3 * H), (H, 3 * H), (1, 3 * H), (1, 3 * H),            # decoder GRU layer 1
        (H, H), (H, H), (H, 1),                                    # attention W_q, W_k, W_v
        (H, V_TGT), (1, V_TGT),                                    # output linear
    ]
    keys = jax.random.split(key, len(shapes))
    return [0.1 * jax.random.normal(k, s, dtype=jnp.float32) for k, s in zip(keys, shapes)]


def pack_params(params):
    (e_emb_w, e_emb_b,
     e_wih0, e_whh0, e_bih0, e_bhh0,
     e_wih1, e_whh1, e_bih1, e_bhh1,
     d_emb_w, d_emb_b,
     d_wih0, d_whh0, d_bih0, d_bhh0,
     d_wih1, d_whh1, d_bih1, d_bhh1,
     wq, wk, wv, out_w, out_b) = params
    # W_q cancels in the masked softmax (no tanh in the reference AdditiveAttention).
    del wq

    z_h3h = jnp.zeros((H, 3 * H), jnp.float32)
    # fused RHS columns: [gh layer-0 | gh layer-1 | gi layer-1]; rows: [h0 ; h1]
    w_enc_fused = jnp.concatenate(
        [jnp.concatenate([e_whh0, z_h3h, e_wih1], axis=1),
         jnp.concatenate([z_h3h, e_whh1, z_h3h], axis=1)], axis=0)             # (2H, 9H)
    b_enc_fused = jnp.concatenate([e_bhh0, e_bhh1, e_bih1], axis=1)            # (1, 9H)
    w_dec_fused = jnp.concatenate(
        [jnp.concatenate([d_whh0, z_h3h, d_wih1], axis=1),
         jnp.concatenate([z_h3h, d_whh1, z_h3h], axis=1)], axis=0)
    b_dec_fused = jnp.concatenate([d_bhh0, d_bhh1, d_bih1], axis=1)

    # fold embedding Linear into the layer-0 input-gate weights (both affine)
    w_xgi0 = e_emb_w @ e_wih0                                                  # (V_SRC, 3H)
    b_gi0_e = e_emb_b @ e_wih0 + e_bih0                                        # (1, 3H)
    w_ygi0 = d_emb_w @ d_wih0[0:E, :]                                          # (V_TGT, 3H)
    b_gi0_d = d_emb_b @ d_wih0[0:E, :] + d_bih0
    w_ctx = d_wih0[E:E + H, :]                                                 # (H, 3H)
    wkv = wk @ wv                                                              # (H, 1) = W_k @ w_v

    p = jnp.zeros((PARAM_ROWS, PARAM_COLS), jnp.float32)

    def put(slab, r, a):
        return slab.at[r:r + a.shape[0], 0:a.shape[1]].set(a)

    p = put(p, R_ENC_FUSED, w_enc_fused)
    p = put(p, R_DEC_FUSED, w_dec_fused)
    p = put(p, R_B_ENC, b_enc_fused)
    p = put(p, R_B_DEC, b_dec_fused)
    p = put(p, R_B_GI0E, b_gi0_e)
    p = put(p, R_B_GI0D, b_gi0_d)
    p = put(p, R_OUT_B, out_b)
    p = put(p, R_W_XGI0, w_xgi0)      # remaining rows of the 128-row block stay zero
    p = put(p, R_W_YGI0, w_ygi0)
    p = put(p, R_W_CTX, w_ctx)
    p = put(p, R_OUT_W, out_w)
    p = put(p, R_WKV, wkv)
    return p


def pack_data(x, y, enc_valid_len):
    x_flat = x.reshape(T_SRC * B, V_SRC)
    y_flat = y.reshape(T_TGT * B, V_TGT)
    vl = enc_valid_len.astype(jnp.int32).reshape(B, 1)
    pos = jnp.arange(T_SRC, dtype=jnp.int32)[None, :]
    mask = (pos < vl).astype(jnp.float32)                         # (B, T_SRC)
    data = jnp.zeros((DATA_ROWS, DATA_COLS), jnp.float32)
    data = data.at[D_X:D_X + T_SRC * B, 0:V_SRC].set(x_flat)
    data = data.at[D_Y:D_Y + T_TGT * B, 0:V_TGT].set(y_flat)
    data = data.at[D_MASK:D_MASK + B, 0:T_SRC].set(mask)
    return data


@jax.jit
def encoder_decoder_forward(x, y, enc_valid_len, params):
    data = pack_data(x, y, enc_valid_len)
    p = pack_params(params)
    out_slab = pl.pallas_call(
        encdec_kernel,
        out_shape=jax.ShapeDtypeStruct((OUT_ROWS, OUT_COLS), jnp.float32),
        in_specs=[pl.BlockSpec(memory_space=pltpu.MemorySpace.VMEM),
                  pl.BlockSpec(memory_space=pltpu.MemorySpace.VMEM)],
        out_specs=pl.BlockSpec(memory_space=pltpu.MemorySpace.VMEM),
    )(data, p)
    # glue: slice the packed output slab back to PyTorch layouts
    logits = out_slab[0:T_TGT * B, 0:V_TGT].reshape(T_TGT, B, V_TGT).transpose(1, 0, 2)
    hidden = out_slab[T_TGT * B:T_TGT * B + L * B, 0:H].reshape(L, B, H)
    return logits, hidden


# ------------------------- pure-JAX reference (mirrors the PyTorch module) -------------------------
def _gru_cell_ref(x_t, h, w_ih, w_hh, b_ih, b_hh):
    gi = x_t @ w_ih + b_ih
    gh = h @ w_hh + b_hh
    r = jax.nn.sigmoid(gi[:, 0:H] + gh[:, 0:H])
    z = jax.nn.sigmoid(gi[:, H:2 * H] + gh[:, H:2 * H])
    n = jnp.tanh(gi[:, 2 * H:3 * H] + r * gh[:, 2 * H:3 * H])
    return (1.0 - z) * n + z * h


@jax.jit
def reference_forward(x, y, enc_valid_len, params):
    (e_emb_w, e_emb_b,
     e_wih0, e_whh0, e_bih0, e_bhh0,
     e_wih1, e_whh1, e_bih1, e_bhh1,
     d_emb_w, d_emb_b,
     d_wih0, d_whh0, d_bih0, d_bhh0,
     d_wih1, d_whh1, d_bih1, d_bhh1,
     wq, wk, wv, out_w, out_b) = params
    h0 = jnp.zeros((B, H), jnp.float32)
    h1 = jnp.zeros((B, H), jnp.float32)
    enc_out = []
    for t in range(T_SRC):
        e = x[t] @ e_emb_w + e_emb_b
        h0 = _gru_cell_ref(e, h0, e_wih0, e_whh0, e_bih0, e_bhh0)
        h1 = _gru_cell_ref(h0, h1, e_wih1, e_whh1, e_bih1, e_bhh1)
        enc_out.append(h1)
    keys = jnp.transpose(jnp.stack(enc_out, axis=0), (1, 0, 2))   # (B, T_SRC, H)
    valid = jnp.arange(T_SRC)[None, :] < enc_valid_len.reshape(B, 1)
    d0, d1 = h0, h1
    outs = []
    for t in range(T_TGT):
        q = d1                                                    # hidden_state[-1]
        pre = (q @ wq)[:, None, :] + keys @ wk                    # (B, T_SRC, H), no tanh
        sc = (pre @ wv)[:, :, 0]                                  # (B, T_SRC)
        sc = jnp.where(valid, sc, -1.0e9)
        attn = jax.nn.softmax(sc, axis=-1)
        ctx = jnp.einsum('bt,bth->bh', attn, keys)                # (B, H)
        e = y[t] @ d_emb_w + d_emb_b
        inp = jnp.concatenate([e, ctx], axis=-1)                  # [embedding, context]
        d0 = _gru_cell_ref(inp, d0, d_wih0, d_whh0, d_bih0, d_bhh0)
        d1 = _gru_cell_ref(d0, d1, d_wih1, d_whh1, d_bih1, d_bhh1)
        outs.append(d1)
    dec_out = jnp.transpose(jnp.stack(outs, axis=0), (1, 0, 2))   # (B, T_TGT, H)
    logits = dec_out @ out_w + out_b
    hidden = jnp.stack([d0, d1], axis=0)
    return logits, hidden


if __name__ == "__main__":
    # TODO(synk): dropout layers are identity here (eval-mode semantics); training-mode dropout not modeled.
    key = jax.random.PRNGKey(0)
    kx, ky, kp = jax.random.split(key, 3)
    x = jax.random.normal(kx, (T_SRC, B, V_SRC), dtype=jnp.float32)
    y = jax.random.normal(ky, (T_TGT, B, V_TGT), dtype=jnp.float32)
    enc_valid_len = jnp.array([5, T_SRC], dtype=jnp.int32)   # (B,)
    params = init_params(kp)

    logits, hidden = encoder_decoder_forward(x, y, enc_valid_len, params)
    jax.block_until_ready((logits, hidden))

    assert logits.shape == (B, T_TGT, V_TGT)
    assert hidden.shape == (L, B, H)
    assert bool(jnp.all(jnp.isfinite(logits))) and bool(jnp.all(jnp.isfinite(hidden)))

    # numerical check against a faithful pure-JAX reference (keeps W_q, per-step attention)
    ref_logits, ref_hidden = reference_forward(x, y, enc_valid_len, params)
    assert bool(jnp.allclose(logits, ref_logits, atol=1e-3, rtol=1e-3)), \
        f"logits mismatch: {float(jnp.max(jnp.abs(logits - ref_logits)))}"
    assert bool(jnp.allclose(hidden, ref_hidden, atol=1e-3, rtol=1e-3)), \
        f"hidden mismatch: {float(jnp.max(jnp.abs(hidden - ref_hidden)))}"
    print("KERNEL_OK")
</pallas_src>

<mosaic_0001>
module attributes {stable_mosaic.version = 11 : i64} {
  func.func @encdec_kernel(%arg0: memref<32x128xf32, #tpu.memory_space<vmem>>, %arg1: memref<488x288xf32, #tpu.memory_space<vmem>>, %arg2: memref<16x128xf32, #tpu.memory_space<vmem>>) attributes {dimension_semantics = [], scalar_prefetch = 0 : i64, scratch_operands = 0 : i64, tpu.core_type = #tpu.core_type<tc>} {
    %c0 = arith.constant 0 : index
    %c0_0 = arith.constant 0 : index
    %0 = vector.load %arg0[%c0, %c0_0] : memref<32x128xf32, #tpu.memory_space<vmem>>, vector<16x128xf32>
    %c16 = arith.constant 16 : index
    %c0_1 = arith.constant 0 : index
    %1 = vector.load %arg0[%c16, %c0_1] : memref<32x128xf32, #tpu.memory_space<vmem>>, vector<12x128xf32>
    %c28 = arith.constant 28 : index
    %c0_2 = arith.constant 0 : index
    %2 = vector.load %arg0[%c28, %c0_2] : memref<32x128xf32, #tpu.memory_space<vmem>>, vector<2x8xf32>
    %c0_3 = arith.constant 0 : index
    %c0_4 = arith.constant 0 : index
    %3 = vector.load %arg1[%c0_3, %c0_4] : memref<488x288xf32, #tpu.memory_space<vmem>>, vector<64x288xf32>
    %c64 = arith.constant 64 : index
    %c0_5 = arith.constant 0 : index
    %4 = vector.load %arg1[%c64, %c0_5] : memref<488x288xf32, #tpu.memory_space<vmem>>, vector<64x288xf32>
    %c128 = arith.constant 128 : index
    %c0_6 = arith.constant 0 : index
    %5 = vector.load %arg1[%c128, %c0_6] : memref<488x288xf32, #tpu.memory_space<vmem>>, vector<1x288xf32>
    %c129 = arith.constant 129 : index
    %c0_7 = arith.constant 0 : index
    %6 = vector.load %arg1[%c129, %c0_7] : memref<488x288xf32, #tpu.memory_space<vmem>>, vector<1x288xf32>
    %c130 = arith.constant 130 : index
    %c0_8 = arith.constant 0 : index
    %7 = vector.load %arg1[%c130, %c0_8] : memref<488x288xf32, #tpu.memory_space<vmem>>, vector<1x96xf32>
    %c131 = arith.constant 131 : index
    %c0_9 = arith.constant 0 : index
    %8 = vector.load %arg1[%c131, %c0_9] : memref<488x288xf32, #tpu.memory_space<vmem>>, vector<1x96xf32>
    %c132 = arith.constant 132 : index
    %c0_10 = arith.constant 0 : index
    %9 = vector.load %arg1[%c132, %c0_10] : memref<488x288xf32, #tpu.memory_space<vmem>>, vector<1x128xf32>
    %c136 = arith.constant 136 : index
    %c0_11 = arith.constant 0 : index
    %10 = vector.load %arg1[%c136, %c0_11] : memref<488x288xf32, #tpu.memory_space<vmem>>, vector<128x96xf32>
    %c264 = arith.constant 264 : index
    %c0_12 = arith.constant 0 : index
    %11 = vector.load %arg1[%c264, %c0_12] : memref<488x288xf32, #tpu.memory_space<vmem>>, vector<128x96xf32>
    %c392 = arith.constant 392 : index
    %c0_13 = arith.constant 0 : index
    %12 = vector.load %arg1[%c392, %c0_13] : memref<488x288xf32, #tpu.memory_space<vmem>>, vector<32x96xf32>
    %c424 = arith.constant 424 : index
    %c0_14 = arith.constant 0 : index
    %13 = vector.load %arg1[%c424, %c0_14] : memref<488x288xf32, #tpu.memory_space<vmem>>, vector<32x128xf32>
    %c456 = arith.constant 456 : index
    %c0_15 = arith.constant 0 : index
    %14 = vector.load %arg1[%c456, %c0_15] : memref<488x288xf32, #tpu.memory_space<vmem>>, vector<32x128xf32>
    %cst = arith.constant dense<0.000000e+00> : vector<16x96xf32>
    %15 = tpu.matmul %0, %10, %cst {dimension_numbers = #tpu.dot_dimension_numbers<[1], [0], [0], [1], [0, 0, 1, 1], [], []>} : vector<16x128xf32>, vector<128x96xf32>, vector<16x96xf32> -> vector<16x96xf32>
    %16 = vector.broadcast %7 : vector<1x96xf32> to vector<16x96xf32>
    %17 = arith.addf %15, %16 : vector<16x96xf32>
    %cst_16 = arith.constant dense<0.000000e+00> : vector<12x96xf32>
    %18 = tpu.matmul %1, %11, %cst_16 {dimension_numbers = #tpu.dot_dimension_numbers<[1], [0], [0], [1], [0, 0, 1, 1], [], []>} : vector<12x128xf32>, vector<128x96xf32>, vector<12x96xf32> -> vector<12x96xf32>
    %cst_17 = arith.constant 0.000000e+00 : f32
    %19 = vector.broadcast %cst_17 : f32 to vector<2x32xf32>
    %20 = vector.shape_cast %5 : vector<1x288xf32> to vector<1x288xf32>
    %21 = vector.broadcast %20 : vector<1x288xf32> to vector<2x288xf32>
    %22 = tpu.concatenate %19, %19 in 1 : vector<2x32xf32>, vector<2x32xf32> -> vector<2x64xf32>
    %cst_18 = arith.constant dense<0.000000e+00> : vector<2x288xf32>
    %23 = tpu.matmul %22, %3, %cst_18 {dimension_numbers = #tpu.dot_dimension_numbers<[1], [0], [0], [1], [0, 0, 1, 1], [], []>} : vector<2x64xf32>, vector<64x288xf32>, vector<2x288xf32> -> vector<2x288xf32>
    %24 = arith.addf %23, %21 : vector<2x288xf32>
    %25 = vector.extract_strided_slice %17 {offsets = [0, 0], sizes = [2, 96], strides = [1, 1]} : vector<16x96xf32> to vector<2x96xf32>
    %26 = vector.extract_strided_slice %24 {offsets = [0, 0], sizes = [2, 96], strides = [1, 1]} : vector<2x288xf32> to vector<2x96xf32>
    %27 = vector.extract_strided_slice %25 {offsets = [0, 0], sizes = [2, 32], strides = [1, 1]} : vector<2x96xf32> to vector<2x32xf32>
    %28 = vector.extract_strided_slice %26 {offsets = [0, 0], sizes = [2, 32], strides = [1, 1]} : vector<2x96xf32> to vector<2x32xf32>
    %29 = arith.addf %27, %28 : vector<2x32xf32>
    %30 = arith.negf %29 : vector<2x32xf32>
    %31 = math.exp %30 : vector<2x32xf32>
    %cst_19 = arith.constant 1.000000e+00 : f32
    %32 = vector.broadcast %cst_19 : f32 to vector<2x32xf32>
    %33 = arith.addf %32, %31 : vector<2x32xf32>
    %34 = arith.divf %32, %33 : vector<2x32xf32>
    %35 = vector.extract_strided_slice %25 {offsets = [0, 32], sizes = [2, 32], strides = [1, 1]} : vector<2x96xf32> to vector<2x32xf32>
    %36 = vector.extract_strided_slice %26 {offsets = [0, 32], sizes = [2, 32], strides = [1, 1]} : vector<2x96xf32> to vector<2x32xf32>
    %37 = arith.addf %35, %36 : vector<2x32xf32>
    %38 = arith.negf %37 : vector<2x32xf32>
    %39 = math.exp %38 : vector<2x32xf32>
    %cst_20 = arith.constant 1.000000e+00 : f32
    %40 = vector.broadcast %cst_20 : f32 to vector<2x32xf32>
    %41 = arith.addf %40, %39 : vector<2x32xf32>
    %42 = arith.divf %40, %41 : vector<2x32xf32>
    %43 = vector.extract_strided_slice %25 {offsets = [0, 64], sizes = [2, 32], strides = [1, 1]} : vector<2x96xf32> to vector<2x32xf32>
    %44 = vector.extract_strided_slice %26 {offsets = [0, 64], sizes = [2, 32], strides = [1, 1]} : vector<2x96xf32> to vector<2x32xf32>
    %45 = arith.mulf %34, %44 : vector<2x32xf32>
    %46 = arith.addf %43, %45 : vector<2x32xf32>
    %47 = math.tanh %46 : vector<2x32xf32>
    %cst_21 = arith.constant 1.000000e+00 : f32
    %48 = vector.broadcast %cst_21 : f32 to vector<2x32xf32>
    %49 = arith.subf %48, %42 : vector<2x32xf32>
    %50 = arith.mulf %49, %47 : vector<2x32xf32>
    %51 = arith.mulf %42, %19 : vector<2x32xf32>
    %52 = arith.addf %50, %51 : vector<2x32xf32>
    %53 = tpu.concatenate %52, %19 in 1 : vector<2x32xf32>, vector<2x32xf32> -> vector<2x64xf32>
    %cst_22 = arith.constant dense<0.000000e+00> : vector<2x288xf32>
    %54 = tpu.matmul %53, %3, %cst_22 {dimension_numbers = #tpu.dot_dimension_numbers<[1], [0], [0], [1], [0, 0, 1, 1], [], []>} : vector<2x64xf32>, vector<64x288xf32>, vector<2x288xf32> -> vector<2x288xf32>
    %55 = arith.addf %54, %21 : vector<2x288xf32>
    %56 = vector.extract_strided_slice %55 {offsets = [0, 192], sizes = [2, 96], strides = [1, 1]} : vector<2x288xf32> to vector<2x96xf32>
    %57 = vector.extract_strided_slice %55 {offsets = [0, 96], sizes = [2, 96], strides = [1, 1]} : vector<2x288xf32> to vector<2x96xf32>
    %58 = vector.extract_strided_slice %56 {offsets = [0, 0], sizes = [2, 32], strides = [1, 1]} : vector<2x96xf32> to vector<2x32xf32>
    %59 = vector.extract_strided_slice %57 {offsets = [0, 0], sizes = [2, 32], strides = [1, 1]} : vector<2x96xf32> to vector<2x32xf32>
    %60 = arith.addf %58, %59 : vector<2x32xf32>
    %61 = arith.negf %60 : vector<2x32xf32>
    %62 = math.exp %61 : vector<2x32xf32>
    %cst_23 = arith.constant 1.000000e+00 : f32
    %63 = vector.broadcast %cst_23 : f32 to vector<2x32xf32>
    %64 = arith.addf %63, %62 : vector<2x32xf32>
    %65 = arith.divf %63, %64 : vector<2x32xf32>
    %66 = vector.extract_strided_slice %56 {offsets = [0, 32], sizes = [2, 32], strides = [1, 1]} : vector<2x96xf32> to vector<2x32xf32>
    %67 = vector.extract_strided_slice %57 {offsets = [0, 32], sizes = [2, 32], strides = [1, 1]} : vector<2x96xf32> to vector<2x32xf32>
    %68 = arith.addf %66, %67 : vector<2x32xf32>
    %69 = arith.negf %68 : vector<2x32xf32>
    %70 = math.exp %69 : vector<2x32xf32>
    %cst_24 = arith.constant 1.000000e+00 : f32
    %71 = vector.broadcast %cst_24 : f32 to vector<2x32xf32>
    %72 = arith.addf %71, %70 : vector<2x32xf32>
    %73 = arith.divf %71, %72 : vector<2x32xf32>
    %74 = vector.extract_strided_slice %56 {offsets = [0, 64], sizes = [2, 32], strides = [1, 1]} : vector<2x96xf32> to vector<2x32xf32>
    %75 = vector.extract_strided_slice %57 {offsets = [0, 64], sizes = [2, 32], strides = [1, 1]} : vector<2x96xf32> to vector<2x32xf32>
    %76 = arith.mulf %65, %75 : vector<2x32xf32>
    %77 = arith.addf %74, %76 : vector<2x32xf32>
    %78 = math.tanh %77 : vector<2x32xf32>
    %cst_25 = arith.constant 1.000000e+00 : f32
    %79 = vector.broadcast %cst_25 : f32 to vector<2x32xf32>
    %80 = arith.subf %79, %73 : vector<2x32xf32>
    %81 = arith.mulf %80, %78 : vector<2x32xf32>
    %82 = arith.mulf %73, %19 : vector<2x32xf32>
    %83 = arith.addf %81, %82 : vector<2x32xf32>
    %84 = vector.extract_strided_slice %17 {offsets = [2, 0], sizes = [2, 96], strides = [1, 1]} : vector<16x96xf32> to vector<2x96xf32>
    %85 = vector.extract_strided_slice %55 {offsets = [0, 0], sizes = [2, 96], strides = [1, 1]} : vector<2x288xf32> to vector<2x96xf32>
    %86 = vector.extract_strided_slice %84 {offsets = [0, 0], sizes = [2, 32], strides = [1, 1]} : vector<2x96xf32> to vector<2x32xf32>
    %87 = vector.extract_strided_slice %85 {offsets = [0, 0], sizes = [2, 32], strides = [1, 1]} : vector<2x96xf32> to vector<2x32xf32>
    %88 = arith.addf %86, %87 : vector<2x32xf32>
    %89 = arith.negf %88 : vector<2x32xf32>
    %90 = math.exp %89 : vector<2x32xf32>
    %cst_26 = arith.constant 1.000000e+00 : f32
    %91 = vector.broadcast %cst_26 : f32 to vector<2x32xf32>
    %92 = arith.addf %91, %90 : vector<2x32xf32>
    %93 = arith.divf %91, %92 : vector<2x32xf32>
    %94 = vector.extract_strided_slice %84 {offsets = [0, 32], sizes = [2, 32], strides = [1, 1]} : vector<2x96xf32> to vector<2x32xf32>
    %95 = vector.extract_strided_slice %85 {offsets = [0, 32], sizes = [2, 32], strides = [1, 1]} : vector<2x96xf32> to vector<2x32xf32>
    %96 = arith.addf %94, %95 : vector<2x32xf32>
    %97 = arith.negf %96 : vector<2x32xf32>
    %98 = math.exp %97 : vector<2x32xf32>
    %cst_27 = arith.constant 1.000000e+00 : f32
    %99 = vector.broadcast %cst_27 : f32 to vector<2x32xf32>
    %100 = arith.addf %99, %98 : vector<2x32xf32>
    %101 = arith.divf %99, %100 : vector<2x32xf32>
    %102 = vector.extract_strided_slice %84 {offsets = [0, 64], sizes = [2, 32], strides = [1, 1]} : vector<2x96xf32> to vector<2x32xf32>
    %103 = vector.extract_strided_slice %85 {offsets = [0, 64], sizes = [2, 32], strides = [1, 1]} : vector<2x96xf32> to vector<2x32xf32>
    %104 = arith.mulf %93, %103 : vector<2x32xf32>
    %105 = arith.addf %102, %104 : vector<2x32xf32>
    %106 = math.tanh %105 : vector<2x32xf32>
    %cst_28 = arith.constant 1.000000e+00 : f32
    %107 = vector.broadcast %cst_28 : f32 to vector<2x32xf32>
    %108 = arith.subf %107, %101 : vector<2x32xf32>
    %109 = arith.mulf %108, %106 : vector<2x32xf32>
    %110 = arith.mulf %101, %52 : vector<2x32xf32>
    %111 = arith.addf %109, %110 : vector<2x32xf32>
    %112 = tpu.concatenate %111, %83 in 1 : vector<2x32xf32>, vector<2x32xf32> -> vector<2x64xf32>
    %cst_29 = arith.constant dense<0.000000e+00> : vector<2x288xf32>
    %113 = tpu.matmul %112, %3, %cst_29 {dimension_numbers = #tpu.dot_dimension_numbers<[1], [0], [0], [1], [0, 0, 1, 1], [], []>} : vector<2x64xf32>, vector<64x288xf32>, vector<2x288xf32> -> vector<2x288xf32>
    %114 = arith.addf %113, %21 : vector<2x288xf32>
    %115 = vector.extract_strided_slice %114 {offsets = [0, 192], sizes = [2, 96], strides = [1, 1]} : vector<2x288xf32> to vector<2x96xf32>
    %116 = vector.extract_strided_slice %114 {offsets = [0, 96], sizes = [2, 96], strides = [1, 1]} : vector<2x288xf32> to vector<2x96xf32>
    %117 = vector.extract_strided_slice %115 {offsets = [0, 0], sizes = [2, 32], strides = [1, 1]} : vector<2x96xf32> to vector<2x32xf32>
    %118 = vector.extract_strided_slice %116 {offsets = [0, 0], sizes = [2, 32], strides = [1, 1]} : vector<2x96xf32> to vector<2x32xf32>
    %119 = arith.addf %117, %118 : vector<2x32xf32>
    %120 = arith.negf %119 : vector<2x32xf32>
    %121 = math.exp %120 : vector<2x32xf32>
    %cst_30 = arith.constant 1.000000e+00 : f32
    %122 = vector.broadcast %cst_30 : f32 to vector<2x32xf32>
    %123 = arith.addf %122, %121 : vector<2x32xf32>
    %124 = arith.divf %122, %123 : vector<2x32xf32>
    %125 = vector.extract_strided_slice %115 {offsets = [0, 32], sizes = [2, 32], strides = [1, 1]} : vector<2x96xf32> to vector<2x32xf32>
    %126 = vector.extract_strided_slice %116 {offsets = [0, 32], sizes = [2, 32], strides = [1, 1]} : vector<2x96xf32> to vector<2x32xf32>
    %127 = arith.addf %125, %126 : vector<2x32xf32>
    %128 = arith.negf %127 : vector<2x32xf32>
    %129 = math.exp %128 : vector<2x32xf32>
    %cst_31 = arith.constant 1.000000e+00 : f32
    %130 = vector.broadcast %cst_31 : f32 to vector<2x32xf32>
    %131 = arith.addf %130, %129 : vector<2x32xf32>
    %132 = arith.divf %130, %131 : vector<2x32xf32>
    %133 = vector.extract_strided_slice %115 {offsets = [0, 64], sizes = [2, 32], strides = [1, 1]} : vector<2x96xf32> to vector<2x32xf32>
    %134 = vector.extract_strided_slice %116 {offsets = [0, 64], sizes = [2, 32], strides = [1, 1]} : vector<2x96xf32> to vector<2x32xf32>
    %135 = arith.mulf %124, %134 : vector<2x32xf32>
    %136 = arith.addf %133, %135 : vector<2x32xf32>
    %137 = math.tanh %136 : vector<2x32xf32>
    %cst_32 = arith.constant 1.000000e+00 : f32
    %138 = vector.broadcast %cst_32 : f32 to vector<2x32xf32>
    %139 = arith.subf %138, %132 : vector<2x32xf32>
    %140 = arith.mulf %139, %137 : vector<2x32xf32>
    %141 = arith.mulf %132, %83 : vector<2x32xf32>
    %142 = arith.addf %140, %141 : vector<2x32xf32>
    %143 = vector.extract_strided_slice %17 {offsets = [4, 0], sizes = [2, 96], strides = [1, 1]} : vector<16x96xf32> to vector<2x96xf32>
    %144 = vector.extract_strided_slice %114 {offsets = [0, 0], sizes = [2, 96], strides = [1, 1]} : vector<2x288xf32> to vector<2x96xf32>
    %145 = vector.extract_strided_slice %143 {offsets = [0, 0], sizes = [2, 32], strides = [1, 1]} : vector<2x96xf32> to vector<2x32xf32>
    %146 = vector.extract_strided_slice %144 {offsets = [0, 0], sizes = [2, 32], strides = [1, 1]} : vector<2x96xf32> to vector<2x32xf32>
    %147 = arith.addf %145, %146 : vector<2x32xf32>
    %148 = arith.negf %147 : vector<2x32xf32>
    %149 = math.exp %148 : vector<2x32xf32>
    %cst_33 = arith.constant 1.000000e+00 : f32
    %150 = vector.broadcast %cst_33 : f32 to vector<2x32xf32>
    %151 = arith.addf %150, %149 : vector<2x32xf32>
    %152 = arith.divf %150, %151 : vector<2x32xf32>
    %153 = vector.extract_strided_slice %143 {offsets = [0, 32], sizes = [2, 32], strides = [1, 1]} : vector<2x96xf32> to vector<2x32xf32>
    %154 = vector.extract_strided_slice %144 {offsets = [0, 32], sizes = [2, 32], strides = [1, 1]} : vector<2x96xf32> to vector<2x32xf32>
    %155 = arith.addf %153, %154 : vector<2x32xf32>
    %156 = arith.negf %155 : vector<2x32xf32>
    %157 = math.exp %156 : vector<2x32xf32>
    %cst_34 = arith.constant 1.000000e+00 : f32
    %158 = vector.broadcast %cst_34 : f32 to vector<2x32xf32>
    %159 = arith.addf %158, %157 : vector<2x32xf32>
    %160 = arith.divf %158, %159 : vector<2x32xf32>
    %161 = vector.extract_strided_slice %143 {offsets = [0, 64], sizes = [2, 32], strides = [1, 1]} : vector<2x96xf32> to vector<2x32xf32>
    %162 = vector.extract_strided_slice %144 {offsets = [0, 64], sizes = [2, 32], strides = [1, 1]} : vector<2x96xf32> to vector<2x32xf32>
    %163 = arith.mulf %152, %162 : vector<2x32xf32>
    %164 = arith.addf %161, %163 : vector<2x32xf32>
    %165 = math.tanh %164 : vector<2x32xf32>
    %cst_35 = arith.constant 1.000000e+00 : f32
    %166 = vector.broadcast %cst_35 : f32 to vector<2x32xf32>
    %167 = arith.subf %166, %160 : vector<2x32xf32>
    %168 = arith.mulf %167, %165 : vector<2x32xf32>
    %169 = arith.mulf %160, %111 : vector<2x32xf32>
    %170 = arith.addf %168, %169 : vector<2x32xf32>
    %171 = tpu.concatenate %170, %142 in 1 : vector<2x32xf32>, vector<2x32xf32> -> vector<2x64xf32>
    %cst_36 = arith.constant dense<0.000000e+00> : vector<2x288xf32>
    %172 = tpu.matmul %171, %3, %cst_36 {dimension_numbers = #tpu.dot_dimension_numbers<[1], [0], [0], [1], [0, 0, 1, 1], [], []>} : vector<2x64xf32>, vector<64x288xf32>, vector<2x288xf32> -> vector<2x288xf32>
    %173 = arith.addf %172, %21 : vector<2x288xf32>
    %174 = vector.extract_strided_slice %173 {offsets = [0, 192], sizes = [2, 96], strides = [1, 1]} : vector<2x288xf32> to vector<2x96xf32>
    %175 = vector.extract_strided_slice %173 {offsets = [0, 96], sizes = [2, 96], strides = [1, 1]} : vector<2x288xf32> to vector<2x96xf32>
    %176 = vector.extract_strided_slice %174 {offsets = [0, 0], sizes = [2, 32], strides = [1, 1]} : vector<2x96xf32> to vector<2x32xf32>
    %177 = vector.extract_strided_slice %175 {offsets = [0, 0], sizes = [2, 32], strides = [1, 1]} : vector<2x96xf32> to vector<2x32xf32>
    %178 = arith.addf %176, %177 : vector<2x32xf32>
    %179 = arith.negf %178 : vector<2x32xf32>
    %180 = math.exp %179 : vector<2x32xf32>
    %cst_37 = arith.constant 1.000000e+00 : f32
    %181 = vector.broadcast %cst_37 : f32 to vector<2x32xf32>
    %182 = arith.addf %181, %180 : vector<2x32xf32>
    %183 = arith.divf %181, %182 : vector<2x32xf32>
    %184 = vector.extract_strided_slice %174 {offsets = [0, 32], sizes = [2, 32], strides = [1, 1]} : vector<2x96xf32> to vector<2x32xf32>
    %185 = vector.extract_strided_slice %175 {offsets = [0, 32], sizes = [2, 32], strides = [1, 1]} : vector<2x96xf32> to vector<2x32xf32>
    %186 = arith.addf %184, %185 : vector<2x32xf32>
    %187 = arith.negf %186 : vector<2x32xf32>
    %188 = math.exp %187 : vector<2x32xf32>
    %cst_38 = arith.constant 1.000000e+00 : f32
    %189 = vector.broadcast %cst_38 : f32 to vector<2x32xf32>
    %190 = arith.addf %189, %188 : vector<2x32xf32>
    %191 = arith.divf %189, %190 : vector<2x32xf32>
    %192 = vector.extract_strided_slice %174 {offsets = [0, 64], sizes = [2, 32], strides = [1, 1]} : vector<2x96xf32> to vector<2x32xf32>
    %193 = vector.extract_strided_slice %175 {offsets = [0, 64], sizes = [2, 32], strides = [1, 1]} : vector<2x96xf32> to vector<2x32xf32>
    %194 = arith.mulf %183, %193 : vector<2x32xf32>
    %195 = arith.addf %192, %194 : vector<2x32xf32>
    %196 = math.tanh %195 : vector<2x32xf32>
    %cst_39 = arith.constant 1.000000e+00 : f32
    %197 = vector.broadcast %cst_39 : f32 to vector<2x32xf32>
    %198 = arith.subf %197, %191 : vector<2x32xf32>
    %199 = arith.mulf %198, %196 : vector<2x32xf32>
    %200 = arith.mulf %191, %142 : vector<2x32xf32>
    %201 = arith.addf %199, %200 : vector<2x32xf32>
    %202 = vector.extract_strided_slice %17 {offsets = [6, 0], sizes = [2, 96], strides = [1, 1]} : vector<16x96xf32> to vector<2x96xf32>
    %203 = vector.extract_strided_slice %173 {offsets = [0, 0], sizes = [2, 96], strides = [1, 1]} : vector<2x288xf32> to vector<2x96xf32>
    %204 = vector.extract_strided_slice %202 {offsets = [0, 0], sizes = [2, 32], strides = [1, 1]} : vector<2x96xf32> to vector<2x32xf32>
    %205 = vector.extract_strided_slice %203 {offsets = [0, 0], sizes = [2, 32], strides = [1, 1]} : vector<2x96xf32> to vector<2x32xf32>
    %206 = arith.addf %204, %205 : vector<2x32xf32>
    %207 = arith.negf %206 : vector<2x32xf32>
    %208 = math.exp %207 : vector<2x32xf32>
    %cst_40 = arith.constant 1.000000e+00 : f32
    %209 = vector.broadcast %cst_40 : f32 to vector<2x32xf32>
    %210 = arith.addf %209, %208 : vector<2x32xf32>
    %211 = arith.divf %209, %210 : vector<2x32xf32>
    %212 = vector.extract_strided_slice %202 {offsets = [0, 32], sizes = [2, 32], strides = [1, 1]} : vector<2x96xf32> to vector<2x32xf32>
    %213 = vector.extract_strided_slice %203 {offsets = [0, 32], sizes = [2, 32], strides = [1, 1]} : vector<2x96xf32> to vector<2x32xf32>
    %214 = arith.addf %212, %213 : vector<2x32xf32>
    %215 = arith.negf %214 : vector<2x32xf32>
    %216 = math.exp %215 : vector<2x32xf32>
    %cst_41 = arith.constant 1.000000e+00 : f32
    %217 = vector.broadcast %cst_41 : f32 to vector<2x32xf32>
    %218 = arith.addf %217, %216 : vector<2x32xf32>
    %219 = arith.divf %217, %218 : vector<2x32xf32>
    %220 = vector.extract_strided_slice %202 {offsets = [0, 64], sizes = [2, 32], strides = [1, 1]} : vector<2x96xf32> to vector<2x32xf32>
    %221 = vector.extract_strided_slice %203 {offsets = [0, 64], sizes = [2, 32], strides = [1, 1]} : vector<2x96xf32> to vector<2x32xf32>
    %222 = arith.mulf %211, %221 : vector<2x32xf32>
    %223 = arith.addf %220, %222 : vector<2x32xf32>
    %224 = math.tanh %223 : vector<2x32xf32>
    %cst_42 = arith.constant 1.000000e+00 : f32
    %225 = vector.broadcast %cst_42 : f32 to vector<2x32xf32>
    %226 = arith.subf %225, %219 : vector<2x32xf32>
    %227 = arith.mulf %226, %224 : vector<2x32xf32>
    %228 = arith.mulf %219, %170 : vector<2x32xf32>
    %229 = arith.addf %227, %228 : vector<2x32xf32>
    %230 = tpu.concatenate %229, %201 in 1 : vector<2x32xf32>, vector<2x32xf32> -> vector<2x64xf32>
    %cst_43 = arith.constant dense<0.000000e+00> : vector<2x288xf32>
    %231 = tpu.matmul %230, %3, %cst_43 {dimension_numbers = #tpu.dot_dimension_numbers<[1], [0], [0], [1], [0, 0, 1, 1], [], []>} : vector<2x64xf32>, vector<64x288xf32>, vector<2x288xf32> -> vector<2x288xf32>
    %232 = arith.addf %231, %21 : vector<2x288xf32>
    %233 = vector.extract_strided_slice %232 {offsets = [0, 192], sizes = [2, 96], strides = [1, 1]} : vector<2x288xf32> to vector<2x96xf32>
    %234 = vector.extract_strided_slice %232 {offsets = [0, 96], sizes = [2, 96], strides = [1, 1]} : vector<2x288xf32> to vector<2x96xf32>
    %235 = vector.extract_strided_slice %233 {offsets = [0, 0], sizes = [2, 32], strides = [1, 1]} : vector<2x96xf32> to vector<2x32xf32>
    %236 = vector.extract_strided_slice %234 {offsets = [0, 0], sizes = [2, 32], strides = [1, 1]} : vector<2x96xf32> to vector<2x32xf32>
    %237 = arith.addf %235, %236 : vector<2x32xf32>
    %238 = arith.negf %237 : vector<2x32xf32>
    %239 = math.exp %238 : vector<2x32xf32>
    %cst_44 = arith.constant 1.000000e+00 : f32
    %240 = vector.broadcast %cst_44 : f32 to vector<2x32xf32>
    %241 = arith.addf %240, %239 : vector<2x32xf32>
    %242 = arith.divf %240, %241 : vector<2x32xf32>
    %243 = vector.extract_strided_slice %233 {offsets = [0, 32], sizes = [2, 32], strides = [1, 1]} : vector<2x96xf32> to vector<2x32xf32>
    %244 = vector.extract_strided_slice %234 {offsets = [0, 32], sizes = [2, 32], strides = [1, 1]} : vector<2x96xf32> to vector<2x32xf32>
    %245 = arith.addf %243, %244 : vector<2x32xf32>
    %246 = arith.negf %245 : vector<2x32xf32>
    %247 = math.exp %246 : vector<2x32xf32>
    %cst_45 = arith.constant 1.000000e+00 : f32
    %248 = vector.broadcast %cst_45 : f32 to vector<2x32xf32>
    %249 = arith.addf %248, %247 : vector<2x32xf32>
    %250 = arith.divf %248, %249 : vector<2x32xf32>
    %251 = vector.extract_strided_slice %233 {offsets = [0, 64], sizes = [2, 32], strides = [1, 1]} : vector<2x96xf32> to vector<2x32xf32>
    %252 = vector.extract_strided_slice %234 {offsets = [0, 64], sizes = [2, 32], strides = [1, 1]} : vector<2x96xf32> to vector<2x32xf32>
    %253 = arith.mulf %242, %252 : vector<2x32xf32>
    %254 = arith.addf %251, %253 : vector<2x32xf32>
    %255 = math.tanh %254 : vector<2x32xf32>
    %cst_46 = arith.constant 1.000000e+00 : f32
    %256 = vector.broadcast %cst_46 : f32 to vector<2x32xf32>
    %257 = arith.subf %256, %250 : vector<2x32xf32>
    %258 = arith.mulf %257, %255 : vector<2x32xf32>
    %259 = arith.mulf %250, %201 : vector<2x32xf32>
    %260 = arith.addf %258, %259 : vector<2x32xf32>
    %261 = vector.extract_strided_slice %17 {offsets = [8, 0], sizes = [2, 96], strides = [1, 1]} : vector<16x96xf32> to vector<2x96xf32>
    %262 = vector.extract_strided_slice %232 {offsets = [0, 0], sizes = [2, 96], strides = [1, 1]} : vector<2x288xf32> to vector<2x96xf32>
    %263 = vector.extract_strided_slice %261 {offsets = [0, 0], sizes = [2, 32], strides = [1, 1]} : vector<2x96xf32> to vector<2x32xf32>
    %264 = vector.extract_strided_slice %262 {offsets = [0, 0], sizes = [2, 32], strides = [1, 1]} : vector<2x96xf32> to vector<2x32xf32>
    %265 = arith.addf %263, %264 : vector<2x32xf32>
    %266 = arith.negf %265 : vector<2x32xf32>
    %267 = math.exp %266 : vector<2x32xf32>
    %cst_47 = arith.constant 1.000000e+00 : f32
    %268 = vector.broadcast %cst_47 : f32 to vector<2x32xf32>
    %269 = arith.addf %268, %267 : vector<2x32xf32>
    %270 = arith.divf %268, %269 : vector<2x32xf32>
    %271 = vector.extract_strided_slice %261 {offsets = [0, 32], sizes = [2, 32], strides = [1, 1]} : vector<2x96xf32> to vector<2x32xf32>
    %272 = vector.extract_strided_slice %262 {offsets = [0, 32], sizes = [2, 32], strides = [1, 1]} : vector<2x96xf32> to vector<2x32xf32>
    %273 = arith.addf %271, %272 : vector<2x32xf32>
    %274 = arith.negf %273 : vector<2x32xf32>
    %275 = math.exp %274 : vector<2x32xf32>
    %cst_48 = arith.constant 1.000000e+00 : f32
    %276 = vector.broadcast %cst_48 : f32 to vector<2x32xf32>
    %277 = arith.addf %276, %275 : vector<2x32xf32>
    %278 = arith.divf %276, %277 : vector<2x32xf32>
    %279 = vector.extract_strided_slice %261 {offsets = [0, 64], sizes = [2, 32], strides = [1, 1]} : vector<2x96xf32> to vector<2x32xf32>
    %280 = vector.extract_strided_slice %262 {offsets = [0, 64], sizes = [2, 32], strides = [1, 1]} : vector<2x96xf32> to vector<2x32xf32>
    %281 = arith.mulf %270, %280 : vector<2x32xf32>
    %282 = arith.addf %279, %281 : vector<2x32xf32>
    %283 = math.tanh %282 : vector<2x32xf32>
    %cst_49 = arith.constant 1.000000e+00 : f32
    %284 = vector.broadcast %cst_49 : f32 to vector<2x32xf32>
    %285 = arith.subf %284, %278 : vector<2x32xf32>
    %286 = arith.mulf %285, %283 : vector<2x32xf32>
    %287 = arith.mulf %278, %229 : vector<2x32xf32>
    %288 = arith.addf %286, %287 : vector<2x32xf32>
    %289 = tpu.concatenate %288, %260 in 1 : vector<2x32xf32>, vector<2x32xf32> -> vector<2x64xf32>
    %cst_50 = arith.constant dense<0.000000e+00> : vector<2x288xf32>
    %290 = tpu.matmul %289, %3, %cst_50 {dimension_numbers = #tpu.dot_dimension_numbers<[1], [0], [0], [1], [0, 0, 1, 1], [], []>} : vector<2x64xf32>, vector<64x288xf32>, vector<2x288xf32> -> vector<2x288xf32>
    %291 = arith.addf %290, %21 : vector<2x288xf32>
    %292 = vector.extract_strided_slice %291 {offsets = [0, 192], sizes = [2, 96], strides = [1, 1]} : vector<2x288xf32> to vector<2x96xf32>
    %293 = vector.extract_strided_slice %291 {offsets = [0, 96], sizes = [2, 96], strides = [1, 1]} : vector<2x288xf32> to vector<2x96xf32>
    %294 = vector.extract_strided_slice %292 {offsets = [0, 0], sizes = [2, 32], strides = [1, 1]} : vector<2x96xf32> to vector<2x32xf32>
    %295 = vector.extract_strided_slice %293 {offsets = [0, 0], sizes = [2, 32], strides = [1, 1]} : vector<2x96xf32> to vector<2x32xf32>
    %296 = arith.addf %294, %295 : vector<2x32xf32>
    %297 = arith.negf %296 : vector<2x32xf32>
    %298 = math.exp %297 : vector<2x32xf32>
    %cst_51 = arith.constant 1.000000e+00 : f32
    %299 = vector.broadcast %cst_51 : f32 to vector<2x32xf32>
    %300 = arith.addf %299, %298 : vector<2x32xf32>
    %301 = arith.divf %299, %300 : vector<2x32xf32>
    %302 = vector.extract_strided_slice %292 {offsets = [0, 32], sizes = [2, 32], strides = [1, 1]} : vector<2x96xf32> to vector<2x32xf32>
    %303 = vector.extract_strided_slice %293 {offsets = [0, 32], sizes = [2, 32], strides = [1, 1]} : vector<2x96xf32> to vector<2x32xf32>
    %304 = arith.addf %302, %303 : vector<2x32xf32>
    %305 = arith.negf %304 : vector<2x32xf32>
    %306 = math.exp %305 : vector<2x32xf32>
    %cst_52 = arith.constant 1.000000e+00 : f32
    %307 = vector.broadcast %cst_52 : f32 to vector<2x32xf32>
    %308 = arith.addf %307, %306 : vector<2x32xf32>
    %309 = arith.divf %307, %308 : vector<2x32xf32>
    %310 = vector.extract_strided_slice %292 {offsets = [0, 64], sizes = [2, 32], strides = [1, 1]} : vector<2x96xf32> to vector<2x32xf32>
    %311 = vector.extract_strided_slice %293 {offsets = [0, 64], sizes = [2, 32], strides = [1, 1]} : vector<2x96xf32> to vector<2x32xf32>
    %312 = arith.mulf %301, %311 : vector<2x32xf32>
    %313 = arith.addf %310, %312 : vector<2x32xf32>
    %314 = math.tanh %313 : vector<2x32xf32>
    %cst_53 = arith.constant 1.000000e+00 : f32
    %315 = vector.broadcast %cst_53 : f32 to vector<2x32xf32>
    %316 = arith.subf %315, %309 : vector<2x32xf32>
    %317 = arith.mulf %316, %314 : vector<2x32xf32>
    %318 = arith.mulf %309, %260 : vector<2x32xf32>
    %319 = arith.addf %317, %318 : vector<2x32xf32>
    %320 = vector.extract_strided_slice %17 {offsets = [10, 0], sizes = [2, 96], strides = [1, 1]} : vector<16x96xf32> to vector<2x96xf32>
    %321 = vector.extract_strided_slice %291 {offsets = [0, 0], sizes = [2, 96], strides = [1, 1]} : vector<2x288xf32> to vector<2x96xf32>
    %322 = vector.extract_strided_slice %320 {offsets = [0, 0], sizes = [2, 32], strides = [1, 1]} : vector<2x96xf32> to vector<2x32xf32>
    %323 = vector.extract_strided_slice %321 {offsets = [0, 0], sizes = [2, 32], strides = [1, 1]} : vector<2x96xf32> to vector<2x32xf32>
    %324 = arith.addf %322, %323 : vector<2x32xf32>
    %325 = arith.negf %324 : vector<2x32xf32>
    %326 = math.exp %325 : vector<2x32xf32>
    %cst_54 = arith.constant 1.000000e+00 : f32
    %327 = vector.broadcast %cst_54 : f32 to vector<2x32xf32>
    %328 = arith.addf %327, %326 : vector<2x32xf32>
    %329 = arith.divf %327, %328 : vector<2x32xf32>
    %330 = vector.extract_strided_slice %320 {offsets = [0, 32], sizes = [2, 32], strides = [1, 1]} : vector<2x96xf32> to vector<2x32xf32>
    %331 = vector.extract_strided_slice %321 {offsets = [0, 32], sizes = [2, 32], strides = [1, 1]} : vector<2x96xf32> to vector<2x32xf32>
    %332 = arith.addf %330, %331 : vector<2x32xf32>
    %333 = arith.negf %332 : vector<2x32xf32>
    %334 = math.exp %333 : vector<2x32xf32>
    %cst_55 = arith.constant 1.000000e+00 : f32
    %335 = vector.broadcast %cst_55 : f32 to vector<2x32xf32>
    %336 = arith.addf %335, %334 : vector<2x32xf32>
    %337 = arith.divf %335, %336 : vector<2x32xf32>
    %338 = vector.extract_strided_slice %320 {offsets = [0, 64], sizes = [2, 32], strides = [1, 1]} : vector<2x96xf32> to vector<2x32xf32>
    %339 = vector.extract_strided_slice %321 {offsets = [0, 64], sizes = [2, 32], strides = [1, 1]} : vector<2x96xf32> to vector<2x32xf32>
    %340 = arith.mulf %329, %339 : vector<2x32xf32>
    %341 = arith.addf %338, %340 : vector<2x32xf32>
    %342 = math.tanh %341 : vector<2x32xf32>
    %cst_56 = arith.constant 1.000000e+00 : f32
    %343 = vector.broadcast %cst_56 : f32 to vector<2x32xf32>
    %344 = arith.subf %343, %337 : vector<2x32xf32>
    %345 = arith.mulf %344, %342 : vector<2x32xf32>
    %346 = arith.mulf %337, %288 : vector<2x32xf32>
    %347 = arith.addf %345, %346 : vector<2x32xf32>
    %348 = tpu.concatenate %347, %319 in 1 : vector<2x32xf32>, vector<2x32xf32> -> vector<2x64xf32>
    %cst_57 = arith.constant dense<0.000000e+00> : vector<2x288xf32>
    %349 = tpu.matmul %348, %3, %cst_57 {dimension_numbers = #tpu.dot_dimension_numbers<[1], [0], [0], [1], [0, 0, 1, 1], [], []>} : vector<2x64xf32>, vector<64x288xf32>, vector<2x288xf32> -> vector<2x288xf32>
    %350 = arith.addf %349, %21 : vector<2x288xf32>
    %351 = vector.extract_strided_slice %350 {offsets = [0, 192], sizes = [2, 96], strides = [1, 1]} : vector<2x288xf32> to vector<2x96xf32>
    %352 = vector.extract_strided_slice %350 {offsets = [0, 96], sizes = [2, 96], strides = [1, 1]} : vector<2x288xf32> to vector<2x96xf32>
    %353 = vector.extract_strided_slice %351 {offsets = [0, 0], sizes = [2, 32], strides = [1, 1]} : vector<2x96xf32> to vector<2x32xf32>
    %354 = vector.extract_strided_slice %352 {offsets = [0, 0], sizes = [2, 32], strides = [1, 1]} : vector<2x96xf32> to vector<2x32xf32>
    %355 = arith.addf %353, %354 : vector<2x32xf32>
    %356 = arith.negf %355 : vector<2x32xf32>
    %357 = math.exp %356 : vector<2x32xf32>
    %cst_58 = arith.constant 1.000000e+00 : f32
    %358 = vector.broadcast %cst_58 : f32 to vector<2x32xf32>
    %359 = arith.addf %358, %357 : vector<2x32xf32>
    %360 = arith.divf %358, %359 : vector<2x32xf32>
    %361 = vector.extract_strided_slice %351 {offsets = [0, 32], sizes = [2, 32], strides = [1, 1]} : vector<2x96xf32> to vector<2x32xf32>
    %362 = vector.extract_strided_slice %352 {offsets = [0, 32], sizes = [2, 32], strides = [1, 1]} : vector<2x96xf32> to vector<2x32xf32>
    %363 = arith.addf %361, %362 : vector<2x32xf32>
    %364 = arith.negf %363 : vector<2x32xf32>
    %365 = math.exp %364 : vector<2x32xf32>
    %cst_59 = arith.constant 1.000000e+00 : f32
    %366 = vector.broadcast %cst_59 : f32 to vector<2x32xf32>
    %367 = arith.addf %366, %365 : vector<2x32xf32>
    %368 = arith.divf %366, %367 : vector<2x32xf32>
    %369 = vector.extract_strided_slice %351 {offsets = [0, 64], sizes = [2, 32], strides = [1, 1]} : vector<2x96xf32> to vector<2x32xf32>
    %370 = vector.extract_strided_slice %352 {offsets = [0, 64], sizes = [2, 32], strides = [1, 1]} : vector<2x96xf32> to vector<2x32xf32>
    %371 = arith.mulf %360, %370 : vector<2x32xf32>
    %372 = arith.addf %369, %371 : vector<2x32xf32>
    %373 = math.tanh %372 : vector<2x32xf32>
    %cst_60 = arith.constant 1.000000e+00 : f32
    %374 = vector.broadcast %cst_60 : f32 to vector<2x32xf32>
    %375 = arith.subf %374, %368 : vector<2x32xf32>
    %376 = arith.mulf %375, %373 : vector<2x32xf32>
    %377 = arith.mulf %368, %319 : vector<2x32xf32>
    %378 = arith.addf %376, %377 : vector<2x32xf32>
    %379 = vector.extract_strided_slice %17 {offsets = [12, 0], sizes = [2, 96], strides = [1, 1]} : vector<16x96xf32> to vector<2x96xf32>
    %380 = vector.extract_strided_slice %350 {offsets = [0, 0], sizes = [2, 96], strides = [1, 1]} : vector<2x288xf32> to vector<2x96xf32>
    %381 = vector.extract_strided_slice %379 {offsets = [0, 0], sizes = [2, 32], strides = [1, 1]} : vector<2x96xf32> to vector<2x32xf32>
    %382 = vector.extract_strided_slice %380 {offsets = [0, 0], sizes = [2, 32], strides = [1, 1]} : vector<2x96xf32> to vector<2x32xf32>
    %383 = arith.addf %381, %382 : vector<2x32xf32>
    %384 = arith.negf %383 : vector<2x32xf32>
    %385 = math.exp %384 : vector<2x32xf32>
    %cst_61 = arith.constant 1.000000e+00 : f32
    %386 = vector.broadcast %cst_61 : f32 to vector<2x32xf32>
    %387 = arith.addf %386, %385 : vector<2x32xf32>
    %388 = arith.divf %386, %387 : vector<2x32xf32>
    %389 = vector.extract_strided_slice %379 {offsets = [0, 32], sizes = [2, 32], strides = [1, 1]} : vector<2x96xf32> to vector<2x32xf32>
    %390 = vector.extract_strided_slice %380 {offsets = [0, 32], sizes = [2, 32], strides = [1, 1]} : vector<2x96xf32> to vector<2x32xf32>
    %391 = arith.addf %389, %390 : vector<2x32xf32>
    %392 = arith.negf %391 : vector<2x32xf32>
    %393 = math.exp %392 : vector<2x32xf32>
    %cst_62 = arith.constant 1.000000e+00 : f32
    %394 = vector.broadcast %cst_62 : f32 to vector<2x32xf32>
    %395 = arith.addf %394, %393 : vector<2x32xf32>
    %396 = arith.divf %394, %395 : vector<2x32xf32>
    %397 = vector.extract_strided_slice %379 {offsets = [0, 64], sizes = [2, 32], strides = [1, 1]} : vector<2x96xf32> to vector<2x32xf32>
    %398 = vector.extract_strided_slice %380 {offsets = [0, 64], sizes = [2, 32], strides = [1, 1]} : vector<2x96xf32> to vector<2x32xf32>
    %399 = arith.mulf %388, %398 : vector<2x32xf32>
    %400 = arith.addf %397, %399 : vector<2x32xf32>
    %401 = math.tanh %400 : vector<2x32xf32>
    %cst_63 = arith.constant 1.000000e+00 : f32
    %402 = vector.broadcast %cst_63 : f32 to vector<2x32xf32>
    %403 = arith.subf %402, %396 : vector<2x32xf32>
    %404 = arith.mulf %403, %401 : vector<2x32xf32>
    %405 = arith.mulf %396, %347 : vector<2x32xf32>
    %406 = arith.addf %404, %405 : vector<2x32xf32>
    %407 = tpu.concatenate %406, %378 in 1 : vector<2x32xf32>, vector<2x32xf32> -> vector<2x64xf32>
    %cst_64 = arith.constant dense<0.000000e+00> : vector<2x288xf32>
    %408 = tpu.matmul %407, %3, %cst_64 {dimension_numbers = #tpu.dot_dimension_numbers<[1], [0], [0], [1], [0, 0, 1, 1], [], []>} : vector<2x64xf32>, vector<64x288xf32>, vector<2x288xf32> -> vector<2x288xf32>
    %409 = arith.addf %408, %21 : vector<2x288xf32>
    %410 = vector.extract_strided_slice %409 {offsets = [0, 192], sizes = [2, 96], strides = [1, 1]} : vector<2x288xf32> to vector<2x96xf32>
    %411 = vector.extract_strided_slice %409 {offsets = [0, 96], sizes = [2, 96], strides = [1, 1]} : vector<2x288xf32> to vector<2x96xf32>
    %412 = vector.extract_strided_slice %410 {offsets = [0, 0], sizes = [2, 32], strides = [1, 1]} : vector<2x96xf32> to vector<2x32xf32>
    %413 = vector.extract_strided_slice %411 {offsets = [0, 0], sizes = [2, 32], strides = [1, 1]} : vector<2x96xf32> to vector<2x32xf32>
    %414 = arith.addf %412, %413 : vector<2x32xf32>
    %415 = arith.negf %414 : vector<2x32xf32>
    %416 = math.exp %415 : vector<2x32xf32>
    %cst_65 = arith.constant 1.000000e+00 : f32
    %417 = vector.broadcast %cst_65 : f32 to vector<2x32xf32>
    %418 = arith.addf %417, %416 : vector<2x32xf32>
    %419 = arith.divf %417, %418 : vector<2x32xf32>
    %420 = vector.extract_strided_slice %410 {offsets = [0, 32], sizes = [2, 32], strides = [1, 1]} : vector<2x96xf32> to vector<2x32xf32>
    %421 = vector.extract_strided_slice %411 {offsets = [0, 32], sizes = [2, 32], strides = [1, 1]} : vector<2x96xf32> to vector<2x32xf32>
    %422 = arith.addf %420, %421 : vector<2x32xf32>
    %423 = arith.negf %422 : vector<2x32xf32>
    %424 = math.exp %423 : vector<2x32xf32>
    %cst_66 = arith.constant 1.000000e+00 : f32
    %425 = vector.broadcast %cst_66 : f32 to vector<2x32xf32>
    %426 = arith.addf %425, %424 : vector<2x32xf32>
    %427 = arith.divf %425, %426 : vector<2x32xf32>
    %428 = vector.extract_strided_slice %410 {offsets = [0, 64], sizes = [2, 32], strides = [1, 1]} : vector<2x96xf32> to vector<2x32xf32>
    %429 = vector.extract_strided_slice %411 {offsets = [0, 64], sizes = [2, 32], strides = [1, 1]} : vector<2x96xf32> to vector<2x32xf32>
    %430 = arith.mulf %419, %429 : vector<2x32xf32>
    %431 = arith.addf %428, %430 : vector<2x32xf32>
    %432 = math.tanh %431 : vector<2x32xf32>
    %cst_67 = arith.constant 1.000000e+00 : f32
    %433 = vector.broadcast %cst_67 : f32 to vector<2x32xf32>
    %434 = arith.subf %433, %427 : vector<2x32xf32>
    %435 = arith.mulf %434, %432 : vector<2x32xf32>
    %436 = arith.mulf %427, %378 : vector<2x32xf32>
    %437 = arith.addf %435, %436 : vector<2x32xf32>
    %438 = vector.extract_strided_slice %17 {offsets = [14, 0], sizes = [2, 96], strides = [1, 1]} : vector<16x96xf32> to vector<2x96xf32>
    %439 = vector.extract_strided_slice %409 {offsets = [0, 0], sizes = [2, 96], strides = [1, 1]} : vector<2x288xf32> to vector<2x96xf32>
    %440 = vector.extract_strided_slice %438 {offsets = [0, 0], sizes = [2, 32], strides = [1, 1]} : vector<2x96xf32> to vector<2x32xf32>
    %441 = vector.extract_strided_slice %439 {offsets = [0, 0], sizes = [2, 32], strides = [1, 1]} : vector<2x96xf32> to vector<2x32xf32>
    %442 = arith.addf %440, %441 : vector<2x32xf32>
    %443 = arith.negf %442 : vector<2x32xf32>
    %444 = math.exp %443 : vector<2x32xf32>
    %cst_68 = arith.constant 1.000000e+00 : f32
    %445 = vector.broadcast %cst_68 : f32 to vector<2x32xf32>
    %446 = arith.addf %445, %444 : vector<2x32xf32>
    %447 = arith.divf %445, %446 : vector<2x32xf32>
    %448 = vector.extract_strided_slice %438 {offsets = [0, 32], sizes = [2, 32], strides = [1, 1]} : vector<2x96xf32> to vector<2x32xf32>
    %449 = vector.extract_strided_slice %439 {offsets = [0, 32], sizes = [2, 32], strides = [1, 1]} : vector<2x96xf32> to vector<2x32xf32>
    %450 = arith.addf %448, %449 : vector<2x32xf32>
    %451 = arith.negf %450 : vector<2x32xf32>
    %452 = math.exp %451 : vector<2x32xf32>
    %cst_69 = arith.constant 1.000000e+00 : f32
    %453 = vector.broadcast %cst_69 : f32 to vector<2x32xf32>
    %454 = arith.addf %453, %452 : vector<2x32xf32>
    %455 = arith.divf %453, %454 : vector<2x32xf32>
    %456 = vector.extract_strided_slice %438 {offsets = [0, 64], sizes = [2, 32], strides = [1, 1]} : vector<2x96xf32> to vector<2x32xf32>
    %457 = vector.extract_strided_slice %439 {offsets = [0, 64], sizes = [2, 32], strides = [1, 1]} : vector<2x96xf32> to vector<2x32xf32>
    %458 = arith.mulf %447, %457 : vector<2x32xf32>
    %459 = arith.addf %456, %458 : vector<2x32xf32>
    %460 = math.tanh %459 : vector<2x32xf32>
    %cst_70 = arith.constant 1.000000e+00 : f32
    %461 = vector.broadcast %cst_70 : f32 to vector<2x32xf32>
    %462 = arith.subf %461, %455 : vector<2x32xf32>
    %463 = arith.mulf %462, %460 : vector<2x32xf32>
    %464 = arith.mulf %455, %406 : vector<2x32xf32>
    %465 = arith.addf %463, %464 : vector<2x32xf32>
    %466 = tpu.concatenate %465, %437 in 1 : vector<2x32xf32>, vector<2x32xf32> -> vector<2x64xf32>
    %cst_71 = arith.constant dense<0.000000e+00> : vector<2x288xf32>
    %467 = tpu.matmul %466, %3, %cst_71 {dimension_numbers = #tpu.dot_dimension_numbers<[1], [0], [0], [1], [0, 0, 1, 1], [], []>} : vector<2x64xf32>, vector<64x288xf32>, vector<2x288xf32> -> vector<2x288xf32>
    %468 = arith.addf %467, %21 : vector<2x288xf32>
    %469 = vector.extract_strided_slice %468 {offsets = [0, 192], sizes = [2, 96], strides = [1, 1]} : vector<2x288xf32> to vector<2x96xf32>
    %470 = vector.extract_strided_slice %468 {offsets = [0, 96], sizes = [2, 96], strides = [1, 1]} : vector<2x288xf32> to vector<2x96xf32>
    %471 = vector.extract_strided_slice %469 {offsets = [0, 0], sizes = [2, 32], strides = [1, 1]} : vector<2x96xf32> to vector<2x32xf32>
    %472 = vector.extract_strided_slice %470 {offsets = [0, 0], sizes = [2, 32], strides = [1, 1]} : vector<2x96xf32> to vector<2x32xf32>
    %473 = arith.addf %471, %472 : vector<2x32xf32>
    %474 = arith.negf %473 : vector<2x32xf32>
    %475 = math.exp %474 : vector<2x32xf32>
    %cst_72 = arith.constant 1.000000e+00 : f32
    %476 = vector.broadcast %cst_72 : f32 to vector<2x32xf32>
    %477 = arith.addf %476, %475 : vector<2x32xf32>
    %478 = arith.divf %476, %477 : vector<2x32xf32>
    %479 = vector.extract_strided_slice %469 {offsets = [0, 32], sizes = [2, 32], strides = [1, 1]} : vector<2x96xf32> to vector<2x32xf32>
    %480 = vector.extract_strided_slice %470 {offsets = [0, 32], sizes = [2, 32], strides = [1, 1]} : vector<2x96xf32> to vector<2x32xf32>
    %481 = arith.addf %479, %480 : vector<2x32xf32>
    %482 = arith.negf %481 : vector<2x32xf32>
    %483 = math.exp %482 : vector<2x32xf32>
    %cst_73 = arith.constant 1.000000e+00 : f32
    %484 = vector.broadcast %cst_73 : f32 to vector<2x32xf32>
    %485 = arith.addf %484, %483 : vector<2x32xf32>
    %486 = arith.divf %484, %485 : vector<2x32xf32>
    %487 = vector.extract_strided_slice %469 {offsets = [0, 64], sizes = [2, 32], strides = [1, 1]} : vector<2x96xf32> to vector<2x32xf32>
    %488 = vector.extract_strided_slice %470 {offsets = [0, 64], sizes = [2, 32], strides = [1, 1]} : vector<2x96xf32> to vector<2x32xf32>
    %489 = arith.mulf %478, %488 : vector<2x32xf32>
    %490 = arith.addf %487, %489 : vector<2x32xf32>
    %491 = math.tanh %490 : vector<2x32xf32>
    %cst_74 = arith.constant 1.000000e+00 : f32
    %492 = vector.broadcast %cst_74 : f32 to vector<2x32xf32>
    %493 = arith.subf %492, %486 : vector<2x32xf32>
    %494 = arith.mulf %493, %491 : vector<2x32xf32>
    %495 = arith.mulf %486, %437 : vector<2x32xf32>
    %496 = arith.addf %494, %495 : vector<2x32xf32>
    %497 = tpu.concatenate %83, %142, %201, %260, %319, %378, %437, %496 in 0 : vector<2x32xf32>, vector<2x32xf32>, vector<2x32xf32>, vector<2x32xf32>, vector<2x32xf32>, vector<2x32xf32>, vector<2x32xf32>, vector<2x32xf32> -> vector<16x32xf32>
    %cst_75 = arith.constant dense<0.000000e+00> : vector<16x128xf32>
    %498 = tpu.matmul %497, %14, %cst_75 {dimension_numbers = #tpu.dot_dimension_numbers<[1], [0], [0], [1], [0, 0, 1, 1], [], []>} : vector<16x32xf32>, vector<32x128xf32>, vector<16x128xf32> -> vector<16x128xf32>
    %499 = vector.extract_strided_slice %498 {offsets = [0, 0], sizes = [2, 1], strides = [1, 1]} : vector<16x128xf32> to vector<2x1xf32>
    %500 = vector.extract_strided_slice %498 {offsets = [2, 0], sizes = [2, 1], strides = [1, 1]} : vector<16x128xf32> to vector<2x1xf32>
    %501 = vector.extract_strided_slice %498 {offsets = [4, 0], sizes = [2, 1], strides = [1, 1]} : vector<16x128xf32> to vector<2x1xf32>
    %502 = vector.extract_strided_slice %498 {offsets = [6, 0], sizes = [2, 1], strides = [1, 1]} : vector<16x128xf32> to vector<2x1xf32>
    %503 = vector.extract_strided_slice %498 {offsets = [8, 0], sizes = [2, 1], strides = [1, 1]} : vector<16x128xf32> to vector<2x1xf32>
    %504 = vector.extract_strided_slice %498 {offsets = [10, 0], sizes = [2, 1], strides = [1, 1]} : vector<16x128xf32> to vector<2x1xf32>
    %505 = vector.extract_strided_slice %498 {offsets = [12, 0], sizes = [2, 1], strides = [1, 1]} : vector<16x128xf32> to vector<2x1xf32>
    %506 = vector.extract_strided_slice %498 {offsets = [14, 0], sizes = [2, 1], strides = [1, 1]} : vector<16x128xf32> to vector<2x1xf32>
    %507 = tpu.concatenate %499, %500, %501, %502, %503, %504, %505, %506 in 1 : vector<2x1xf32>, vector<2x1xf32>, vector<2x1xf32>, vector<2x1xf32>, vector<2x1xf32>, vector<2x1xf32>, vector<2x1xf32>, vector<2x1xf32> -> vector<2x8xf32>
    %cst_76 = arith.constant 5.000000e-01 : f32
    %508 = vector.broadcast %cst_76 : f32 to vector<2x8xf32>
    %509 = arith.cmpf ogt, %2, %508 : vector<2x8xf32>
    %cst_77 = arith.constant -1.000000e+09 : f32
    %510 = vector.broadcast %cst_77 : f32 to vector<2x8xf32>
    %511 = arith.select %509, %507, %510 : vector<2x8xi1>, vector<2x8xf32>
    %cst_78 = arith.constant dense<0xFF800000> : vector<2xf32>
    %512 = vector.multi_reduction <maximumf>, %511, %cst_78 [1] : vector<2x8xf32> to vector<2xf32>
    %513 = vector.shape_cast %512 : vector<2xf32> to vector<2x1xf32>
    %514 = vector.broadcast %513 : vector<2x1xf32> to vector<2x8xf32>
    %515 = arith.subf %511, %514 : vector<2x8xf32>
    %516 = math.exp %515 : vector<2x8xf32>
    %cst_79 = arith.constant dense<0.000000e+00> : vector<2xf32>
    %517 = vector.multi_reduction <add>, %516, %cst_79 [1] : vector<2x8xf32> to vector<2xf32>
    %518 = vector.shape_cast %517 : vector<2xf32> to vector<2x1xf32>
    %519 = vector.broadcast %518 : vector<2x1xf32> to vector<2x8xf32>
    %520 = arith.divf %516, %519 : vector<2x8xf32>
    %521 = vector.extract_strided_slice %520 {offsets = [0, 0], sizes = [2, 1], strides = [1, 1]} : vector<2x8xf32> to vector<2x1xf32>
    %522 = vector.broadcast %521 : vector<2x1xf32> to vector<2x32xf32>
    %523 = arith.mulf %522, %83 : vector<2x32xf32>
    %524 = vector.extract_strided_slice %520 {offsets = [0, 1], sizes = [2, 1], strides = [1, 1]} : vector<2x8xf32> to vector<2x1xf32>
    %525 = vector.broadcast %524 : vector<2x1xf32> to vector<2x32xf32>
    %526 = arith.mulf %525, %142 : vector<2x32xf32>
    %527 = vector.extract_strided_slice %520 {offsets = [0, 2], sizes = [2, 1], strides = [1, 1]} : vector<2x8xf32> to vector<2x1xf32>
    %528 = vector.broadcast %527 : vector<2x1xf32> to vector<2x32xf32>
    %529 = arith.mulf %528, %201 : vector<2x32xf32>
    %530 = vector.extract_strided_slice %520 {offsets = [0, 3], sizes = [2, 1], strides = [1, 1]} : vector<2x8xf32> to vector<2x1xf32>
    %531 = vector.broadcast %530 : vector<2x1xf32> to vector<2x32xf32>
    %532 = arith.mulf %531, %260 : vector<2x32xf32>
    %533 = vector.extract_strided_slice %520 {offsets = [0, 4], sizes = [2, 1], strides = [1, 1]} : vector<2x8xf32> to vector<2x1xf32>
    %534 = vector.broadcast %533 : vector<2x1xf32> to vector<2x32xf32>
    %535 = arith.mulf %534, %319 : vector<2x32xf32>
    %536 = vector.extract_strided_slice %520 {offsets = [0, 5], sizes = [2, 1], strides = [1, 1]} : vector<2x8xf32> to vector<2x1xf32>
    %537 = vector.broadcast %536 : vector<2x1xf32> to vector<2x32xf32>
    %538 = arith.mulf %537, %378 : vector<2x32xf32>
    %539 = vector.extract_strided_slice %520 {offsets = [0, 6], sizes = [2, 1], strides = [1, 1]} : vector<2x8xf32> to vector<2x1xf32>
    %540 = vector.broadcast %539 : vector<2x1xf32> to vector<2x32xf32>
    %541 = arith.mulf %540, %437 : vector<2x32xf32>
    %542 = vector.extract_strided_slice %520 {offsets = [0, 7], sizes = [2, 1], strides = [1, 1]} : vector<2x8xf32> to vector<2x1xf32>
    %543 = vector.broadcast %542 : vector<2x1xf32> to vector<2x32xf32>
    %544 = arith.mulf %543, %496 : vector<2x32xf32>
    %545 = arith.addf %523, %526 : vector<2x32xf32>
    %546 = arith.addf %529, %532 : vector<2x32xf32>
    %547 = arith.addf %535, %538 : vector<2x32xf32>
    %548 = arith.addf %541, %544 : vector<2x32xf32>
    %549 = arith.addf %545, %546 : vector<2x32xf32>
    %550 = arith.addf %547, %548 : vector<2x32xf32>
    %551 = arith.addf %549, %550 : vector<2x32xf32>
    %cst_80 = arith.constant dense<0.000000e+00> : vector<2x96xf32>
    %552 = tpu.matmul %551, %12, %cst_80 {dimension_numbers = #tpu.dot_dimension_numbers<[1], [0], [0], [1], [0, 0, 1, 1], [], []>} : vector<2x32xf32>, vector<32x96xf32>, vector<2x96xf32> -> vector<2x96xf32>
    %553 = vector.broadcast %8 : vector<1x96xf32> to vector<2x96xf32>
    %554 = arith.addf %552, %553 : vector<2x96xf32>
    %555 = vector.shape_cast %6 : vector<1x288xf32> to vector<1x288xf32>
    %556 = vector.broadcast %555 : vector<1x288xf32> to vector<2x288xf32>
    %557 = tpu.concatenate %465, %496 in 1 : vector<2x32xf32>, vector<2x32xf32> -> vector<2x64xf32>
    %cst_81 = arith.constant dense<0.000000e+00> : vector<2x288xf32>
    %558 = tpu.matmul %557, %4, %cst_81 {dimension_numbers = #tpu.dot_dimension_numbers<[1], [0], [0], [1], [0, 0, 1, 1], [], []>} : vector<2x64xf32>, vector<64x288xf32>, vector<2x288xf32> -> vector<2x288xf32>
    %559 = arith.addf %558, %556 : vector<2x288xf32>
    %560 = vector.extract_strided_slice %18 {offsets = [0, 0], sizes = [2, 96], strides = [1, 1]} : vector<12x96xf32> to vector<2x96xf32>
    %561 = arith.addf %560, %554 : vector<2x96xf32>
    %562 = vector.extract_strided_slice %559 {offsets = [0, 0], sizes = [2, 96], strides = [1, 1]} : vector<2x288xf32> to vector<2x96xf32>
    %563 = vector.extract_strided_slice %561 {offsets = [0, 0], sizes = [2, 32], strides = [1, 1]} : vector<2x96xf32> to vector<2x32xf32>
    %564 = vector.extract_strided_slice %562 {offsets = [0, 0], sizes = [2, 32], strides = [1, 1]} : vector<2x96xf32> to vector<2x32xf32>
    %565 = arith.addf %563, %564 : vector<2x32xf32>
    %566 = arith.negf %565 : vector<2x32xf32>
    %567 = math.exp %566 : vector<2x32xf32>
    %cst_82 = arith.constant 1.000000e+00 : f32
    %568 = vector.broadcast %cst_82 : f32 to vector<2x32xf32>
    %569 = arith.addf %568, %567 : vector<2x32xf32>
    %570 = arith.divf %568, %569 : vector<2x32xf32>
    %571 = vector.extract_strided_slice %561 {offsets = [0, 32], sizes = [2, 32], strides = [1, 1]} : vector<2x96xf32> to vector<2x32xf32>
    %572 = vector.extract_strided_slice %562 {offsets = [0, 32], sizes = [2, 32], strides = [1, 1]} : vector<2x96xf32> to vector<2x32xf32>
    %573 = arith.addf %571, %572 : vector<2x32xf32>
    %574 = arith.negf %573 : vector<2x32xf32>
    %575 = math.exp %574 : vector<2x32xf32>
    %cst_83 = arith.constant 1.000000e+00 : f32
    %576 = vector.broadcast %cst_83 : f32 to vector<2x32xf32>
    %577 = arith.addf %576, %575 : vector<2x32xf32>
    %578 = arith.divf %576, %577 : vector<2x32xf32>
    %579 = vector.extract_strided_slice %561 {offsets = [0, 64], sizes = [2, 32], strides = [1, 1]} : vector<2x96xf32> to vector<2x32xf32>
    %580 = vector.extract_strided_slice %562 {offsets = [0, 64], sizes = [2, 32], strides = [1, 1]} : vector<2x96xf32> to vector<2x32xf32>
    %581 = arith.mulf %570, %580 : vector<2x32xf32>
    %582 = arith.addf %579, %581 : vector<2x32xf32>
    %583 = math.tanh %582 : vector<2x32xf32>
    %cst_84 = arith.constant 1.000000e+00 : f32
    %584 = vector.broadcast %cst_84 : f32 to vector<2x32xf32>
    %585 = arith.subf %584, %578 : vector<2x32xf32>
    %586 = arith.mulf %585, %583 : vector<2x32xf32>
    %587 = arith.mulf %578, %465 : vector<2x32xf32>
    %588 = arith.addf %586, %587 : vector<2x32xf32>
    %589 = tpu.concatenate %588, %496 in 1 : vector<2x32xf32>, vector<2x32xf32> -> vector<2x64xf32>
    %cst_85 = arith.constant dense<0.000000e+00> : vector<2x288xf32>
    %590 = tpu.matmul %589, %4, %cst_85 {dimension_numbers = #tpu.dot_dimension_numbers<[1], [0], [0], [1], [0, 0, 1, 1], [], []>} : vector<2x64xf32>, vector<64x288xf32>, vector<2x288xf32> -> vector<2x288xf32>
    %591 = arith.addf %590, %556 : vector<2x288xf32>
    %592 = vector.extract_strided_slice %591 {offsets = [0, 192], sizes = [2, 96], strides = [1, 1]} : vector<2x288xf32> to vector<2x96xf32>
    %593 = vector.extract_strided_slice %591 {offsets = [0, 96], sizes = [2, 96], strides = [1, 1]} : vector<2x288xf32> to vector<2x96xf32>
    %594 = vector.extract_strided_slice %592 {offsets = [0, 0], sizes = [2, 32], strides = [1, 1]} : vector<2x96xf32> to vector<2x32xf32>
    %595 = vector.extract_strided_slice %593 {offsets = [0, 0], sizes = [2, 32], strides = [1, 1]} : vector<2x96xf32> to vector<2x32xf32>
    %596 = arith.addf %594, %595 : vector<2x32xf32>
    %597 = arith.negf %596 : vector<2x32xf32>
    %598 = math.exp %597 : vector<2x32xf32>
    %cst_86 = arith.constant 1.000000e+00 : f32
    %599 = vector.broadcast %cst_86 : f32 to vector<2x32xf32>
    %600 = arith.addf %599, %598 : vector<2x32xf32>
    %601 = arith.divf %599, %600 : vector<2x32xf32>
    %602 = vector.extract_strided_slice %592 {offsets = [0, 32], sizes = [2, 32], strides = [1, 1]} : vector<2x96xf32> to vector<2x32xf32>
    %603 = vector.extract_strided_slice %593 {offsets = [0, 32], sizes = [2, 32], strides = [1, 1]} : vector<2x96xf32> to vector<2x32xf32>
    %604 = arith.addf %602, %603 : vector<2x32xf32>
    %605 = arith.negf %604 : vector<2x32xf32>
    %606 = math.exp %605 : vector<2x32xf32>
    %cst_87 = arith.constant 1.000000e+00 : f32
    %607 = vector.broadcast %cst_87 : f32 to vector<2x32xf32>
    %608 = arith.addf %607, %606 : vector<2x32xf32>
    %609 = arith.divf %607, %608 : vector<2x32xf32>
    %610 = vector.extract_strided_slice %592 {offsets = [0, 64], sizes = [2, 32], strides = [1, 1]} : vector<2x96xf32> to vector<2x32xf32>
    %611 = vector.extract_strided_slice %593 {offsets = [0, 64], sizes = [2, 32], strides = [1, 1]} : vector<2x96xf32> to vector<2x32xf32>
    %612 = arith.mulf %601, %611 : vector<2x32xf32>
    %613 = arith.addf %610, %612 : vector<2x32xf32>
    %614 = math.tanh %613 : vector<2x32xf32>
    %cst_88 = arith.constant 1.000000e+00 : f32
    %615 = vector.broadcast %cst_88 : f32 to vector<2x32xf32>
    %616 = arith.subf %615, %609 : vector<2x32xf32>
    %617 = arith.mulf %616, %614 : vector<2x32xf32>
    %618 = arith.mulf %609, %496 : vector<2x32xf32>
    %619 = arith.addf %617, %618 : vector<2x32xf32>
    %620 = vector.extract_strided_slice %18 {offsets = [2, 0], sizes = [2, 96], strides = [1, 1]} : vector<12x96xf32> to vector<2x96xf32>
    %621 = arith.addf %620, %554 : vector<2x96xf32>
    %622 = vector.extract_strided_slice %591 {offsets = [0, 0], sizes = [2, 96], strides = [1, 1]} : vector<2x288xf32> to vector<2x96xf32>
    %623 = vector.extract_strided_slice %621 {offsets = [0, 0], sizes = [2, 32], strides = [1, 1]} : vector<2x96xf32> to vector<2x32xf32>
    %624 = vector.extract_strided_slice %622 {offsets = [0, 0], sizes = [2, 32], strides = [1, 1]} : vector<2x96xf32> to vector<2x32xf32>
    %625 = arith.addf %623, %624 : vector<2x32xf32>
    %626 = arith.negf %625 : vector<2x32xf32>
    %627 = math.exp %626 : vector<2x32xf32>
    %cst_89 = arith.constant 1.000000e+00 : f32
    %628 = vector.broadcast %cst_89 : f32 to vector<2x32xf32>
    %629 = arith.addf %628, %627 : vector<2x32xf32>
    %630 = arith.divf %628, %629 : vector<2x32xf32>
    %631 = vector.extract_strided_slice %621 {offsets = [0, 32], sizes = [2, 32], strides = [1, 1]} : vector<2x96xf32> to vector<2x32xf32>
    %632 = vector.extract_strided_slice %622 {offsets = [0, 32], sizes = [2, 32], strides = [1, 1]} : vector<2x96xf32> to vector<2x32xf32>
    %633 = arith.addf %631, %632 : vector<2x32xf32>
    %634 = arith.negf %633 : vector<2x32xf32>
    %635 = math.exp %634 : vector<2x32xf32>
    %cst_90 = arith.constant 1.000000e+00 : f32
    %636 = vector.broadcast %cst_90 : f32 to vector<2x32xf32>
    %637 = arith.addf %636, %635 : vector<2x32xf32>
    %638 = arith.divf %636, %637 : vector<2x32xf32>
    %639 = vector.extract_strided_slice %621 {offsets = [0, 64], sizes = [2, 32], strides = [1, 1]} : vector<2x96xf32> to vector<2x32xf32>
    %640 = vector.extract_strided_slice %622 {offsets = [0, 64], sizes = [2, 32], strides = [1, 1]} : vector<2x96xf32> to vector<2x32xf32>
    %641 = arith.mulf %630, %640 : vector<2x32xf32>
    %642 = arith.addf %639, %641 : vector<2x32xf32>
    %643 = math.tanh %642 : vector<2x32xf32>
    %cst_91 = arith.constant 1.000000e+00 : f32
    %644 = vector.broadcast %cst_91 : f32 to vector<2x32xf32>
    %645 = arith.subf %644, %638 : vector<2x32xf32>
    %646 = arith.mulf %645, %643 : vector<2x32xf32>
    %647 = arith.mulf %638, %588 : vector<2x32xf32>
    %648 = arith.addf %646, %647 : vector<2x32xf32>
    %649 = tpu.concatenate %648, %619 in 1 : vector<2x32xf32>, vector<2x32xf32> -> vector<2x64xf32>
    %cst_92 = arith.constant dense<0.000000e+00> : vector<2x288xf32>
    %650 = tpu.matmul %649, %4, %cst_92 {dimension_numbers = #tpu.dot_dimension_numbers<[1], [0], [0], [1], [0, 0, 1, 1], [], []>} : vector<2x64xf32>, vector<64x288xf32>, vector<2x288xf32> -> vector<2x288xf32>
    %651 = arith.addf %650, %556 : vector<2x288xf32>
    %652 = vector.extract_strided_slice %651 {offsets = [0, 192], sizes = [2, 96], strides = [1, 1]} : vector<2x288xf32> to vector<2x96xf32>
    %653 = vector.extract_strided_slice %651 {offsets = [0, 96], sizes = [2, 96], strides = [1, 1]} : vector<2x288xf32> to vector<2x96xf32>
    %654 = vector.extract_strided_slice %652 {offsets = [0, 0], sizes = [2, 32], strides = [1, 1]} : vector<2x96xf32> to vector<2x32xf32>
    %655 = vector.extract_strided_slice %653 {offsets = [0, 0], sizes = [2, 32], strides = [1, 1]} : vector<2x96xf32> to vector<2x32xf32>
    %656 = arith.addf %654, %655 : vector<2x32xf32>
    %657 = arith.negf %656 : vector<2x32xf32>
    %658 = math.exp %657 : vector<2x32xf32>
    %cst_93 = arith.constant 1.000000e+00 : f32
    %659 = vector.broadcast %cst_93 : f32 to vector<2x32xf32>
    %660 = arith.addf %659, %658 : vector<2x32xf32>
    %661 = arith.divf %659, %660 : vector<2x32xf32>
    %662 = vector.extract_strided_slice %652 {offsets = [0, 32], sizes = [2, 32], strides = [1, 1]} : vector<2x96xf32> to vector<2x32xf32>
    %663 = vector.extract_strided_slice %653 {offsets = [0, 32], sizes = [2, 32], strides = [1, 1]} : vector<2x96xf32> to vector<2x32xf32>
    %664 = arith.addf %662, %663 : vector<2x32xf32>
    %665 = arith.negf %664 : vector<2x32xf32>
    %666 = math.exp %665 : vector<2x32xf32>
    %cst_94 = arith.constant 1.000000e+00 : f32
    %667 = vector.broadcast %cst_94 : f32 to vector<2x32xf32>
    %668 = arith.addf %667, %666 : vector<2x32xf32>
    %669 = arith.divf %667, %668 : vector<2x32xf32>
    %670 = vector.extract_strided_slice %652 {offsets = [0, 64], sizes = [2, 32], strides = [1, 1]} : vector<2x96xf32> to vector<2x32xf32>
    %671 = vector.extract_strided_slice %653 {offsets = [0, 64], sizes = [2, 32], strides = [1, 1]} : vector<2x96xf32> to vector<2x32xf32>
    %672 = arith.mulf %661, %671 : vector<2x32xf32>
    %673 = arith.addf %670, %672 : vector<2x32xf32>
    %674 = math.tanh %673 : vector<2x32xf32>
    %cst_95 = arith.constant 1.000000e+00 : f32
    %675 = vector.broadcast %cst_95 : f32 to vector<2x32xf32>
    %676 = arith.subf %675, %669 : vector<2x32xf32>
    %677 = arith.mulf %676, %674 : vector<2x32xf32>
    %678 = arith.mulf %669, %619 : vector<2x32xf32>
    %679 = arith.addf %677, %678 : vector<2x32xf32>
    %680 = vector.extract_strided_slice %18 {offsets = [4, 0], sizes = [2, 96], strides = [1, 1]} : vector<12x96xf32> to vector<2x96xf32>
    %681 = arith.addf %680, %554 : vector<2x96xf32>
    %682 = vector.extract_strided_slice %651 {offsets = [0, 0], sizes = [2, 96], strides = [1, 1]} : vector<2x288xf32> to vector<2x96xf32>
    %683 = vector.extract_strided_slice %681 {offsets = [0, 0], sizes = [2, 32], strides = [1, 1]} : vector<2x96xf32> to vector<2x32xf32>
    %684 = vector.extract_strided_slice %682 {offsets = [0, 0], sizes = [2, 32], strides = [1, 1]} : vector<2x96xf32> to vector<2x32xf32>
    %685 = arith.addf %683, %684 : vector<2x32xf32>
    %686 = arith.negf %685 : vector<2x32xf32>
    %687 = math.exp %686 : vector<2x32xf32>
    %cst_96 = arith.constant 1.000000e+00 : f32
    %688 = vector.broadcast %cst_96 : f32 to vector<2x32xf32>
    %689 = arith.addf %688, %687 : vector<2x32xf32>
    %690 = arith.divf %688, %689 : vector<2x32xf32>
    %691 = vector.extract_strided_slice %681 {offsets = [0, 32], sizes = [2, 32], strides = [1, 1]} : vector<2x96xf32> to vector<2x32xf32>
    %692 = vector.extract_strided_slice %682 {offsets = [0, 32], sizes = [2, 32], strides = [1, 1]} : vector<2x96xf32> to vector<2x32xf32>
    %693 = arith.addf %691, %692 : vector<2x32xf32>
    %694 = arith.negf %693 : vector<2x32xf32>
    %695 = math.exp %694 : vector<2x32xf32>
    %cst_97 = arith.constant 1.000000e+00 : f32
    %696 = vector.broadcast %cst_97 : f32 to vector<2x32xf32>
    %697 = arith.addf %696, %695 : vector<2x32xf32>
    %698 = arith.divf %696, %697 : vector<2x32xf32>
    %699 = vector.extract_strided_slice %681 {offsets = [0, 64], sizes = [2, 32], strides = [1, 1]} : vector<2x96xf32> to vector<2x32xf32>
    %700 = vector.extract_strided_slice %682 {offsets = [0, 64], sizes = [2, 32], strides = [1, 1]} : vector<2x96xf32> to vector<2x32xf32>
    %701 = arith.mulf %690, %700 : vector<2x32xf32>
    %702 = arith.addf %699, %701 : vector<2x32xf32>
    %703 = math.tanh %702 : vector<2x32xf32>
    %cst_98 = arith.constant 1.000000e+00 : f32
    %704 = vector.broadcast %cst_98 : f32 to vector<2x32xf32>
    %705 = arith.subf %704, %698 : vector<2x32xf32>
    %706 = arith.mulf %705, %703 : vector<2x32xf32>
    %707 = arith.mulf %698, %648 : vector<2x32xf32>
    %708 = arith.addf %706, %707 : vector<2x32xf32>
    %709 = tpu.concatenate %708, %679 in 1 : vector<2x32xf32>, vector<2x32xf32> -> vector<2x64xf32>
    %cst_99 = arith.constant dense<0.000000e+00> : vector<2x288xf32>
    %710 = tpu.matmul %709, %4, %cst_99 {dimension_numbers = #tpu.dot_dimension_numbers<[1], [0], [0], [1], [0, 0, 1, 1], [], []>} : vector<2x64xf32>, vector<64x288xf32>, vector<2x288xf32> -> vector<2x288xf32>
    %711 = arith.addf %710, %556 : vector<2x288xf32>
    %712 = vector.extract_strided_slice %711 {offsets = [0, 192], sizes = [2, 96], strides = [1, 1]} : vector<2x288xf32> to vector<2x96xf32>
    %713 = vector.extract_strided_slice %711 {offsets = [0, 96], sizes = [2, 96], strides = [1, 1]} : vector<2x288xf32> to vector<2x96xf32>
    %714 = vector.extract_strided_slice %712 {offsets = [0, 0], sizes = [2, 32], strides = [1, 1]} : vector<2x96xf32> to vector<2x32xf32>
    %715 = vector.extract_strided_slice %713 {offsets = [0, 0], sizes = [2, 32], strides = [1, 1]} : vector<2x96xf32> to vector<2x32xf32>
    %716 = arith.addf %714, %715 : vector<2x32xf32>
    %717 = arith.negf %716 : vector<2x32xf32>
    %718 = math.exp %717 : vector<2x32xf32>
    %cst_100 = arith.constant 1.000000e+00 : f32
    %719 = vector.broadcast %cst_100 : f32 to vector<2x32xf32>
    %720 = arith.addf %719, %718 : vector<2x32xf32>
    %721 = arith.divf %719, %720 : vector<2x32xf32>
    %722 = vector.extract_strided_slice %712 {offsets = [0, 32], sizes = [2, 32], strides = [1, 1]} : vector<2x96xf32> to vector<2x32xf32>
    %723 = vector.extract_strided_slice %713 {offsets = [0, 32], sizes = [2, 32], strides = [1, 1]} : vector<2x96xf32> to vector<2x32xf32>
    %724 = arith.addf %722, %723 : vector<2x32xf32>
    %725 = arith.negf %724 : vector<2x32xf32>
    %726 = math.exp %725 : vector<2x32xf32>
    %cst_101 = arith.constant 1.000000e+00 : f32
    %727 = vector.broadcast %cst_101 : f32 to vector<2x32xf32>
    %728 = arith.addf %727, %726 : vector<2x32xf32>
    %729 = arith.divf %727, %728 : vector<2x32xf32>
    %730 = vector.extract_strided_slice %712 {offsets = [0, 64], sizes = [2, 32], strides = [1, 1]} : vector<2x96xf32> to vector<2x32xf32>
    %731 = vector.extract_strided_slice %713 {offsets = [0, 64], sizes = [2, 32], strides = [1, 1]} : vector<2x96xf32> to vector<2x32xf32>
    %732 = arith.mulf %721, %731 : vector<2x32xf32>
    %733 = arith.addf %730, %732 : vector<2x32xf32>
    %734 = math.tanh %733 : vector<2x32xf32>
    %cst_102 = arith.constant 1.000000e+00 : f32
    %735 = vector.broadcast %cst_102 : f32 to vector<2x32xf32>
    %736 = arith.subf %735, %729 : vector<2x32xf32>
    %737 = arith.mulf %736, %734 : vector<2x32xf32>
    %738 = arith.mulf %729, %679 : vector<2x32xf32>
    %739 = arith.addf %737, %738 : vector<2x32xf32>
    %740 = vector.extract_strided_slice %18 {offsets = [6, 0], sizes = [2, 96], strides = [1, 1]} : vector<12x96xf32> to vector<2x96xf32>
    %741 = arith.addf %740, %554 : vector<2x96xf32>
    %742 = vector.extract_strided_slice %711 {offsets = [0, 0], sizes = [2, 96], strides = [1, 1]} : vector<2x288xf32> to vector<2x96xf32>
    %743 = vector.extract_strided_slice %741 {offsets = [0, 0], sizes = [2, 32], strides = [1, 1]} : vector<2x96xf32> to vector<2x32xf32>
    %744 = vector.extract_strided_slice %742 {offsets = [0, 0], sizes = [2, 32], strides = [1, 1]} : vector<2x96xf32> to vector<2x32xf32>
    %745 = arith.addf %743, %744 : vector<2x32xf32>
    %746 = arith.negf %745 : vector<2x32xf32>
    %747 = math.exp %746 : vector<2x32xf32>
    %cst_103 = arith.constant 1.000000e+00 : f32
    %748 = vector.broadcast %cst_103 : f32 to vector<2x32xf32>
    %749 = arith.addf %748, %747 : vector<2x32xf32>
    %750 = arith.divf %748, %749 : vector<2x32xf32>
    %751 = vector.extract_strided_slice %741 {offsets = [0, 32], sizes = [2, 32], strides = [1, 1]} : vector<2x96xf32> to vector<2x32xf32>
    %752 = vector.extract_strided_slice %742 {offsets = [0, 32], sizes = [2, 32], strides = [1, 1]} : vector<2x96xf32> to vector<2x32xf32>
    %753 = arith.addf %751, %752 : vector<2x32xf32>
    %754 = arith.negf %753 : vector<2x32xf32>
    %755 = math.exp %754 : vector<2x32xf32>
    %cst_104 = arith.constant 1.000000e+00 : f32
    %756 = vector.broadcast %cst_104 : f32 to vector<2x32xf32>
    %757 = arith.addf %756, %755 : vector<2x32xf32>
    %758 = arith.divf %756, %757 : vector<2x32xf32>
    %759 = vector.extract_strided_slice %741 {offsets = [0, 64], sizes = [2, 32], strides = [1, 1]} : vector<2x96xf32> to vector<2x32xf32>
    %760 = vector.extract_strided_slice %742 {offsets = [0, 64], sizes = [2, 32], strides = [1, 1]} : vector<2x96xf32> to vector<2x32xf32>
    %761 = arith.mulf %750, %760 : vector<2x32xf32>
    %762 = arith.addf %759, %761 : vector<2x32xf32>
    %763 = math.tanh %762 : vector<2x32xf32>
    %cst_105 = arith.constant 1.000000e+00 : f32
    %764 = vector.broadcast %cst_105 : f32 to vector<2x32xf32>
    %765 = arith.subf %764, %758 : vector<2x32xf32>
    %766 = arith.mulf %765, %763 : vector<2x32xf32>
    %767 = arith.mulf %758, %708 : vector<2x32xf32>
    %768 = arith.addf %766, %767 : vector<2x32xf32>
    %769 = tpu.concatenate %768, %739 in 1 : vector<2x32xf32>, vector<2x32xf32> -> vector<2x64xf32>
    %cst_106 = arith.constant dense<0.000000e+00> : vector<2x288xf32>
    %770 = tpu.matmul %769, %4, %cst_106 {dimension_numbers = #tpu.dot_dimension_numbers<[1], [0], [0], [1], [0, 0, 1, 1], [], []>} : vector<2x64xf32>, vector<64x288xf32>, vector<2x288xf32> -> vector<2x288xf32>
    %771 = arith.addf %770, %556 : vector<2x288xf32>
    %772 = vector.extract_strided_slice %771 {offsets = [0, 192], sizes = [2, 96], strides = [1, 1]} : vector<2x288xf32> to vector<2x96xf32>
    %773 = vector.extract_strided_slice %771 {offsets = [0, 96], sizes = [2, 96], strides = [1, 1]} : vector<2x288xf32> to vector<2x96xf32>
    %774 = vector.extract_strided_slice %772 {offsets = [0, 0], sizes = [2, 32], strides = [1, 1]} : vector<2x96xf32> to vector<2x32xf32>
    %775 = vector.extract_strided_slice %773 {offsets = [0, 0], sizes = [2, 32], strides = [1, 1]} : vector<2x96xf32> to vector<2x32xf32>
    %776 = arith.addf %774, %775 : vector<2x32xf32>
    %777 = arith.negf %776 : vector<2x32xf32>
    %778 = math.exp %777 : vector<2x32xf32>
    %cst_107 = arith.constant 1.000000e+00 : f32
    %779 = vector.broadcast %cst_107 : f32 to vector<2x32xf32>
    %780 = arith.addf %779, %778 : vector<2x32xf32>
    %781 = arith.divf %779, %780 : vector<2x32xf32>
    %782 = vector.extract_strided_slice %772 {offsets = [0, 32], sizes = [2, 32], strides = [1, 1]} : vector<2x96xf32> to vector<2x32xf32>
    %783 = vector.extract_strided_slice %773 {offsets = [0, 32], sizes = [2, 32], strides = [1, 1]} : vector<2x96xf32> to vector<2x32xf32>
    %784 = arith.addf %782, %783 : vector<2x32xf32>
    %785 = arith.negf %784 : vector<2x32xf32>
    %786 = math.exp %785 : vector<2x32xf32>
    %cst_108 = arith.constant 1.000000e+00 : f32
    %787 = vector.broadcast %cst_108 : f32 to vector<2x32xf32>
    %788 = arith.addf %787, %786 : vector<2x32xf32>
    %789 = arith.divf %787, %788 : vector<2x32xf32>
    %790 = vector.extract_strided_slice %772 {offsets = [0, 64], sizes = [2, 32], strides = [1, 1]} : vector<2x96xf32> to vector<2x32xf32>
    %791 = vector.extract_strided_slice %773 {offsets = [0, 64], sizes = [2, 32], strides = [1, 1]} : vector<2x96xf32> to vector<2x32xf32>
    %792 = arith.mulf %781, %791 : vector<2x32xf32>
    %793 = arith.addf %790, %792 : vector<2x32xf32>
    %794 = math.tanh %793 : vector<2x32xf32>
    %cst_109 = arith.constant 1.000000e+00 : f32
    %795 = vector.broadcast %cst_109 : f32 to vector<2x32xf32>
    %796 = arith.subf %795, %789 : vector<2x32xf32>
    %797 = arith.mulf %796, %794 : vector<2x32xf32>
    %798 = arith.mulf %789, %739 : vector<2x32xf32>
    %799 = arith.addf %797, %798 : vector<2x32xf32>
    %800 = vector.extract_strided_slice %18 {offsets = [8, 0], sizes = [2, 96], strides = [1, 1]} : vector<12x96xf32> to vector<2x96xf32>
    %801 = arith.addf %800, %554 : vector<2x96xf32>
    %802 = vector.extract_strided_slice %771 {offsets = [0, 0], sizes = [2, 96], strides = [1, 1]} : vector<2x288xf32> to vector<2x96xf32>
    %803 = vector.extract_strided_slice %801 {offsets = [0, 0], sizes = [2, 32], strides = [1, 1]} : vector<2x96xf32> to vector<2x32xf32>
    %804 = vector.extract_strided_slice %802 {offsets = [0, 0], sizes = [2, 32], strides = [1, 1]} : vector<2x96xf32> to vector<2x32xf32>
    %805 = arith.addf %803, %804 : vector<2x32xf32>
    %806 = arith.negf %805 : vector<2x32xf32>
    %807 = math.exp %806 : vector<2x32xf32>
    %cst_110 = arith.constant 1.000000e+00 : f32
    %808 = vector.broadcast %cst_110 : f32 to vector<2x32xf32>
    %809 = arith.addf %808, %807 : vector<2x32xf32>
    %810 = arith.divf %808, %809 : vector<2x32xf32>
    %811 = vector.extract_strided_slice %801 {offsets = [0, 32], sizes = [2, 32], strides = [1, 1]} : vector<2x96xf32> to vector<2x32xf32>
    %812 = vector.extract_strided_slice %802 {offsets = [0, 32], sizes = [2, 32], strides = [1, 1]} : vector<2x96xf32> to vector<2x32xf32>
    %813 = arith.addf %811, %812 : vector<2x32xf32>
    %814 = arith.negf %813 : vector<2x32xf32>
    %815 = math.exp %814 : vector<2x32xf32>
    %cst_111 = arith.constant 1.000000e+00 : f32
    %816 = vector.broadcast %cst_111 : f32 to vector<2x32xf32>
    %817 = arith.addf %816, %815 : vector<2x32xf32>
    %818 = arith.divf %816, %817 : vector<2x32xf32>
    %819 = vector.extract_strided_slice %801 {offsets = [0, 64], sizes = [2, 32], strides = [1, 1]} : vector<2x96xf32> to vector<2x32xf32>
    %820 = vector.extract_strided_slice %802 {offsets = [0, 64], sizes = [2, 32], strides = [1, 1]} : vector<2x96xf32> to vector<2x32xf32>
    %821 = arith.mulf %810, %820 : vector<2x32xf32>
    %822 = arith.addf %819, %821 : vector<2x32xf32>
    %823 = math.tanh %822 : vector<2x32xf32>
    %cst_112 = arith.constant 1.000000e+00 : f32
    %824 = vector.broadcast %cst_112 : f32 to vector<2x32xf32>
    %825 = arith.subf %824, %818 : vector<2x32xf32>
    %826 = arith.mulf %825, %823 : vector<2x32xf32>
    %827 = arith.mulf %818, %768 : vector<2x32xf32>
    %828 = arith.addf %826, %827 : vector<2x32xf32>
    %829 = tpu.concatenate %828, %799 in 1 : vector<2x32xf32>, vector<2x32xf32> -> vector<2x64xf32>
    %cst_113 = arith.constant dense<0.000000e+00> : vector<2x288xf32>
    %830 = tpu.matmul %829, %4, %cst_113 {dimension_numbers = #tpu.dot_dimension_numbers<[1], [0], [0], [1], [0, 0, 1, 1], [], []>} : vector<2x64xf32>, vector<64x288xf32>, vector<2x288xf32> -> vector<2x288xf32>
    %831 = arith.addf %830, %556 : vector<2x288xf32>
    %832 = vector.extract_strided_slice %831 {offsets = [0, 192], sizes = [2, 96], strides = [1, 1]} : vector<2x288xf32> to vector<2x96xf32>
    %833 = vector.extract_strided_slice %831 {offsets = [0, 96], sizes = [2, 96], strides = [1, 1]} : vector<2x288xf32> to vector<2x96xf32>
    %834 = vector.extract_strided_slice %832 {offsets = [0, 0], sizes = [2, 32], strides = [1, 1]} : vector<2x96xf32> to vector<2x32xf32>
    %835 = vector.extract_strided_slice %833 {offsets = [0, 0], sizes = [2, 32], strides = [1, 1]} : vector<2x96xf32> to vector<2x32xf32>
    %836 = arith.addf %834, %835 : vector<2x32xf32>
    %837 = arith.negf %836 : vector<2x32xf32>
    %838 = math.exp %837 : vector<2x32xf32>
    %cst_114 = arith.constant 1.000000e+00 : f32
    %839 = vector.broadcast %cst_114 : f32 to vector<2x32xf32>
    %840 = arith.addf %839, %838 : vector<2x32xf32>
    %841 = arith.divf %839, %840 : vector<2x32xf32>
    %842 = vector.extract_strided_slice %832 {offsets = [0, 32], sizes = [2, 32], strides = [1, 1]} : vector<2x96xf32> to vector<2x32xf32>
    %843 = vector.extract_strided_slice %833 {offsets = [0, 32], sizes = [2, 32], strides = [1, 1]} : vector<2x96xf32> to vector<2x32xf32>
    %844 = arith.addf %842, %843 : vector<2x32xf32>
    %845 = arith.negf %844 : vector<2x32xf32>
    %846 = math.exp %845 : vector<2x32xf32>
    %cst_115 = arith.constant 1.000000e+00 : f32
    %847 = vector.broadcast %cst_115 : f32 to vector<2x32xf32>
    %848 = arith.addf %847, %846 : vector<2x32xf32>
    %849 = arith.divf %847, %848 : vector<2x32xf32>
    %850 = vector.extract_strided_slice %832 {offsets = [0, 64], sizes = [2, 32], strides = [1, 1]} : vector<2x96xf32> to vector<2x32xf32>
    %851 = vector.extract_strided_slice %833 {offsets = [0, 64], sizes = [2, 32], strides = [1, 1]} : vector<2x96xf32> to vector<2x32xf32>
    %852 = arith.mulf %841, %851 : vector<2x32xf32>
    %853 = arith.addf %850, %852 : vector<2x32xf32>
    %854 = math.tanh %853 : vector<2x32xf32>
    %cst_116 = arith.constant 1.000000e+00 : f32
    %855 = vector.broadcast %cst_116 : f32 to vector<2x32xf32>
    %856 = arith.subf %855, %849 : vector<2x32xf32>
    %857 = arith.mulf %856, %854 : vector<2x32xf32>
    %858 = arith.mulf %849, %799 : vector<2x32xf32>
    %859 = arith.addf %857, %858 : vector<2x32xf32>
    %860 = vector.extract_strided_slice %18 {offsets = [10, 0], sizes = [2, 96], strides = [1, 1]} : vector<12x96xf32> to vector<2x96xf32>
    %861 = arith.addf %860, %554 : vector<2x96xf32>
    %862 = vector.extract_strided_slice %831 {offsets = [0, 0], sizes = [2, 96], strides = [1, 1]} : vector<2x288xf32> to vector<2x96xf32>
    %863 = vector.extract_strided_slice %861 {offsets = [0, 0], sizes = [2, 32], strides = [1, 1]} : vector<2x96xf32> to vector<2x32xf32>
    %864 = vector.extract_strided_slice %862 {offsets = [0, 0], sizes = [2, 32], strides = [1, 1]} : vector<2x96xf32> to vector<2x32xf32>
    %865 = arith.addf %863, %864 : vector<2x32xf32>
    %866 = arith.negf %865 : vector<2x32xf32>
    %867 = math.exp %866 : vector<2x32xf32>
    %cst_117 = arith.constant 1.000000e+00 : f32
    %868 = vector.broadcast %cst_117 : f32 to vector<2x32xf32>
    %869 = arith.addf %868, %867 : vector<2x32xf32>
    %870 = arith.divf %868, %869 : vector<2x32xf32>
    %871 = vector.extract_strided_slice %861 {offsets = [0, 32], sizes = [2, 32], strides = [1, 1]} : vector<2x96xf32> to vector<2x32xf32>
    %872 = vector.extract_strided_slice %862 {offsets = [0, 32], sizes = [2, 32], strides = [1, 1]} : vector<2x96xf32> to vector<2x32xf32>
    %873 = arith.addf %871, %872 : vector<2x32xf32>
    %874 = arith.negf %873 : vector<2x32xf32>
    %875 = math.exp %874 : vector<2x32xf32>
    %cst_118 = arith.constant 1.000000e+00 : f32
    %876 = vector.broadcast %cst_118 : f32 to vector<2x32xf32>
    %877 = arith.addf %876, %875 : vector<2x32xf32>
    %878 = arith.divf %876, %877 : vector<2x32xf32>
    %879 = vector.extract_strided_slice %861 {offsets = [0, 64], sizes = [2, 32], strides = [1, 1]} : vector<2x96xf32> to vector<2x32xf32>
    %880 = vector.extract_strided_slice %862 {offsets = [0, 64], sizes = [2, 32], strides = [1, 1]} : vector<2x96xf32> to vector<2x32xf32>
    %881 = arith.mulf %870, %880 : vector<2x32xf32>
    %882 = arith.addf %879, %881 : vector<2x32xf32>
    %883 = math.tanh %882 : vector<2x32xf32>
    %cst_119 = arith.constant 1.000000e+00 : f32
    %884 = vector.broadcast %cst_119 : f32 to vector<2x32xf32>
    %885 = arith.subf %884, %878 : vector<2x32xf32>
    %886 = arith.mulf %885, %883 : vector<2x32xf32>
    %887 = arith.mulf %878, %828 : vector<2x32xf32>
    %888 = arith.addf %886, %887 : vector<2x32xf32>
    %889 = tpu.concatenate %888, %859 in 1 : vector<2x32xf32>, vector<2x32xf32> -> vector<2x64xf32>
    %cst_120 = arith.constant dense<0.000000e+00> : vector<2x288xf32>
    %890 = tpu.matmul %889, %4, %cst_120 {dimension_numbers = #tpu.dot_dimension_numbers<[1], [0], [0], [1], [0, 0, 1, 1], [], []>} : vector<2x64xf32>, vector<64x288xf32>, vector<2x288xf32> -> vector<2x288xf32>
    %891 = arith.addf %890, %556 : vector<2x288xf32>
    %892 = vector.extract_strided_slice %891 {offsets = [0, 192], sizes = [2, 96], strides = [1, 1]} : vector<2x288xf32> to vector<2x96xf32>
    %893 = vector.extract_strided_slice %891 {offsets = [0, 96], sizes = [2, 96], strides = [1, 1]} : vector<2x288xf32> to vector<2x96xf32>
    %894 = vector.extract_strided_slice %892 {offsets = [0, 0], sizes = [2, 32], strides = [1, 1]} : vector<2x96xf32> to vector<2x32xf32>
    %895 = vector.extract_strided_slice %893 {offsets = [0, 0], sizes = [2, 32], strides = [1, 1]} : vector<2x96xf32> to vector<2x32xf32>
    %896 = arith.addf %894, %895 : vector<2x32xf32>
    %897 = arith.negf %896 : vector<2x32xf32>
    %898 = math.exp %897 : vector<2x32xf32>
    %cst_121 = arith.constant 1.000000e+00 : f32
    %899 = vector.broadcast %cst_121 : f32 to vector<2x32xf32>
    %900 = arith.addf %899, %898 : vector<2x32xf32>
    %901 = arith.divf %899, %900 : vector<2x32xf32>
    %902 = vector.extract_strided_slice %892 {offsets = [0, 32], sizes = [2, 32], strides = [1, 1]} : vector<2x96xf32> to vector<2x32xf32>
    %903 = vector.extract_strided_slice %893 {offsets = [0, 32], sizes = [2, 32], strides = [1, 1]} : vector<2x96xf32> to vector<2x32xf32>
    %904 = arith.addf %902, %903 : vector<2x32xf32>
    %905 = arith.negf %904 : vector<2x32xf32>
    %906 = math.exp %905 : vector<2x32xf32>
    %cst_122 = arith.constant 1.000000e+00 : f32
    %907 = vector.broadcast %cst_122 : f32 to vector<2x32xf32>
    %908 = arith.addf %907, %906 : vector<2x32xf32>
    %909 = arith.divf %907, %908 : vector<2x32xf32>
    %910 = vector.extract_strided_slice %892 {offsets = [0, 64], sizes = [2, 32], strides = [1, 1]} : vector<2x96xf32> to vector<2x32xf32>
    %911 = vector.extract_strided_slice %893 {offsets = [0, 64], sizes = [2, 32], strides = [1, 1]} : vector<2x96xf32> to vector<2x32xf32>
    %912 = arith.mulf %901, %911 : vector<2x32xf32>
    %913 = arith.addf %910, %912 : vector<2x32xf32>
    %914 = math.tanh %913 : vector<2x32xf32>
    %cst_123 = arith.constant 1.000000e+00 : f32
    %915 = vector.broadcast %cst_123 : f32 to vector<2x32xf32>
    %916 = arith.subf %915, %909 : vector<2x32xf32>
    %917 = arith.mulf %916, %914 : vector<2x32xf32>
    %918 = arith.mulf %909, %859 : vector<2x32xf32>
    %919 = arith.addf %917, %918 : vector<2x32xf32>
    %920 = tpu.concatenate %619, %679, %739, %799, %859, %919 in 0 : vector<2x32xf32>, vector<2x32xf32>, vector<2x32xf32>, vector<2x32xf32>, vector<2x32xf32>, vector<2x32xf32> -> vector<12x32xf32>
    %cst_124 = arith.constant dense<0.000000e+00> : vector<12x128xf32>
    %921 = tpu.matmul %920, %13, %cst_124 {dimension_numbers = #tpu.dot_dimension_numbers<[1], [0], [0], [1], [0, 0, 1, 1], [], []>} : vector<12x32xf32>, vector<32x128xf32>, vector<12x128xf32> -> vector<12x128xf32>
    %922 = vector.broadcast %9 : vector<1x128xf32> to vector<12x128xf32>
    %923 = arith.addf %921, %922 : vector<12x128xf32>
    %924 = tpu.concatenate %888, %919 in 0 : vector<2x32xf32>, vector<2x32xf32> -> vector<4x32xf32>
    %cst_125 = arith.constant 0.000000e+00 : f32
    %925 = vector.broadcast %cst_125 : f32 to vector<4x96xf32>
    %926 = tpu.concatenate %924, %925 in 1 : vector<4x32xf32>, vector<4x96xf32> -> vector<4x128xf32>
    %c0_126 = arith.constant 0 : index
    %c0_127 = arith.constant 0 : index
    %927 = vector.load %arg2[%c0_126, %c0_127] : memref<16x128xf32, #tpu.memory_space<vmem>>, vector<12x128xf32>
    tpu.vector_store %arg2[%c0_126, %c0_127], %923 {strides = array<i32>} : memref<16x128xf32, #tpu.memory_space<vmem>>, vector<12x128xf32>,
    %c12 = arith.constant 12 : index
    %c0_128 = arith.constant 0 : index
    %928 = vector.load %arg2[%c12, %c0_128] : memref<16x128xf32, #tpu.memory_space<vmem>>, vector<4x128xf32>
    tpu.vector_store %arg2[%c12, %c0_128], %926 {strides = array<i32>} : memref<16x128xf32, #tpu.memory_space<vmem>>, vector<4x128xf32>,
    return
  }
}

</mosaic_0001>

<bundles_post_ra>
// kernel: encoder_decoder_forward.1
= control target key start
LH: loop header
LB: loop body
LE: loop exit
PB: predicated region body
PF: predicated region fallthrough
CT: control target
= control target key end

     0   :  { %v4904_v23 = vmov 0.0   ;;  %v266_v38 = vlaneseq  ;;  %s4905_s25 = smov 64   ;;  %s4906_s16 = smov 96   ;;  %vm4907_vm0 = vmmov 0   ;;  %vm385_vm1 = vcmask 261120   ;;  %s6507_s1 = inlined_call_operand.vmem [shape: f32[488,288], index: 1, kind: input, shape index: {}]   ;;  %s6508_s0 = inlined_call_operand.vmem [shape: f32[32,128], index: 0, kind: input, shape index: {}]   ;;  %s6509_s2 = inlined_call_operand.vmem [shape: f32[16,128], index: 2, kind: output, shape index: {}]  }
   0x1   :  { %v86_v0 = vld [vmem:[%s6507_s1 + $0x300] sm:$0xff]  ;;  %v85_v1 = vld [vmem:[%s6507_s1 + $0x2e8] sm:$0xff]  ;;  %v84_v2 = vld [vmem:[%s6507_s1 + $0x2d0] sm:$0xff]  ;;  %vm281_vm2 = vcmask 523264   ;;  %s4908_s26 = smov 32   ;;  %vm2148_vm3 = vcmask 1041408  }
   0x2   :  { %4238 = vmatprep.subr.mxu0 %v86_v0  ;;  %v83_v3 = vld [vmem:[%s6507_s1 + $0x2b8] sm:$0xff]  ;;  %v11_v4 = vld [vmem:[%s6508_s0] sm:$0xff]  ;;  %v81_v6 = vld [vmem:[%s6507_s1 + $0x288] sm:$0xff]  ;;  %v5097_v39 = vshrl.u32 %v266_v38, 7  ;;  %vm2150_vm4 = vcmask 1043456   ;;  %vm2152_vm5 = vcmask 1045504  }
   0x3   :  { %4239 = vmatpush3.msra.mxu0 %v86_v0  ;;  %v82_v5 = vld [vmem:[%s6507_s1 + $0x2a0] sm:$0xff]  ;;  %4270 = vmatprep.mubr.f32.mxu0 %v11_v4  ;;  %v80_v7 = vld [vmem:[%s6507_s1 + $0x270] sm:$0xff]  ;;  %v79_v8 = vld [vmem:[%s6507_s1 + $0x258] sm:$0xff]  ;;  %s4909_s5 = smov 4   ;;  %s4910_s6 = smov 5   ;;  %vm2271_vm6 = vcmask 7168  }
   0x4   :  { %4240 = vmatprep.subr.mxu0 %v85_v1  ;;  %v78_v9 = vld [vmem:[%s6507_s1 + $0x240] sm:$0xff]  ;;  %v77_v10 = vld [vmem:[%s6507_s1 + $0x228] sm:$0xff]  ;;  %v76_v11 = vld [vmem:[%s6507_s1 + $0x210] sm:$0xff]  ;;  %v268_v40 = vsub.s32 0, %v5097_v39  ;;  %s4911_s7 = smov 2   ;;  %s4912_s8 = smov 1  }
   0x5   :  { %4241 = vmatpush3.msra.mxu0 %v85_v1  ;;  %v75_v12 = vld [vmem:[%s6507_s1 + $0x1f8] sm:$0xff]  ;;  %v74_v13 = vld [vmem:[%s6507_s1 + $0x1e0] sm:$0xff]  ;;  %v73_v14 = vld [vmem:[%s6507_s1 + $0x1c8] sm:$0xff]  ;;  %s4913_s9 = smov 6   ;;  %s4914_s10 = smov 3   ;;  %vm2273_vm7 = vcmask 15360  }
   0x6   :  { %4242 = vmatprep.subr.mxu0 %v84_v2  ;;  %v72_v15 = vld [vmem:[%s6507_s1 + $0x1b0] sm:$0xff]  ;;  %v71_v16 = vld [vmem:[%s6507_s1 + $0x198] sm:$0xff]  ;;  %v12_v17 = vld [vmem:[%s6508_s0 + $0x8] sm:$0xff]  ;;  %s4915_s11 = smov 7   ;;  %vm2275_vm8 = vcmask 23552   ;;  %vm2277_vm9 = vcmask 31744  }
   0x7   :  { %4243 = vmatpush3.msra.mxu0 %v84_v2  ;;  %v4996_v18 = vld [vmem:[%s6507_s1 + $0xb0] sm:$0xff]  ;;  %v5001_v19 = vld [vmem:[%s6507_s1 + $0xa8] sm:$0xff]  ;;  %v5006_v20 = vld [vmem:[%s6507_s1 + $0x98] sm:$0xff]  ;;  %vm2279_vm10 = vcmask 39936   ;;  %vm2281_vm11 = vcmask 48128   ;;  %vm2283_vm12 = vcmask 56320  }
   0x8   :  { %4244 = vmatprep.subr.mxu0 %v83_v3  ;;  %v5012_v21 = vld [vmem:[%s6507_s1 + $0x90] sm:$0xff]  ;;  %v5018_v22 = vld [vmem:[%s6507_s1 + $0x80] sm:$0xff]  ;;  %v5025_v24 = vld [vmem:[%s6507_s1 + $0x78] sm:$0xff]  ;;  %vm2287_vm14 = vcmask 58368  }
   0x9   :  { %4245 = vmatpush3.msra.mxu0 %v83_v3  ;;  %v5031_v25 = vld [vmem:[%s6507_s1 + $0x68] sm:$0xff]  ;;  %v5037_v26 = vld [vmem:[%s6507_s1 + $0x60] sm:$0xff]  ;;  %v5043_v27 = vld [vmem:[%s6507_s1 + $0x50] sm:$0xff] }
   0xa   :  { %4246 = vmatprep.subr.mxu0 %v82_v5  ;;  %v5049_v28 = vld [vmem:[%s6507_s1 + $0x48] sm:$0xff]  ;;  %v5055_v29 = vld [vmem:[%s6507_s1 + $0x38] sm:$0xff]  ;;  %v5061_v30 = vld [vmem:[%s6507_s1 + $0x30] sm:$0xff] }
   0xb   :  { %4247 = vmatpush3.msra.mxu0 %v82_v5  ;;  %v5067_v31 = vld [vmem:[%s6507_s1 + $0x20] sm:$0xff]  ;;  %v5073_v32 = vld [vmem:[%s6507_s1 + $0x18] sm:$0xff]  ;;  %v5079_v33 = vld [vmem:[%s6507_s1 + $0x8] sm:$0xff] }
   0xc   :  { %4248 = vmatprep.subr.mxu0 %v81_v6  ;;  %v5085_v34 = vld [vmem:[%s6507_s1] sm:$0xff]  ;;  %v101_v58 = vld [vmem:[%s6507_s1 + $0x468] sm:$0xff]  ;;  %v100_v59 = vld [vmem:[%s6507_s1 + $0x450] sm:$0xff] }
   0xd   :  { %4249 = vmatpush3.msra.mxu0 %v81_v6  ;;  %v68_v35 = vld [vmem:[%s6507_s1 + $0x182] ss:$0 sm:$0xff]  ;;  %v5103_v41 = vld [vmem:[%s6507_s1 + $0x180] ss:$8 sm:$0x7]  ;;  %v99_v60 = vld [vmem:[%s6507_s1 + $0x438] sm:$0xff] }
   0xe   :  { %4250 = vmatprep.subr.mxu0 %v80_v7  ;;  %v5108_v42 = vrot.slane %v5103_v41, %v268_v40  ;;  %v102_v57 = vld [vmem:[%s6507_s1 + $0x480] sm:$0xff]  ;;  %v13_v61 = vld [vmem:[%s6508_s0 + $0x10] sm:$0xff]  ;;  %v5141_v63 = vld [vmem:[%s6507_s1 + $0xb8] sm:$0xff] }
   0xf   :  { %4251 = vmatpush3.msra.mxu0 %v80_v7  ;;  %4273 = vmatprep.subr.mxu1 %v102_v57  ;;  %v98_v62 = vld [vmem:[%s6507_s1 + $0x420] sm:$0xff]  ;;  %v97_v2 = vld [vmem:[%s6507_s1 + $0x408] sm:$0xff]  ;;  %v96_v4 = vld [vmem:[%s6507_s1 + $0x3f0] sm:$0xff] }
  0x10   :  { %4252 = vmatprep.subr.mxu0 %v79_v8  ;;  %4274 = vmatpush3.msra.mxu1 %v102_v57  ;;  %v5147_v0 = vld [vmem:[%s6507_s1 + $0xa0] sm:$0xff]  ;;  %v5157_v3 = vld [vmem:[%s6507_s1 + $0x88] sm:$0xff]  ;;  %v5167_v5 = vld [vmem:[%s6507_s1 + $0x70] sm:$0xff] }
  0x11   :  { %4253 = vmatpush3.msra.mxu0 %v79_v8  ;;  %4275 = vmatprep.subr.mxu1 %v101_v58  ;;  %v95_v6 = vld [vmem:[%s6507_s1 + $0x3d8] sm:$0xff]  ;;  %v94_v8 = vld [vmem:[%s6507_s1 + $0x3c0] sm:$0xff] }
  0x12   :  { %4254 = vmatprep.subr.mxu0 %v78_v9  ;;  %4276 = vmatpush3.msra.mxu1 %v101_v58  ;;  %v5177_v7 = vld [vmem:[%s6507_s1 + $0x58] sm:$0xff] }
  0x13   :  { %4255 = vmatpush3.msra.mxu0 %v78_v9  ;;  %4277 = vmatprep.subr.mxu1 %v100_v59  ;;  %v5187_v9 = vld [vmem:[%s6507_s1 + $0x40] sm:$0xff] }
  0x14   :  { %4256 = vmatprep.subr.mxu0 %v77_v10  ;;  %4278 = vmatpush3.msra.mxu1 %v100_v59 }
  0x15   :  { %4257 = vmatpush3.msra.mxu0 %v77_v10  ;;  %4305 = vmatprep.mubr.f32.mxu1 %v13_v61  ;;  %v93_v10 = vld [vmem:[%s6507_s1 + $0x3a8] sm:$0xff] }
  0x16   :  { %4258 = vmatprep.subr.mxu0 %v76_v11  ;;  %4279 = vmatprep.subr.mxu1 %v99_v60 }
  0x17   :  { %4259 = vmatpush3.msra.mxu0 %v76_v11  ;;  %4280 = vmatpush3.msra.mxu1 %v99_v60  ;;  %v5197_v11 = vld [vmem:[%s6507_s1 + $0x28] sm:$0xff] }
  0x18   :  { %4260 = vmatprep.subr.mxu0 %v75_v12  ;;  %4281 = vmatprep.subr.mxu1 %v98_v62 }
  0x19   :  { %4261 = vmatpush3.msra.mxu0 %v75_v12  ;;  %4282 = vmatpush3.msra.mxu1 %v98_v62  ;;  %v92_v12 = vld [vmem:[%s6507_s1 + $0x390] sm:$0xff] }
  0x1a   :  { %4262 = vmatprep.subr.mxu0 %v74_v13  ;;  %4283 = vmatprep.subr.mxu1 %v97_v2 }
  0x1b   :  { %4263 = vmatpush3.msra.mxu0 %v74_v13  ;;  %4284 = vmatpush3.msra.mxu1 %v97_v2  ;;  %v91_v13 = vld [vmem:[%s6507_s1 + $0x378] sm:$0xff] }
  0x1c   :  { %4264 = vmatprep.subr.mxu0 %v73_v14  ;;  %4285 = vmatprep.subr.mxu1 %v96_v4 }
  0x1d   :  { %4265 = vmatpush3.msra.mxu0 %v73_v14  ;;  %4286 = vmatpush3.msra.mxu1 %v96_v4  ;;  %v90_v14 = vld [vmem:[%s6507_s1 + $0x360] sm:$0xff] }
  0x1e   :  { %4266 = vmatprep.subr.mxu0 %v72_v15  ;;  %4287 = vmatprep.subr.mxu1 %v95_v6 }
  0x1f   :  { %4267 = vmatpush3.msra.mxu0 %v72_v15  ;;  %4288 = vmatpush3.msra.mxu1 %v95_v6  ;;  %v89_v15 = vld [vmem:[%s6507_s1 + $0x348] sm:$0xff] }
  0x20   :  { %4268 = vmatprep.subr.mxu0 %v71_v16  ;;  %4289 = vmatprep.subr.mxu1 %v94_v8 }
  0x21   :  { %4269 = vmatpush3.msra.mxu0 %v71_v16  ;;  %4290 = vmatpush3.msra.mxu1 %v94_v8  ;;  %v88_v16 = vld [vmem:[%s6507_s1 + $0x330] sm:$0xff] }
  0x22   :  { %4271 = vmatmul.mubr.f32.vlgmr.msra.gmra.mxu0 %v12_v17  ;;  %301 = vmatprep.subr.mxu0 %v4996_v18  ;;  %v87_v17 = vld [vmem:[%s6507_s1 + $0x318] sm:$0xff] }
  0x23   :  { %302 = vmatpush1.msra.mxu0 %v5001_v19  ;;  %349 = vmatprep.mubr.f32.mxu0 %v4904_v23 }
  0x24   :  { %303 = vmatprep.subr.mxu0 %v5006_v20  ;;  %4291 = vmatprep.subr.mxu1 %v93_v10 }
  0x25   :  { %304 = vmatpush1.msra.mxu0 %v5012_v21  ;;  %4292 = vmatpush3.msra.mxu1 %v93_v10 }
  0x26   :  { %305 = vmatprep.subr.mxu0 %v5018_v22  ;;  %4293 = vmatprep.subr.mxu1 %v92_v12 }
  0x27   :  { %306 = vmatpush1.msra.mxu0 %v5025_v24  ;;  %4294 = vmatpush3.msra.mxu1 %v92_v12 }
  0x28   :  { %307 = vmatprep.subr.mxu0 %v5031_v25  ;;  %4295 = vmatprep.subr.mxu1 %v91_v13 }
  0x29   :  { %308 = vmatpush1.msra.mxu0 %v5037_v26  ;;  %4296 = vmatpush3.msra.mxu1 %v91_v13 }
  0x2a   :  { %309 = vmatprep.subr.mxu0 %v5043_v27  ;;  %4297 = vmatprep.subr.mxu1 %v90_v14 }
  0x2b   :  { %310 = vmatpush1.msra.mxu0 %v5049_v28  ;;  %4298 = vmatpush3.msra.mxu1 %v90_v14 }
  0x2c   :  { %311 = vmatprep.subr.mxu0 %v5055_v29  ;;  %4299 = vmatprep.subr.mxu1 %v89_v15 }
  0x2d   :  { %312 = vmatpush1.msra.mxu0 %v5061_v30  ;;  %4300 = vmatpush3.msra.mxu1 %v89_v15 }
  0x2e   :  { %313 = vmatprep.subr.mxu0 %v5067_v31  ;;  %4301 = vmatprep.subr.mxu1 %v88_v16 }
  0x2f   :  { %314 = vmatpush1.msra.mxu0 %v5073_v32  ;;  %4302 = vmatpush3.msra.mxu1 %v88_v16 }
  0x30   :  { %315 = vmatprep.subr.mxu0 %v5079_v33  ;;  %4303 = vmatprep.subr.mxu1 %v87_v17 }
  0x31   :  { %316 = vmatpush1.msra.mxu0 %v5085_v34  ;;  %4304 = vmatpush3.msra.mxu1 %v87_v17 }
  0x32   :  { %350 = vmatmul.mubr.f32.vlgmr.msra.gmra.mxu0 %v4904_v23  ;;  %4308 = vmatprep.subr.mxu0 %v4904_v23 }
  0x33   :  { %4309 = vmatpush3.msra.mxu0 %v5141_v63  ;;  %406 = vmatprep.subr.mxu1 %v4996_v18 }
  0x34   :  { %4310 = vmatprep.subr.mxu0 %v4904_v23  ;;  %4324 = vmatprep.mubr.msk.f32.mxu0 %vm4907_vm0, %v4904_v23 }
  0x35   :  { %4311 = vmatpush3.msra.mxu0 %v5147_v0 }
  0x36   :  { %4312 = vmatprep.subr.mxu0 %v4904_v23 }
  0x37   :  { %4313 = vmatpush3.msra.mxu0 %v5157_v3 }
  0x38   :  { %4314 = vmatprep.subr.mxu0 %v4904_v23 }
  0x39   :  { %4315 = vmatpush3.msra.mxu0 %v5167_v5 }
  0x3a   :  { %4316 = vmatprep.subr.mxu0 %v4904_v23 }
  0x3b   :  { %4317 = vmatpush3.msra.mxu0 %v5177_v7 }
  0x3c   :  { %4318 = vmatprep.subr.mxu0 %v4904_v23 }
  0x3d   :  { %4319 = vmatpush3.msra.mxu0 %v5187_v9 }
  0x3e   :  { %4320 = vmatprep.subr.mxu0 %v4904_v23 }
  0x3f   :  { %4321 = vmatpush3.msra.mxu0 %v5197_v11 }
  0x40   :  { %4322 = vmatprep.subr.mxu0 %v4904_v23 }
  0xe2   :  { %v4272_v36 = vpop.f32.mrf.mxu0 }
  0xe3   :  { %v5095_v37 = vadd.f32 %v4272_v36, %v68_v35  ;;  %v5245_v36 = vld [vmem:[%s6507_s1 + $0x10] sm:$0xff] }
  0xe4   :  { %v181_v43 = vpop.f32.mrf.mxu0  ;;  %4323 = vmatpush3.msra.mxu0 %v5245_v36 }
  0xe5   :  { %v5112_v47 = vadd.f32 %v181_v43, %v68_v35  ;;  %v14_v35 = vld [vmem:[%s6508_s0 + $0x18] sm:$0xf]  ;;  %4327 = vmatprep.subr.mxu0 %v4904_v23 }
  0xe6   :  { %4306 = vmatmul.mubr.f32.vlgmr.msra.gmra.mxu1 %v14_v35 }
  0xe7   :  { %407 = vmatpush1.msra.mxu1 %v5001_v19  ;;  %454 = vmatprep.mubr.f32.mxu1 %v4904_v23 }
  0xe8   :  { %408 = vmatprep.subr.mxu1 %v5006_v20 }
  0xe9   :  { %409 = vmatpush1.msra.mxu1 %v5012_v21 }
  0xea   :  { %410 = vmatprep.subr.mxu1 %v5018_v22 }
  0xeb   :  { %411 = vmatpush1.msra.mxu1 %v5025_v24 }
  0xec   :  { %412 = vmatprep.subr.mxu1 %v5031_v25 }
  0xed   :  { %413 = vmatpush1.msra.mxu1 %v5037_v26 }
  0xee   :  { %414 = vmatprep.subr.mxu1 %v5043_v27 }
  0xef   :  { %415 = vmatpush1.msra.mxu1 %v5049_v28 }
  0xf0   :  { %416 = vmatprep.subr.mxu1 %v5055_v29 }
  0xf1   :  { %417 = vmatpush1.msra.mxu1 %v5061_v30 }
  0xf2   :  { %v351_v44 = vpop.f32.mrf.mxu0  ;;  %418 = vmatprep.subr.mxu1 %v5067_v31 }
  0xf3   :  { %v352_v45 = vadd.f32 %v351_v44, %v5108_v42  ;;  %419 = vmatpush1.msra.mxu1 %v5073_v32 }
  0xf4   :  { %v353_v46 = vpop.f32.mrf.mxu0  ;;  %420 = vmatprep.subr.mxu1 %v5079_v33 }
  0xf5   :  { %363 = vrot.lane.b32.xlu0 %v352_v45, %s4905_s25  ;;  %v355_v48 = vadd.f32 %v352_v45, %v5112_v47  ;;  %421 = vmatpush1.msra.mxu1 %v5085_v34 }
  0xf6   :  { %630 = vmatprep.subr.mxu1 %v4996_v18 }
  0xf7   :  { %v3983_v49 = vmul.f32 -1.442695, %v355_v48 }
  0xf9   :  { %4636 = vpow2.f32 %v3983_v49 }
 0x106   :  { %v4637_v50 = vpop.eup %4636 }
 0x107   :  { %v359_v51 = vadd.f32 1.0, %v4637_v50 }
 0x109   :  { %4638 = vrcp.f32 %v359_v51  ;;  %v272_v51 = vsub.s32 1, %v5097_v39 }
 0x116   :  { %v5115_v52 = vpop.eup %4638 }
 0x117   :  { %v373_v38 = vsub.f32 1.0, %v5115_v52  ;;  %v379_v44 = vmul.f32 0.0, %v5115_v52 }
 0x167   :  { %v364_v53 = vpop.permute.xlu0 %363 }
 0x168   :  { %v366_v54 = vmul.f32 %v5115_v52, %v364_v53  ;;  %v5303_v53 = vrot.slane %v5103_v41, %v272_v51 }
 0x16a   :  { %368 = vrot.lane.b32.xlu0 %v366_v54, %s4905_s25 }
 0x1a6   :  { %v5295_v50 = vpop.f32.mrf.mxu1 }
 0x1a8   :  { %v5298_v52 = vpop.f32.mrf.mxu1 }
 0x1dc   :  { %v369_v55 = vpop.permute.xlu0 %368 }
 0x1dd   :  { %v371_v56 = vadd.f32 %v369_v55, %v5112_v47 }
 0x1df   :  { %4640 = vtanh.f32 %v371_v56 }
 0x1ec   :  { %v4641_v1 = vpop.eup %4640 }
 0x1ed   :  { %375 = vrot.lane.b32.xlu1 %v4641_v1, %s4906_s16 }
 0x25f   :  { %v376_v43 = vpop.permute.xlu1 %375 }
 0x260   :  { %v378_v45 = vmul.f32 %v376_v43, %v373_v38 }
 0x262   :  { %v5253_v46 = vadd.f32 %v379_v44, %v378_v45  ;;  %v276_v45 = vsub.s32 2, %v5097_v39 }
 0x264   :  { %382 = vrot.lane.b32.xlu1 %v5253_v46, %s4906_s16 }
 0x2d6   :  { %v383_v48 = vpop.permute.xlu1 %382 }
 0x2d7   :  { %v386_v49 = vsel %vm385_vm1, %v383_v48, 0.0  ;;  %v5320_v48 = vrot.slane %v5103_v41, %v276_v45 }
 0x2d8   :  { %3984 = vmatmul.mubr.msk.f32.vlgmr.msra.gmra.mxu1 %vm281_vm2, %v386_v49  ;;  %4325 = vmatmul.mubr.msk.f32.vlgmr.msra.gmra.mxu0 %vm281_vm2, %v386_v49 }
 0x2d9   :  { %631 = vmatpush1.msra.mxu1 %v5001_v19  ;;  %4328 = vmatpush3.msra.mxu0 %v5141_v63 }
 0x2da   :  { %632 = vmatprep.subr.mxu1 %v5006_v20  ;;  %4329 = vmatprep.subr.mxu0 %v4904_v23 }
 0x2db   :  { %633 = vmatpush1.msra.mxu1 %v5012_v21  ;;  %4330 = vmatpush3.msra.mxu0 %v5147_v0 }
 0x2dc   :  { %634 = vmatprep.subr.mxu1 %v5018_v22  ;;  %4331 = vmatprep.subr.mxu0 %v4904_v23 }
 0x2dd   :  { %635 = vmatpush1.msra.mxu1 %v5025_v24  ;;  %4332 = vmatpush3.msra.mxu0 %v5157_v3 }
 0x2de   :  { %636 = vmatprep.subr.mxu1 %v5031_v25  ;;  %4333 = vmatprep.subr.mxu0 %v4904_v23 }
 0x2df   :  { %637 = vmatpush1.msra.mxu1 %v5037_v26  ;;  %4334 = vmatpush3.msra.mxu0 %v5167_v5 }
 0x2e0   :  { %638 = vmatprep.subr.mxu1 %v5043_v27  ;;  %4335 = vmatprep.subr.mxu0 %v4904_v23 }
 0x2e1   :  { %639 = vmatpush1.msra.mxu1 %v5049_v28  ;;  %4336 = vmatpush3.msra.mxu0 %v5177_v7 }
 0x2e2   :  { %640 = vmatprep.subr.mxu1 %v5055_v29  ;;  %4337 = vmatprep.subr.mxu0 %v4904_v23 }
 0x2e3   :  { %641 = vmatpush1.msra.mxu1 %v5061_v30  ;;  %4338 = vmatpush3.msra.mxu0 %v5187_v9 }
 0x2e4   :  { %642 = vmatprep.subr.mxu1 %v5067_v31  ;;  %4339 = vmatprep.subr.mxu0 %v4904_v23 }
 0x2e5   :  { %643 = vmatpush1.msra.mxu1 %v5073_v32  ;;  %4340 = vmatpush3.msra.mxu0 %v5197_v11 }
 0x2e6   :  { %644 = vmatprep.subr.mxu1 %v5079_v33  ;;  %4341 = vmatprep.subr.mxu0 %v4904_v23 }
 0x2e7   :  { %645 = vmatpush1.msra.mxu1 %v5085_v34  ;;  %678 = vmatprep.mubr.f32.mxu1 %v4904_v23 }
 0x2e8   :  { %4342 = vmatpush3.msra.mxu0 %v5245_v36  ;;  %4343 = vmatprep.mubr.msk.f32.mxu0 %vm4907_vm0, %v4904_v23 }
 0x2e9   :  { %854 = vmatprep.subr.mxu1 %v4996_v18  ;;  %4346 = vmatprep.subr.mxu0 %v4904_v23 }
 0x398   :  { %v456_v54 = vpop.f32.mrf.mxu1  ;;  %v527_v55 = vpop.f32.mrf.mxu0 }
 0x399   :  { %v457_v56 = vadd.f32 %v456_v54, %v5108_v42  ;;  %v528_v49 = vadd.f32 %v527_v55, %v5320_v48 }
 0x39a   :  { %v458_v57 = vpop.f32.mrf.mxu1  ;;  %v4326_v58 = vpop.f32.mrf.mxu0 }
 0x39b   :  { %v459_v59 = vadd.f32 %v458_v57, %v5303_v53  ;;  %532 = vrot.lane.b32.xlu0 %v457_v56, %s4906_s16  ;;  %v571_v60 = vrot.slane %v457_v56, 6 }
 0x39d   :  { %553 = vrot.lane.b32.xlu1 %v459_v59, %s4908_s26  ;;  %v573_v61 = vadd.f32 %v571_v60, %v5112_v47 }
 0x39f   :  { %580 = vrot.lane.b32.xlu0 %v571_v60, %s4905_s25  ;;  %v3988_v62 = vmul.f32 -1.442695, %v573_v61 }
 0x3a1   :  { %4642 = vpow2.f32 %v3988_v62  ;;  %v596_v62 = vrot.slane %v5253_v46, 6 }
 0x3ae   :  { %v4643_v1 = vpop.eup %4642 }
 0x3af   :  { %v577_v2 = vadd.f32 1.0, %v4643_v1 }
 0x3b1   :  { %4644 = vrcp.f32 %v577_v2 }
 0x3be   :  { %v4645_v10 = vpop.eup %4644 }
 0x3bf   :  { %v590_v1 = vsub.f32 1.0, %v4645_v10 }
 0x40d   :  { %v533_v4 = vpop.permute.xlu0 %532 }
 0x40e   :  { %v535_v6 = vadd.f32 %v533_v4, %v459_v59 }
 0x40f   :  { %v554_v17 = vpop.permute.xlu1 %553 }
 0x410   :  { %v3986_v8 = vmul.f32 -1.442695, %v535_v6  ;;  %v598_v6 = vmul.f32 %v4645_v10, %v596_v62 }
 0x411   :  { %v581_v12 = vpop.permute.xlu0 %580 }
 0x412   :  { %4646 = vpow2.f32 %v3986_v8  ;;  %v583_v13 = vmul.f32 %v4645_v10, %v581_v12 }
 0x414   :  { %585 = vrot.lane.b32.xlu0 %v583_v13, %s4905_s25 }
 0x41f   :  { %v4647_v14 = vpop.eup %4646 }
 0x420   :  { %v539_v15 = vadd.f32 1.0, %v4647_v14 }
 0x422   :  { %4648 = vrcp.f32 %v539_v15 }
 0x42f   :  { %v4649_v16 = vpop.eup %4648 }
 0x430   :  { %v556_v35 = vmul.f32 %v4649_v16, %v554_v17 }
 0x432   :  { %558 = vrot.lane.b32.xlu1 %v556_v35, %s4905_s25 }
 0x436   :  { %543 = vrot.lane.b32.xlu1 %v459_v59, %s4906_s16 }
 0x486   :  { %v586_v38 = vpop.permute.xlu0 %585 }
 0x487   :  { %v588_v43 = vadd.f32 %v586_v38, %v5112_v47 }
 0x489   :  { %4650 = vtanh.f32 %v588_v43 }
 0x496   :  { %v4651_v44 = vpop.eup %4650 }
 0x497   :  { %592 = vrot.lane.b32.xlu1 %v4651_v44, %s4906_s16 }
 0x4a4   :  { %v559_v54 = vpop.permute.xlu1 %558 }
 0x4a5   :  { %v561_v56 = vadd.f32 %v559_v54, %v528_v49 }
 0x4a7   :  { %4652 = vtanh.f32 %v561_v56 }
 0x4a8   :  { %v544_v58 = vpop.permute.xlu1 %543 }
 0x4a9   :  { %v546_v60 = vadd.f32 %v544_v58, %v459_v59 }
 0x4ab   :  { %v3987_v61 = vmul.f32 -1.442695, %v546_v60 }
 0x4ad   :  { %4654 = vpow2.f32 %v3987_v61 }
 0x4b4   :  { %v4653_v57 = vpop.eup %4652 }
 0x4b5   :  { %565 = vrot.lane.b32.xlu0 %v4653_v57, %s4906_s16 }
 0x4ba   :  { %v4655_v55 = vpop.eup %4654 }
 0x4bb   :  { %v550_v8 = vadd.f32 1.0, %v4655_v55 }
 0x4bd   :  { %4656 = vrcp.f32 %v550_v8 }
 0x4ca   :  { %v4657_v12 = vpop.eup %4656 }
 0x4cb   :  { %v563_v13 = vsub.f32 1.0, %v4657_v12  ;;  %v569_v59 = vmul.f32 0.0, %v4657_v12 }
 0x509   :  { %v593_v2 = vpop.permute.xlu1 %592 }
 0x50a   :  { %v595_v4 = vmul.f32 %v593_v2, %v590_v1 }
 0x50c   :  { %v5325_v41 = vadd.f32 %v598_v6, %v595_v4 }
 0x50e   :  { %601 = vrot.lane.b32.xlu0 %v5325_v41, %s4906_s16 }
 0x527   :  { %v566_v14 = vpop.permute.xlu0 %565 }
 0x528   :  { %v568_v15 = vmul.f32 %v566_v14, %v563_v13 }
 0x52a   :  { %v5329_v16 = vadd.f32 %v569_v59, %v568_v15 }
 0x52c   :  { %v605_v46 = vrot.slane %v5329_v16, 6 }
 0x52e   :  { %606 = vrot.lane.b32.xlu1 %v605_v46, %s4905_s25 }
 0x580   :  { %v602_v10 = vpop.permute.xlu0 %601 }
 0x5a0   :  { %v607_v17 = vpop.permute.xlu1 %606 }
 0x5a1   :  { %v609_v35 = vsel %vm385_vm1, %v602_v10, %v607_v17 }
 0x5a2   :  { %v611_v38 = vrot.slane %v609_v35, 2 }
 0x5a4   :  { %3989 = vmatmul.mubr.msk.f32.vlgmr.msra.gmra.mxu1 %vm281_vm2, %v611_v38  ;;  %4344 = vmatmul.mubr.msk.f32.vlgmr.msra.gmra.mxu0 %vm281_vm2, %v611_v38 }
 0x5a5   :  { %855 = vmatpush1.msra.mxu1 %v5001_v19  ;;  %4347 = vmatpush3.msra.mxu0 %v5141_v63 }
 0x5a6   :  { %856 = vmatprep.subr.mxu1 %v5006_v20  ;;  %4348 = vmatprep.subr.mxu0 %v4904_v23 }
 0x5a7   :  { %857 = vmatpush1.msra.mxu1 %v5012_v21  ;;  %4349 = vmatpush3.msra.mxu0 %v5147_v0 }
 0x5a8   :  { %858 = vmatprep.subr.mxu1 %v5018_v22  ;;  %4350 = vmatprep.subr.mxu0 %v4904_v23 }
 0x5a9   :  { %859 = vmatpush1.msra.mxu1 %v5025_v24  ;;  %4351 = vmatpush3.msra.mxu0 %v5157_v3 }
 0x5aa   :  { %860 = vmatprep.subr.mxu1 %v5031_v25  ;;  %4352 = vmatprep.subr.mxu0 %v4904_v23 }
 0x5ab   :  { %861 = vmatpush1.msra.mxu1 %v5037_v26  ;;  %4353 = vmatpush3.msra.mxu0 %v5167_v5 }
 0x5ac   :  { %862 = vmatprep.subr.mxu1 %v5043_v27  ;;  %4354 = vmatprep.subr.mxu0 %v4904_v23 }
 0x5ad   :  { %863 = vmatpush1.msra.mxu1 %v5049_v28  ;;  %4355 = vmatpush3.msra.mxu0 %v5177_v7 }
 0x5ae   :  { %864 = vmatprep.subr.mxu1 %v5055_v29  ;;  %4356 = vmatprep.subr.mxu0 %v4904_v23 }
 0x5af   :  { %865 = vmatpush1.msra.mxu1 %v5061_v30  ;;  %4357 = vmatpush3.msra.mxu0 %v5187_v9 }
 0x5b0   :  { %866 = vmatprep.subr.mxu1 %v5067_v31  ;;  %4358 = vmatprep.subr.mxu0 %v4904_v23 }
 0x5b1   :  { %867 = vmatpush1.msra.mxu1 %v5073_v32  ;;  %4359 = vmatpush3.msra.mxu0 %v5197_v11 }
 0x5b2   :  { %868 = vmatprep.subr.mxu1 %v5079_v33  ;;  %4360 = vmatprep.subr.mxu0 %v4904_v23 }
 0x5b3   :  { %869 = vmatpush1.msra.mxu1 %v5085_v34  ;;  %902 = vmatprep.mubr.f32.mxu1 %v4904_v23 }
 0x5b4   :  { %4361 = vmatpush3.msra.mxu0 %v5245_v36  ;;  %4362 = vmatprep.mubr.msk.f32.mxu0 %vm4907_vm0, %v4904_v23 }
 0x5b5   :  { %1078 = vmatprep.subr.mxu1 %v4996_v18  ;;  %4365 = vmatprep.subr.mxu0 %v4904_v23 }
 0x664   :  { %v680_v43 = vpop.f32.mrf.mxu1  ;;  %v751_v44 = vpop.f32.mrf.mxu0 }
 0x665   :  { %v681_v49 = vadd.f32 %v680_v43, %v5108_v42  ;;  %v752_v38 = vadd.f32 %v751_v44, %v5320_v48 }
 0x666   :  { %v682_v54 = vpop.f32.mrf.mxu1  ;;  %v4345_v56 = vpop.f32.mrf.mxu0 }
 0x667   :  { %v683_v57 = vadd.f32 %v682_v54, %v5303_v53  ;;  %756 = vrot.lane.b32.xlu0 %v681_v49, %s4906_s16  ;;  %v795_v58 = vrot.slane %v681_v49, 4 }
 0x669   :  { %777 = vrot.lane.b32.xlu1 %v683_v57, %s4908_s26  ;;  %v797_v60 = vadd.f32 %v795_v58, %v5112_v47 }
 0x66b   :  { %804 = vrot.lane.b32.xlu0 %v795_v58, %s4905_s25  ;;  %v3993_v61 = vmul.f32 -1.442695, %v797_v60 }
 0x66d   :  { %4658 = vpow2.f32 %v3993_v61  ;;  %v820_v61 = vrot.slane %v5325_v41, 6 }
 0x67a   :  { %v4659_v62 = vpop.eup %4658 }
 0x67b   :  { %v801_v1 = vadd.f32 1.0, %v4659_v62 }
 0x67d   :  { %4660 = vrcp.f32 %v801_v1 }
 0x68a   :  { %v4661_v55 = vpop.eup %4660 }
 0x68b   :  { %v814_v62 = vsub.f32 1.0, %v4661_v55 }
 0x6d9   :  { %v757_v2 = vpop.permute.xlu0 %756 }
 0x6da   :  { %v759_v4 = vadd.f32 %v757_v2, %v683_v57 }
 0x6db   :  { %v778_v15 = vpop.permute.xlu1 %777 }
 0x6dc   :  { %v3991_v6 = vmul.f32 -1.442695, %v759_v4  ;;  %v822_v4 = vmul.f32 %v4661_v55, %v820_v61 }
 0x6dd   :  { %v805_v8 = vpop.permute.xlu0 %804 }
 0x6de   :  { %4662 = vpow2.f32 %v3991_v6  ;;  %v807_v12 = vmul.f32 %v4661_v55, %v805_v8 }
 0x6e0   :  { %809 = vrot.lane.b32.xlu0 %v807_v12, %s4905_s25 }
 0x6eb   :  { %v4663_v13 = vpop.eup %4662 }
 0x6ec   :  { %v763_v14 = vadd.f32 1.0, %v4663_v13 }
 0x6ee   :  { %4664 = vrcp.f32 %v763_v14 }
 0x6fb   :  { %v4665_v59 = vpop.eup %4664 }
 0x6fc   :  { %v780_v46 = vmul.f32 %v4665_v59, %v778_v15 }
 0x6fe   :  { %782 = vrot.lane.b32.xlu1 %v780_v46, %s4905_s25 }
 0x702   :  { %767 = vrot.lane.b32.xlu1 %v683_v57, %s4906_s16 }
 0x752   :  { %v810_v10 = vpop.permute.xlu0 %809 }
 0x753   :  { %v812_v17 = vadd.f32 %v810_v10, %v5112_v47 }
 0x755   :  { %4666 = vtanh.f32 %v812_v17 }
 0x762   :  { %v4667_v35 = vpop.eup %4666 }
 0x763   :  { %816 = vrot.lane.b32.xlu1 %v4667_v35, %s4906_s16 }
 0x770   :  { %v783_v43 = vpop.permute.xlu1 %782 }
 0x771   :  { %v785_v49 = vadd.f32 %v783_v43, %v752_v38 }
 0x773   :  { %4668 = vtanh.f32 %v785_v49 }
 0x774   :  { %v768_v56 = vpop.permute.xlu1 %767 }
 0x775   :  { %v770_v58 = vadd.f32 %v768_v56, %v683_v57 }
 0x777   :  { %v3992_v60 = vmul.f32 -1.442695, %v770_v58 }
 0x779   :  { %4670 = vpow2.f32 %v3992_v60 }
 0x780   :  { %v4669_v54 = vpop.eup %4668 }
 0x781   :  { %789 = vrot.lane.b32.xlu0 %v4669_v54, %s4906_s16 }
 0x786   :  { %v4671_v44 = vpop.eup %4670 }
 0x787   :  { %v774_v8 = vadd.f32 1.0, %v4671_v44 }
 0x789   :  { %4672 = vrcp.f32 %v774_v8 }
 0x796   :  { %v4673_v12 = vpop.eup %4672 }
 0x797   :  { %v787_v13 = vsub.f32 1.0, %v4673_v12  ;;  %v793_v57 = vmul.f32 %v4673_v12, %v5329_v16 }
 0x7d5   :  { %v817_v1 = vpop.permute.xlu1 %816 }
 0x7d6   :  { %v819_v2 = vmul.f32 %v817_v1, %v814_v62 }
 0x7d8   :  { %v5385_v6 = vadd.f32 %v822_v4, %v819_v2 }
 0x7da   :  { %825 = vrot.lane.b32.xlu0 %v5385_v6, %s4906_s16 }
 0x7f3   :  { %v790_v14 = vpop.permute.xlu0 %789 }
 0x7f4   :  { %v792_v59 = vmul.f32 %v790_v14, %v787_v13 }
 0x7f6   :  { %v5390_v15 = vadd.f32 %v793_v57, %v792_v59 }
 0x7f8   :  { %v829_v41 = vrot.slane %v5390_v15, 4 }
 0x7fa   :  { %830 = vrot.lane.b32.xlu1 %v829_v41, %s4905_s25 }
 0x84c   :  { %v826_v55 = vpop.permute.xlu0 %825 }
 0x86c   :  { %v831_v46 = vpop.permute.xlu1 %830 }
 0x86d   :  { %v833_v10 = vsel %vm385_vm1, %v826_v55, %v831_v46 }
 0x86e   :  { %v835_v17 = vrot.slane %v833_v10, 4 }
 0x870   :  { %3994 = vmatmul.mubr.msk.f32.vlgmr.msra.gmra.mxu1 %vm281_vm2, %v835_v17  ;;  %4363 = vmatmul.mubr.msk.f32.vlgmr.msra.gmra.mxu0 %vm281_vm2, %v835_v17 }
 0x871   :  { %1079 = vmatpush1.msra.mxu1 %v5001_v19  ;;  %4366 = vmatpush3.msra.mxu0 %v5141_v63 }
 0x872   :  { %1080 = vmatprep.subr.mxu1 %v5006_v20  ;;  %4367 = vmatprep.subr.mxu0 %v4904_v23 }
 0x873   :  { %1081 = vmatpush1.msra.mxu1 %v5012_v21  ;;  %4368 = vmatpush3.msra.mxu0 %v5147_v0 }
 0x874   :  { %1082 = vmatprep.subr.mxu1 %v5018_v22  ;;  %4369 = vmatprep.subr.mxu0 %v4904_v23 }
 0x875   :  { %1083 = vmatpush1.msra.mxu1 %v5025_v24  ;;  %4370 = vmatpush3.msra.mxu0 %v5157_v3 }
 0x876   :  { %1084 = vmatprep.subr.mxu1 %v5031_v25  ;;  %4371 = vmatprep.subr.mxu0 %v4904_v23 }
 0x877   :  { %1085 = vmatpush1.msra.mxu1 %v5037_v26  ;;  %4372 = vmatpush3.msra.mxu0 %v5167_v5 }
 0x878   :  { %1086 = vmatprep.subr.mxu1 %v5043_v27  ;;  %4373 = vmatprep.subr.mxu0 %v4904_v23 }
 0x879   :  { %1087 = vmatpush1.msra.mxu1 %v5049_v28  ;;  %4374 = vmatpush3.msra.mxu0 %v5177_v7 }
 0x87a   :  { %1088 = vmatprep.subr.mxu1 %v5055_v29  ;;  %4375 = vmatprep.subr.mxu0 %v4904_v23 }
 0x87b   :  { %1089 = vmatpush1.msra.mxu1 %v5061_v30  ;;  %4376 = vmatpush3.msra.mxu0 %v5187_v9 }
 0x87c   :  { %1090 = vmatprep.subr.mxu1 %v5067_v31  ;;  %4377 = vmatprep.subr.mxu0 %v4904_v23 }
 0x87d   :  { %1091 = vmatpush1.msra.mxu1 %v5073_v32  ;;  %4378 = vmatpush3.msra.mxu0 %v5197_v11 }
 0x87e   :  { %1092 = vmatprep.subr.mxu1 %v5079_v33  ;;  %4379 = vmatprep.subr.mxu0 %v4904_v23 }
 0x87f   :  { %1093 = vmatpush1.msra.mxu1 %v5085_v34  ;;  %1126 = vmatprep.mubr.f32.mxu1 %v4904_v23 }
 0x880   :  { %4380 = vmatpush3.msra.mxu0 %v5245_v36  ;;  %4381 = vmatprep.mubr.msk.f32.mxu0 %vm4907_vm0, %v4904_v23 }
 0x881   :  { %1298 = vmatprep.subr.mxu1 %v4996_v18  ;;  %4384 = vmatprep.subr.mxu0 %v4904_v23 }
 0x930   :  { %v904_v35 = vpop.f32.mrf.mxu1  ;;  %v975_v38 = vpop.f32.mrf.mxu0 }
 0x931   :  { %v905_v43 = vadd.f32 %v904_v35, %v5108_v42  ;;  %v976_v17 = vadd.f32 %v975_v38, %v5320_v48 }
 0x932   :  { %v906_v49 = vpop.f32.mrf.mxu1  ;;  %v4364_v54 = vpop.f32.mrf.mxu0 }
 0x933   :  { %v907_v56 = vadd.f32 %v906_v49, %v5303_v53  ;;  %980 = vrot.lane.b32.xlu0 %v905_v43, %s4906_s16  ;;  %v1019_v58 = vrot.slane %v905_v43, 2 }
 0x935   :  { %1001 = vrot.lane.b32.xlu1 %v907_v56, %s4908_s26  ;;  %v1021_v60 = vadd.f32 %v1019_v58, %v5112_v47 }
 0x937   :  { %1028 = vrot.lane.b32.xlu0 %v1019_v58, %s4905_s25  ;;  %v3998_v18 = vmul.f32 -1.442695, %v1021_v60 }
 0x939   :  { %4674 = vpow2.f32 %v3998_v18  ;;  %v1044_v18 = vrot.slane %v5385_v6, 6 }
 0x946   :  { %v4675_v61 = vpop.eup %4674 }
 0x947   :  { %v1025_v62 = vadd.f32 1.0, %v4675_v61 }
 0x949   :  { %4676 = vrcp.f32 %v1025_v62 }
 0x956   :  { %v4677_v44 = vpop.eup %4676 }
 0x957   :  { %v1038_v61 = vsub.f32 1.0, %v4677_v44 }
 0x9a5   :  { %v981_v1 = vpop.permute.xlu0 %980 }
 0x9a6   :  { %v983_v2 = vadd.f32 %v981_v1, %v907_v56  ;;  %v1046_v1 = vmul.f32 %v4677_v44, %v1044_v18 }
 0x9a7   :  { %v1002_v59 = vpop.permute.xlu1 %1001 }
 0x9a8   :  { %v3996_v4 = vmul.f32 -1.442695, %v983_v2 }
 0x9a9   :  { %v1029_v8 = vpop.permute.xlu0 %1028 }
 0x9aa   :  { %4678 = vpow2.f32 %v3996_v4  ;;  %v1031_v12 = vmul.f32 %v4677_v44, %v1029_v8 }
 0x9ac   :  { %1033 = vrot.lane.b32.xlu0 %v1031_v12, %s4905_s25 }
 0x9b7   :  { %v4679_v13 = vpop.eup %4678 }
 0x9b8   :  { %v987_v14 = vadd.f32 1.0, %v4679_v13 }
 0x9ba   :  { %4680 = vrcp.f32 %v987_v14 }
 0x9c7   :  { %v4681_v57 = vpop.eup %4680 }
 0x9c8   :  { %v1004_v41 = vmul.f32 %v4681_v57, %v1002_v59 }
 0x9ca   :  { %1006 = vrot.lane.b32.xlu1 %v1004_v41, %s4905_s25 }
 0x9ce   :  { %991 = vrot.lane.b32.xlu1 %v907_v56, %s4906_s16 }
 0xa1e   :  { %v1034_v55 = vpop.permute.xlu0 %1033 }
 0xa1f   :  { %v1036_v46 = vadd.f32 %v1034_v55, %v5112_v47 }
 0xa21   :  { %4682 = vtanh.f32 %v1036_v46 }
 0xa2e   :  { %v4683_v10 = vpop.eup %4682 }
 0xa2f   :  { %1040 = vrot.lane.b32.xlu1 %v4683_v10, %s4906_s16 }
 0xa3c   :  { %v1007_v35 = vpop.permute.xlu1 %1006 }
 0xa3d   :  { %v1009_v43 = vadd.f32 %v1007_v35, %v976_v17 }
 0xa3f   :  { %4684 = vtanh.f32 %v1009_v43 }
 0xa40   :  { %v992_v54 = vpop.permute.xlu1 %991 }
 0xa41   :  { %v994_v58 = vadd.f32 %v992_v54, %v907_v56 }
 0xa43   :  { %v3997_v60 = vmul.f32 -1.442695, %v994_v58 }
 0xa45   :  { %4686 = vpow2.f32 %v3997_v60 }
 0xa4c   :  { %v4685_v49 = vpop.eup %4684 }
 0xa4d   :  { %1013 = vrot.lane.b32.xlu0 %v4685_v49, %s4906_s16 }
 0xa52   :  { %v4687_v38 = vpop.eup %4686 }
 0xa53   :  { %v998_v4 = vadd.f32 1.0, %v4687_v38 }
 0xa55   :  { %4688 = vrcp.f32 %v998_v4 }
 0xa62   :  { %v4689_v8 = vpop.eup %4688 }
 0xa63   :  { %v1011_v12 = vsub.f32 1.0, %v4689_v8  ;;  %v1017_v56 = vmul.f32 %v4689_v8, %v5390_v15 }
 0xaa1   :  { %v1041_v47 = vpop.permute.xlu1 %1040 }
 0xaa2   :  { %v1043_v62 = vmul.f32 %v1041_v47, %v1038_v61 }
 0xaa4   :  { %v5446_v2 = vadd.f32 %v1046_v1, %v1043_v62 }
 0xaa6   :  { %1049 = vrot.lane.b32.xlu0 %v5446_v2, %s4906_s16  ;;  %v1266_v61 = vrot.slane %v5446_v2, 6 }
 0xabf   :  { %v1014_v13 = vpop.permute.xlu0 %1013 }
 0xac0   :  { %v1016_v14 = vmul.f32 %v1014_v13, %v1011_v12 }
 0xac2   :  { %v5451_v57 = vadd.f32 %v1017_v56, %v1016_v14 }
 0xac4   :  { %v1053_v6 = vrot.slane %v5451_v57, 2 }
 0xac6   :  { %1054 = vrot.lane.b32.xlu1 %v1053_v6, %s4905_s25 }
 0xb18   :  { %v1050_v44 = vpop.permute.xlu0 %1049 }
 0xb38   :  { %v1055_v59 = vpop.permute.xlu1 %1054 }
 0xb39   :  { %v1057_v41 = vsel %vm385_vm1, %v1050_v44, %v1055_v59 }
 0xb3a   :  { %v1059_v55 = vrot.slane %v1057_v41, 6 }
 0xb3c   :  { %3999 = vmatmul.mubr.msk.f32.vlgmr.msra.gmra.mxu1 %vm281_vm2, %v1059_v55  ;;  %4382 = vmatmul.mubr.msk.f32.vlgmr.msra.gmra.mxu0 %vm281_vm2, %v1059_v55 }
 0xb3d   :  { %1299 = vmatpush1.msra.mxu1 %v5001_v19  ;;  %4385 = vmatpush3.msra.mxu0 %v5141_v63  ;;  %v5494_v19 = vld [vmem:[%s6507_s1 + $0xb0] sm:$0xff] }
 0xb3e   :  { %1300 = vmatprep.subr.mxu1 %v5006_v20  ;;  %4386 = vmatprep.subr.mxu0 %v4904_v23 }
 0xb3f   :  { %1301 = vmatpush1.msra.mxu1 %v5012_v21  ;;  %4387 = vmatpush3.msra.mxu0 %v5147_v0 }
 0xb40   :  { %1302 = vmatprep.subr.mxu1 %v5018_v22  ;;  %4388 = vmatprep.subr.mxu0 %v4904_v23 }
 0xb41   :  { %1303 = vmatpush1.msra.mxu1 %v5025_v24  ;;  %4389 = vmatpush3.msra.mxu0 %v5157_v3 }
 0xb42   :  { %1304 = vmatprep.subr.mxu1 %v5031_v25  ;;  %4390 = vmatprep.subr.mxu0 %v4904_v23 }
 0xb43   :  { %1305 = vmatpush1.msra.mxu1 %v5037_v26  ;;  %4391 = vmatpush3.msra.mxu0 %v5167_v5 }
 0xb44   :  { %1306 = vmatprep.subr.mxu1 %v5043_v27  ;;  %4392 = vmatprep.subr.mxu0 %v4904_v23 }
 0xb45   :  { %1307 = vmatpush1.msra.mxu1 %v5049_v28  ;;  %4393 = vmatpush3.msra.mxu0 %v5177_v7 }
 0xb46   :  { %1308 = vmatprep.subr.mxu1 %v5055_v29  ;;  %4394 = vmatprep.subr.mxu0 %v4904_v23 }
 0xb47   :  { %1309 = vmatpush1.msra.mxu1 %v5061_v30  ;;  %4395 = vmatpush3.msra.mxu0 %v5187_v9 }
 0xb48   :  { %1310 = vmatprep.subr.mxu1 %v5067_v31  ;;  %4396 = vmatprep.subr.mxu0 %v4904_v23 }
 0xb49   :  { %1311 = vmatpush1.msra.mxu1 %v5073_v32  ;;  %4397 = vmatpush3.msra.mxu0 %v5197_v11 }
 0xb4a   :  { %1312 = vmatprep.subr.mxu1 %v5079_v33  ;;  %4398 = vmatprep.subr.mxu0 %v4904_v23 }
 0xb4b   :  { %1313 = vmatpush1.msra.mxu1 %v5085_v34  ;;  %1346 = vmatprep.mubr.f32.mxu1 %v4904_v23 }
 0xb4c   :  { %4399 = vmatpush3.msra.mxu0 %v5245_v36  ;;  %4400 = vmatprep.mubr.msk.f32.mxu0 %vm4907_vm0, %v4904_v23 }
 0xb4d   :  { %1522 = vmatprep.subr.mxu1 %v5494_v19  ;;  %4403 = vmatprep.subr.mxu0 %v4904_v23 }
 0xbfc   :  { %v1128_v20 = vpop.f32.mrf.mxu1  ;;  %v1199_v21 = vpop.f32.mrf.mxu0 }
 0xbfd   :  { %v1129_v22 = vadd.f32 %v1128_v20, %v5108_v42  ;;  %v1200_v35 = vadd.f32 %v1199_v21, %v5320_v48  ;;  %v5527_v20 = vld [vmem:[%s6507_s1 + $0xa8] sm:$0xff]  ;;  %v5533_v21 = vld [vmem:[%s6507_s1 + $0xb8] sm:$0xff] }
 0xbfe   :  { %v1130_v24 = vpop.f32.mrf.mxu1  ;;  %v4383_v25 = vpop.f32.mrf.mxu0 }
 0xbff   :  { %v1131_v26 = vadd.f32 %v1130_v24, %v5303_v53  ;;  %1204 = vrot.lane.b32.xlu0 %v1129_v22, %s4906_s16  ;;  %v1243_v27 = vadd.f32 %v1129_v22, %v5095_v37  ;;  %v5546_v24 = vld [vmem:[%s6507_s1 + $0x90] sm:$0xff]  ;;  %v5552_v25 = vld [vmem:[%s6507_s1 + $0xa0] sm:$0xff] }
 0xc01   :  { %1225 = vrot.lane.b32.xlu1 %v1131_v26, %s4908_s26  ;;  %v4003_v28 = vmul.f32 -1.442695, %v1243_v27  ;;  %v5565_v27 = vld [vmem:[%s6507_s1 + $0x78] sm:$0xff] }
 0xc03   :  { %1250 = vrot.lane.b32.xlu0 %v1129_v22, %s4905_s25  ;;  %4690 = vpow2.f32 %v4003_v28  ;;  %v5539_v22 = vld [vmem:[%s6507_s1 + $0x98] sm:$0xff]  ;;  %v5571_v28 = vld [vmem:[%s6507_s1 + $0x88] sm:$0xff] }
 0xc10   :  { %v4691_v29 = vpop.eup %4690 }
 0xc11   :  { %v1247_v30 = vadd.f32 1.0, %v4691_v29  ;;  %v5577_v29 = vld [vmem:[%s6507_s1 + $0x68] sm:$0xff] }
 0xc13   :  { %4692 = vrcp.f32 %v1247_v30  ;;  %v5584_v30 = vld [vmem:[%s6507_s1 + $0x60] sm:$0xff] }
 0xc20   :  { %v4693_v34 = vpop.eup %4692 }
 0xc21   :  { %v1260_v47 = vsub.f32 1.0, %v4693_v34  ;;  %v1268_v38 = vmul.f32 %v4693_v34, %v1266_v61 }
 0xc71   :  { %v1205_v31 = vpop.permute.xlu0 %1204 }
 0xc72   :  { %v1207_v32 = vadd.f32 %v1205_v31, %v1131_v26  ;;  %v5590_v31 = vld [vmem:[%s6507_s1 + $0x70] sm:$0xff] }
 0xc73   :  { %v1226_v9 = vpop.permute.xlu1 %1225 }
 0xc74   :  { %v4001_v33 = vmul.f32 -1.442695, %v1207_v32  ;;  %v5596_v32 = vld [vmem:[%s6507_s1 + $0x50] sm:$0xff] }
 0xc75   :  { %v1251_v63 = vpop.permute.xlu0 %1250 }
 0xc76   :  { %4694 = vpow2.f32 %v4001_v33  ;;  %v1253_v0 = vmul.f32 %v4693_v34, %v1251_v63  ;;  %v5603_v33 = vld [vmem:[%s6507_s1 + $0x48] sm:$0xff]  ;;  %v5609_v34 = vld [vmem:[%s6507_s1 + $0x58] sm:$0xff] }
 0xc77   :  { %v5615_v63 = vld [vmem:[%s6507_s1 + $0x38] sm:$0xff] }
 0xc78   :  { %1255 = vrot.lane.b32.xlu0 %v1253_v0, %s4905_s25  ;;  %v5622_v0 = vld [vmem:[%s6507_s1 + $0x30] sm:$0xff] }
 0xc83   :  { %v4695_v3 = vpop.eup %4694 }
 0xc84   :  { %v1211_v5 = vadd.f32 1.0, %v4695_v3  ;;  %v5628_v3 = vld [vmem:[%s6507_s1 + $0x40] sm:$0xff] }
 0xc86   :  { %4696 = vrcp.f32 %v1211_v5  ;;  %v5634_v5 = vld [vmem:[%s6507_s1 + $0x20] sm:$0xff] }
 0xc93   :  { %v4697_v7 = vpop.eup %4696 }
 0xc94   :  { %v1228_v11 = vmul.f32 %v4697_v7, %v1226_v9  ;;  %v5641_v7 = vld [vmem:[%s6507_s1 + $0x18] sm:$0xff]  ;;  %v5647_v9 = vld [vmem:[%s6507_s1 + $0x28] sm:$0xff] }
 0xc96   :  { %1230 = vrot.lane.b32.xlu1 %v1228_v11, %s4905_s25  ;;  %v5653_v11 = vld [vmem:[%s6507_s1 + $0x8] sm:$0xff] }
 0xc9a   :  { %1215 = vrot.lane.b32.xlu1 %v1131_v26, %s4906_s16 }
 0xcea   :  { %v1256_v46 = vpop.permute.xlu0 %1255 }
 0xceb   :  { %v1258_v10 = vadd.f32 %v1256_v46, %v5095_v37  ;;  %v5660_v46 = vld [vmem:[%s6507_s1] sm:$0xff] }
 0xced   :  { %4698 = vtanh.f32 %v1258_v10 }
 0xcfa   :  { %v4699_v17 = vpop.eup %4698 }
 0xcfb   :  { %1262 = vrot.lane.b32.xlu1 %v4699_v17, %s4906_s16 }
 0xd08   :  { %v1231_v43 = vpop.permute.xlu1 %1230 }
 0xd09   :  { %v1233_v49 = vadd.f32 %v1231_v43, %v1200_v35 }
 0xd0b   :  { %4700 = vtanh.f32 %v1233_v49 }
 0xd0c   :  { %v1216_v58 = vpop.permute.xlu1 %1215 }
 0xd0d   :  { %v1218_v60 = vadd.f32 %v1216_v58, %v1131_v26  ;;  %v5558_v26 = vld [vmem:[%s6507_s1 + $0x80] sm:$0xff] }
 0xd0f   :  { %v4002_v18 = vmul.f32 -1.442695, %v1218_v60 }
 0xd11   :  { %4702 = vpow2.f32 %v4002_v18 }
 0xd18   :  { %v4701_v54 = vpop.eup %4700 }
 0xd19   :  { %1237 = vrot.lane.b32.xlu0 %v4701_v54, %s4906_s16 }
 0xd1e   :  { %v4703_v8 = vpop.eup %4702 }
 0xd1f   :  { %v1222_v12 = vadd.f32 1.0, %v4703_v8 }
 0xd21   :  { %4704 = vrcp.f32 %v1222_v12 }
 0xd2e   :  { %v4705_v13 = vpop.eup %4704 }
 0xd2f   :  { %v1235_v56 = vsub.f32 1.0, %v4705_v13  ;;  %v1241_v6 = vmul.f32 %v4705_v13, %v5451_v57 }
 0xd6d   :  { %v1263_v62 = vpop.permute.xlu1 %1262 }
 0xd6e   :  { %v1265_v1 = vmul.f32 %v1263_v62, %v1260_v47 }
 0xd70   :  { %v5512_v4 = vadd.f32 %v1268_v38, %v1265_v1 }
 0xd72   :  { %1271 = vrot.lane.b32.xlu0 %v5512_v4, %s4906_s16 }
 0xd8b   :  { %v1238_v14 = vpop.permute.xlu0 %1237 }
 0xd8c   :  { %v1240_v44 = vmul.f32 %v1238_v14, %v1235_v56 }
 0xd8e   :  { %v5517_v59 = vadd.f32 %v1241_v6, %v1240_v44 }
 0xd90   :  { %1275 = vrot.lane.b32.xlu1 %v5517_v59, %s4905_s25 }
 0xde4   :  { %v1272_v2 = vpop.permute.xlu0 %1271 }
 0xe02   :  { %v1276_v41 = vpop.permute.xlu1 %1275 }
 0xe03   :  { %v1278_v55 = vsel %vm385_vm1, %v1272_v2, %v1276_v41 }
 0xe04   :  { %4004 = vmatmul.mubr.msk.f32.vlgmr.msra.gmra.mxu1 %vm281_vm2, %v1278_v55  ;;  %4401 = vmatmul.mubr.msk.f32.vlgmr.msra.gmra.mxu0 %vm281_vm2, %v1278_v55 }
 0xe05   :  { %1523 = vmatpush1.msra.mxu1 %v5527_v20  ;;  %4404 = vmatpush3.msra.mxu0 %v5533_v21 }
 0xe06   :  { %1524 = vmatprep.subr.mxu1 %v5539_v22  ;;  %4405 = vmatprep.subr.mxu0 %v4904_v23 }
 0xe07   :  { %1525 = vmatpush1.msra.mxu1 %v5546_v24  ;;  %4406 = vmatpush3.msra.mxu0 %v5552_v25 }
 0xe08   :  { %1526 = vmatprep.subr.mxu1 %v5558_v26  ;;  %4407 = vmatprep.subr.mxu0 %v4904_v23 }
 0xe09   :  { %1527 = vmatpush1.msra.mxu1 %v5565_v27  ;;  %4408 = vmatpush3.msra.mxu0 %v5571_v28 }
 0xe0a   :  { %1528 = vmatprep.subr.mxu1 %v5577_v29  ;;  %4409 = vmatprep.subr.mxu0 %v4904_v23 }
 0xe0b   :  { %1529 = vmatpush1.msra.mxu1 %v5584_v30  ;;  %4410 = vmatpush3.msra.mxu0 %v5590_v31 }
 0xe0c   :  { %1530 = vmatprep.subr.mxu1 %v5596_v32  ;;  %4411 = vmatprep.subr.mxu0 %v4904_v23 }
 0xe0d   :  { %1531 = vmatpush1.msra.mxu1 %v5603_v33  ;;  %4412 = vmatpush3.msra.mxu0 %v5609_v34 }
 0xe0e   :  { %1532 = vmatprep.subr.mxu1 %v5615_v63  ;;  %4413 = vmatprep.subr.mxu0 %v4904_v23 }
 0xe0f   :  { %1533 = vmatpush1.msra.mxu1 %v5622_v0  ;;  %4414 = vmatpush3.msra.mxu0 %v5628_v3 }
 0xe10   :  { %1534 = vmatprep.subr.mxu1 %v5634_v5  ;;  %4415 = vmatprep.subr.mxu0 %v4904_v23 }
 0xe11   :  { %1535 = vmatpush1.msra.mxu1 %v5641_v7  ;;  %4416 = vmatpush3.msra.mxu0 %v5647_v9 }
 0xe12   :  { %1536 = vmatprep.subr.mxu1 %v5653_v11  ;;  %4417 = vmatprep.subr.mxu0 %v4904_v23 }
 0xe13   :  { %1537 = vmatpush1.msra.mxu1 %v5660_v46  ;;  %1570 = vmatprep.mubr.f32.mxu1 %v4904_v23 }
 0xe14   :  { %4418 = vmatpush3.msra.mxu0 %v5245_v36  ;;  %4419 = vmatprep.mubr.msk.f32.mxu0 %vm4907_vm0, %v4904_v23 }
 0xe15   :  { %1746 = vmatprep.subr.mxu1 %v5494_v19  ;;  %4422 = vmatprep.subr.mxu0 %v4904_v23 }
 0xec4   :  { %v1348_v10 = vpop.f32.mrf.mxu1  ;;  %v1419_v17 = vpop.f32.mrf.mxu0 }
 0xec5   :  { %v1349_v35 = vadd.f32 %v1348_v10, %v5108_v42  ;;  %v1420_v10 = vadd.f32 %v1419_v17, %v5320_v48 }
 0xec6   :  { %v1350_v43 = vpop.f32.mrf.mxu1  ;;  %v4402_v49 = vpop.f32.mrf.mxu0 }
 0xec7   :  { %v1351_v54 = vadd.f32 %v1350_v43, %v5303_v53  ;;  %1424 = vrot.lane.b32.xlu0 %v1349_v35, %s4906_s16  ;;  %v1463_v58 = vrot.slane %v1349_v35, 6 }
 0xec9   :  { %1445 = vrot.lane.b32.xlu1 %v1351_v54, %s4908_s26  ;;  %v1465_v36 = vadd.f32 %v1463_v58, %v5095_v37 }
 0xecb   :  { %1472 = vrot.lane.b32.xlu0 %v1463_v58, %s4905_s25  ;;  %v4008_v60 = vmul.f32 -1.442695, %v1465_v36 }
 0xecd   :  { %4706 = vpow2.f32 %v4008_v60 }
 0xeda   :  { %v4707_v18 = vpop.eup %4706 }
 0xedb   :  { %v1469_v61 = vadd.f32 1.0, %v4707_v18  ;;  %v1488_v18 = vrot.slane %v5512_v4, 6 }
 0xedd   :  { %4708 = vrcp.f32 %v1469_v61 }
 0xeea   :  { %v4709_v38 = vpop.eup %4708 }
 0xeeb   :  { %v1482_v61 = vsub.f32 1.0, %v4709_v38 }
 0xf39   :  { %v1425_v47 = vpop.permute.xlu0 %1424 }
 0xf3a   :  { %v1427_v62 = vadd.f32 %v1425_v47, %v1351_v54 }
 0xf3b   :  { %v1446_v6 = vpop.permute.xlu1 %1445 }
 0xf3c   :  { %v4006_v1 = vmul.f32 -1.442695, %v1427_v62 }
 0xf3d   :  { %v1473_v8 = vpop.permute.xlu0 %1472 }
 0xf3e   :  { %4710 = vpow2.f32 %v4006_v1  ;;  %v1475_v12 = vmul.f32 %v4709_v38, %v1473_v8  ;;  %v1490_v1 = vmul.f32 %v4709_v38, %v1488_v18 }
 0xf40   :  { %1477 = vrot.lane.b32.xlu0 %v1475_v12, %s4905_s25 }
 0xf4b   :  { %v4711_v13 = vpop.eup %4710 }
 0xf4c   :  { %v1431_v56 = vadd.f32 1.0, %v4711_v13 }
 0xf4e   :  { %4712 = vrcp.f32 %v1431_v56 }
 0xf5b   :  { %v4713_v14 = vpop.eup %4712 }
 0xf5c   :  { %v1448_v44 = vmul.f32 %v4713_v14, %v1446_v6 }
 0xf5e   :  { %1450 = vrot.lane.b32.xlu1 %v1448_v44, %s4905_s25 }
 0xf62   :  { %1435 = vrot.lane.b32.xlu1 %v1351_v54, %s4906_s16 }
 0xfb2   :  { %v1478_v2 = vpop.permute.xlu0 %1477 }
 0xfb3   :  { %v1480_v41 = vadd.f32 %v1478_v2, %v5095_v37 }
 0xfb5   :  { %4714 = vtanh.f32 %v1480_v41 }
 0xfc2   :  { %v4715_v55 = vpop.eup %4714 }
 0xfc3   :  { %1484 = vrot.lane.b32.xlu1 %v4715_v55, %s4906_s16 }
 0xfd0   :  { %v1451_v35 = vpop.permute.xlu1 %1450 }
 0xfd1   :  { %v1453_v43 = vadd.f32 %v1451_v35, %v1420_v10  ;;  %v5728_v10 = vld [vmem:[%s6507_s1 + $0x10] sm:$0xff] }
 0xfd3   :  { %4716 = vtanh.f32 %v1453_v43 }
 0xfd4   :  { %v1436_v58 = vpop.permute.xlu1 %1435 }
 0xfd5   :  { %v1438_v36 = vadd.f32 %v1436_v58, %v1351_v54 }
 0xfd7   :  { %v4007_v60 = vmul.f32 -1.442695, %v1438_v36 }
 0xfd9   :  { %4718 = vpow2.f32 %v4007_v60 }
 0xfe0   :  { %v4717_v49 = vpop.eup %4716 }
 0xfe1   :  { %1457 = vrot.lane.b32.xlu0 %v4717_v49, %s4906_s16 }
 0xfe6   :  { %v4719_v17 = vpop.eup %4718 }
 0xfe7   :  { %v1442_v12 = vadd.f32 1.0, %v4719_v17 }
 0xfe9   :  { %4720 = vrcp.f32 %v1442_v12 }
 0xff6   :  { %v4721_v13 = vpop.eup %4720 }
 0xff7   :  { %v1455_v56 = vsub.f32 1.0, %v4721_v13  ;;  %v1461_v54 = vmul.f32 %v4721_v13, %v5517_v59 }
0x1035   :  { %v1485_v47 = vpop.permute.xlu1 %1484 }
0x1036   :  { %v1487_v62 = vmul.f32 %v1485_v47, %v1482_v61 }
0x1038   :  { %v5683_v8 = vadd.f32 %v1490_v1, %v1487_v62 }
0x103a   :  { %1493 = vrot.lane.b32.xlu0 %v5683_v8, %s4906_s16 }
0x1053   :  { %v1458_v14 = vpop.permute.xlu0 %1457 }
0x1054   :  { %v1460_v6 = vmul.f32 %v1458_v14, %v1455_v56 }
0x1056   :  { %v5688_v44 = vadd.f32 %v1461_v54, %v1460_v6 }
0x1058   :  { %v1497_v4 = vrot.slane %v5688_v44, 6 }
0x105a   :  { %1498 = vrot.lane.b32.xlu1 %v1497_v4, %s4905_s25 }
0x10ac   :  { %v1494_v38 = vpop.permute.xlu0 %1493 }
0x10cc   :  { %v1499_v2 = vpop.permute.xlu1 %1498 }
0x10cd   :  { %v1501_v41 = vsel %vm385_vm1, %v1494_v38, %v1499_v2 }
0x10ce   :  { %v1503_v55 = vrot.slane %v1501_v41, 2 }
0x10d0   :  { %4009 = vmatmul.mubr.msk.f32.vlgmr.msra.gmra.mxu1 %vm281_vm2, %v1503_v55  ;;  %4420 = vmatmul.mubr.msk.f32.vlgmr.msra.gmra.mxu0 %vm281_vm2, %v1503_v55 }
0x10d1   :  { %1747 = vmatpush1.msra.mxu1 %v5527_v20  ;;  %4423 = vmatpush3.msra.mxu0 %v5533_v21 }
0x10d2   :  { %1748 = vmatprep.subr.mxu1 %v5539_v22  ;;  %4424 = vmatprep.subr.mxu0 %v4904_v23 }
0x10d3   :  { %1749 = vmatpush1.msra.mxu1 %v5546_v24  ;;  %4425 = vmatpush3.msra.mxu0 %v5552_v25 }
0x10d4   :  { %1750 = vmatprep.subr.mxu1 %v5558_v26  ;;  %4426 = vmatprep.subr.mxu0 %v4904_v23 }
0x10d5   :  { %1751 = vmatpush1.msra.mxu1 %v5565_v27  ;;  %4427 = vmatpush3.msra.mxu0 %v5571_v28 }
0x10d6   :  { %1752 = vmatprep.subr.mxu1 %v5577_v29  ;;  %4428 = vmatprep.subr.mxu0 %v4904_v23 }
0x10d7   :  { %1753 = vmatpush1.msra.mxu1 %v5584_v30  ;;  %4429 = vmatpush3.msra.mxu0 %v5590_v31 }
0x10d8   :  { %1754 = vmatprep.subr.mxu1 %v5596_v32  ;;  %4430 = vmatprep.subr.mxu0 %v4904_v23 }
0x10d9   :  { %1755 = vmatpush1.msra.mxu1 %v5603_v33  ;;  %4431 = vmatpush3.msra.mxu0 %v5609_v34 }
0x10da   :  { %1756 = vmatprep.subr.mxu1 %v5615_v63  ;;  %4432 = vmatprep.subr.mxu0 %v4904_v23 }
0x10db   :  { %1757 = vmatpush1.msra.mxu1 %v5622_v0  ;;  %4433 = vmatpush3.msra.mxu0 %v5628_v3 }
0x10dc   :  { %1758 = vmatprep.subr.mxu1 %v5634_v5  ;;  %4434 = vmatprep.subr.mxu0 %v4904_v23 }
0x10dd   :  { %1759 = vmatpush1.msra.mxu1 %v5641_v7  ;;  %4435 = vmatpush3.msra.mxu0 %v5647_v9 }
0x10de   :  { %1760 = vmatprep.subr.mxu1 %v5653_v11  ;;  %4436 = vmatprep.subr.mxu0 %v4904_v23 }
0x10df   :  { %1761 = vmatpush1.msra.mxu1 %v5660_v46  ;;  %1794 = vmatprep.mubr.f32.mxu1 %v4904_v23 }
0x10e0   :  { %4437 = vmatpush3.msra.mxu0 %v5728_v10  ;;  %4438 = vmatprep.mubr.msk.f32.mxu0 %vm4907_vm0, %v4904_v23 }
0x10e1   :  { %1970 = vmatprep.subr.mxu1 %v5494_v19  ;;  %4441 = vmatprep.subr.mxu0 %v4904_v23 }
0x1190   :  { %v1572_v35 = vpop.f32.mrf.mxu1  ;;  %v1643_v43 = vpop.f32.mrf.mxu0 }
0x1191   :  { %v1573_v49 = vadd.f32 %v1572_v35, %v5108_v42 }
0x1192   :  { %v1574_v58 = vpop.f32.mrf.mxu1  ;;  %v4421_v36 = vpop.f32.mrf.mxu0 }
0x1193   :  { %v1575_v60 = vadd.f32 %v1574_v58, %v5303_v53  ;;  %1648 = vrot.lane.b32.xlu0 %v1573_v49, %s4906_s16  ;;  %v1687_v18 = vrot.slane %v1573_v49, 4  ;;  %v1644_v49 = vadd.f32 %v1643_v43, %v5320_v48 }
0x1195   :  { %1669 = vrot.lane.b32.xlu1 %v1575_v60, %s4908_s26  ;;  %v1689_v61 = vadd.f32 %v1687_v18, %v5095_v37 }
0x1197   :  { %1696 = vrot.lane.b32.xlu0 %v1687_v18, %s4905_s25  ;;  %v4013_v19 = vmul.f32 -1.442695, %v1689_v61 }
0x1199   :  { %4722 = vpow2.f32 %v4013_v19 }
0x11a6   :  { %v4723_v47 = vpop.eup %4722 }
0x11a7   :  { %v1693_v62 = vadd.f32 1.0, %v4723_v47 }
0x11a9   :  { %4724 = vrcp.f32 %v1693_v62  ;;  %v1712_v62 = vrot.slane %v5683_v8, 6 }
0x11b6   :  { %v4725_v13 = vpop.eup %4724 }
0x1205   :  { %v1649_v1 = vpop.permute.xlu0 %1648 }
0x1206   :  { %v1651_v17 = vadd.f32 %v1649_v1, %v1575_v60  ;;  %v1706_v1 = vsub.f32 1.0, %v4725_v13 }
0x1207   :  { %v1670_v38 = vpop.permute.xlu1 %1669 }
0x1208   :  { %v4011_v12 = vmul.f32 -1.442695, %v1651_v17 }
0x1209   :  { %v1697_v56 = vpop.permute.xlu0 %1696 }
0x120a   :  { %4726 = vpow2.f32 %v4011_v12  ;;  %v1699_v14 = vmul.f32 %v4725_v13, %v1697_v56  ;;  %v1714_v56 = vmul.f32 %v4725_v13, %v1712_v62 }
0x120c   :  { %1701 = vrot.lane.b32.xlu0 %v1699_v14, %s4905_s25 }
0x1217   :  { %v4727_v54 = vpop.eup %4726 }
0x1218   :  { %v1655_v6 = vadd.f32 1.0, %v4727_v54 }
0x121a   :  { %4728 = vrcp.f32 %v1655_v6 }
0x1227   :  { %v4729_v4 = vpop.eup %4728 }
0x1228   :  { %v1672_v2 = vmul.f32 %v4729_v4, %v1670_v38 }
0x122a   :  { %1674 = vrot.lane.b32.xlu1 %v1672_v2, %s4905_s25 }
0x122e   :  { %1659 = vrot.lane.b32.xlu1 %v1575_v60, %s4906_s16 }
0x127e   :  { %v1702_v41 = vpop.permute.xlu0 %1701 }
0x127f   :  { %v1704_v55 = vadd.f32 %v1702_v41, %v5095_v37 }
0x1281   :  { %4730 = vtanh.f32 %v1704_v55 }
0x128e   :  { %v4731_v35 = vpop.eup %4730 }
0x128f   :  { %1708 = vrot.lane.b32.xlu1 %v4731_v35, %s4906_s16 }
0x129c   :  { %v1675_v58 = vpop.permute.xlu1 %1674 }
0x129d   :  { %v1677_v36 = vadd.f32 %v1675_v58, %v1644_v49 }
0x129f   :  { %4732 = vtanh.f32 %v1677_v36 }
0x12a0   :  { %v1660_v61 = vpop.permute.xlu1 %1659 }
0x12a1   :  { %v1662_v19 = vadd.f32 %v1660_v61, %v1575_v60 }
0x12a3   :  { %v4012_v47 = vmul.f32 -1.442695, %v1662_v19 }
0x12a5   :  { %4734 = vpow2.f32 %v4012_v47 }
0x12ac   :  { %v4733_v18 = vpop.eup %4732 }
0x12ad   :  { %1681 = vrot.lane.b32.xlu0 %v4733_v18, %s4906_s16 }
0x12b2   :  { %v4735_v43 = vpop.eup %4734 }
0x12b3   :  { %v1666_v54 = vadd.f32 1.0, %v4735_v43 }
0x12b5   :  { %4736 = vrcp.f32 %v1666_v54 }
0x12c2   :  { %v4737_v6 = vpop.eup %4736 }
0x12c3   :  { %v1679_v4 = vsub.f32 1.0, %v4737_v6  ;;  %v1685_v60 = vmul.f32 %v4737_v6, %v5688_v44 }
0x1301   :  { %v1709_v17 = vpop.permute.xlu1 %1708 }
0x1302   :  { %v1711_v12 = vmul.f32 %v1709_v17, %v1706_v1 }
0x1304   :  { %v5749_v14 = vadd.f32 %v1714_v56, %v1711_v12 }
0x1306   :  { %1717 = vrot.lane.b32.xlu0 %v5749_v14, %s4906_s16  ;;  %v1936_v12 = vrot.slane %v5749_v14, 6 }
0x131f   :  { %v1682_v38 = vpop.permute.xlu0 %1681 }
0x1320   :  { %v1684_v2 = vmul.f32 %v1682_v38, %v1679_v4 }
0x1322   :  { %v5754_v41 = vadd.f32 %v1685_v60, %v1684_v2 }
0x1324   :  { %v1721_v8 = vrot.slane %v5754_v41, 4 }
0x1326   :  { %1722 = vrot.lane.b32.xlu1 %v1721_v8, %s4905_s25 }
0x1378   :  { %v1718_v13 = vpop.permute.xlu0 %1717 }
0x1398   :  { %v1723_v55 = vpop.permute.xlu1 %1722 }
0x1399   :  { %v1725_v35 = vsel %vm385_vm1, %v1718_v13, %v1723_v55 }
0x139a   :  { %v1727_v49 = vrot.slane %v1725_v35, 4 }
0x139c   :  { %4014 = vmatmul.mubr.msk.f32.vlgmr.msra.gmra.mxu1 %vm281_vm2, %v1727_v49  ;;  %4439 = vmatmul.mubr.msk.f32.vlgmr.msra.gmra.mxu0 %vm281_vm2, %v1727_v49 }
0x139d   :  { %1971 = vmatpush1.msra.mxu1 %v5527_v20  ;;  %4442 = vmatpush3.msra.mxu0 %v5533_v21 }
0x139e   :  { %1972 = vmatprep.subr.mxu1 %v5539_v22  ;;  %4443 = vmatprep.subr.mxu0 %v4904_v23 }
0x139f   :  { %1973 = vmatpush1.msra.mxu1 %v5546_v24  ;;  %4444 = vmatpush3.msra.mxu0 %v5552_v25 }
0x13a0   :  { %1974 = vmatprep.subr.mxu1 %v5558_v26  ;;  %4445 = vmatprep.subr.mxu0 %v4904_v23 }
0x13a1   :  { %1975 = vmatpush1.msra.mxu1 %v5565_v27  ;;  %4446 = vmatpush3.msra.mxu0 %v5571_v28 }
0x13a2   :  { %1976 = vmatprep.subr.mxu1 %v5577_v29  ;;  %4447 = vmatprep.subr.mxu0 %v4904_v23 }
0x13a3   :  { %1977 = vmatpush1.msra.mxu1 %v5584_v30  ;;  %4448 = vmatpush3.msra.mxu0 %v5590_v31 }
0x13a4   :  { %1978 = vmatprep.subr.mxu1 %v5596_v32  ;;  %4449 = vmatprep.subr.mxu0 %v4904_v23 }
0x13a5   :  { %1979 = vmatpush1.msra.mxu1 %v5603_v33  ;;  %4450 = vmatpush3.msra.mxu0 %v5609_v34 }
0x13a6   :  { %1980 = vmatprep.subr.mxu1 %v5615_v63  ;;  %4451 = vmatprep.subr.mxu0 %v4904_v23 }
0x13a7   :  { %1981 = vmatpush1.msra.mxu1 %v5622_v0  ;;  %4452 = vmatpush3.msra.mxu0 %v5628_v3 }
0x13a8   :  { %1982 = vmatprep.subr.mxu1 %v5634_v5  ;;  %4453 = vmatprep.subr.mxu0 %v4904_v23 }
0x13a9   :  { %1983 = vmatpush1.msra.mxu1 %v5641_v7  ;;  %4454 = vmatpush3.msra.mxu0 %v5647_v9 }
0x13aa   :  { %1984 = vmatprep.subr.mxu1 %v5653_v11  ;;  %4455 = vmatprep.subr.mxu0 %v4904_v23 }
0x13ab   :  { %1985 = vmatpush1.msra.mxu1 %v5660_v46  ;;  %2018 = vmatprep.mubr.f32.mxu1 %v4904_v23 }
0x13ac   :  { %4456 = vmatpush3.msra.mxu0 %v5728_v10  ;;  %4457 = vmatprep.mubr.msk.f32.mxu0 %vm4907_vm0, %v4904_v23 }
0x145c   :  { %v1796_v20 = vpop.f32.mrf.mxu1  ;;  %v1867_v21 = vpop.f32.mrf.mxu0 }
0x145d   :  { %v1797_v22 = vadd.f32 %v1796_v20, %v5108_v42  ;;  %v1868_v18 = vadd.f32 %v1867_v21, %v5320_v48 }
0x145e   :  { %v1798_v24 = vpop.f32.mrf.mxu1  ;;  %v4440_v25 = vpop.f32.mrf.mxu0 }
0x145f   :  { %v1799_v26 = vadd.f32 %v1798_v24, %v5303_v53  ;;  %1872 = vrot.lane.b32.xlu0 %v1797_v22, %s4906_s16  ;;  %v1911_v27 = vrot.slane %v1797_v22, 2 }
0x1461   :  { %1893 = vrot.lane.b32.xlu1 %v1799_v26, %s4908_s26  ;;  %v1913_v28 = vadd.f32 %v1911_v27, %v5095_v37 }
0x1463   :  { %1920 = vrot.lane.b32.xlu0 %v1911_v27, %s4905_s25  ;;  %v4018_v29 = vmul.f32 -1.442695, %v1913_v28 }
0x1465   :  { %4738 = vpow2.f32 %v4018_v29 }
0x1472   :  { %v4739_v30 = vpop.eup %4738 }
0x1473   :  { %v1917_v31 = vadd.f32 1.0, %v4739_v30  ;;  %v2135_v30 = vrot.slane %v5390_v15, 6 }
0x1475   :  { %4740 = vrcp.f32 %v1917_v31  ;;  %v2137_v31 = vrot.slane %v5451_v57, 4 }
0x1482   :  { %v4741_v63 = vpop.eup %4740 }
0x1483   :  { %v1930_v56 = vsub.f32 1.0, %v4741_v63  ;;  %v1938_v54 = vmul.f32 %v4741_v63, %v1936_v12 }
0x14d1   :  { %v1873_v32 = vpop.permute.xlu0 %1872 }
0x14d2   :  { %v1875_v33 = vadd.f32 %v1873_v32, %v1799_v26  ;;  %v2139_v32 = vrot.slane %v5517_v59, 2 }
0x14d3   :  { %v1894_v11 = vpop.permute.xlu1 %1893 }
0x14d4   :  { %v4016_v34 = vmul.f32 -1.442695, %v1875_v33 }
0x14d5   :  { %v1921_v0 = vpop.permute.xlu0 %1920 }
0x14d6   :  { %4742 = vpow2.f32 %v4016_v34  ;;  %v1923_v3 = vmul.f32 %v4741_v63, %v1921_v0 }
0x14d8   :  { %1925 = vrot.lane.b32.xlu0 %v1923_v3, %s4905_s25 }
0x14e3   :  { %v4743_v5 = vpop.eup %4742 }
0x14e4   :  { %v1879_v7 = vadd.f32 1.0, %v4743_v5 }
0x14e6   :  { %4744 = vrcp.f32 %v1879_v7 }
0x14f3   :  { %v4745_v9 = vpop.eup %4744 }
0x14f4   :  { %v1896_v46 = vmul.f32 %v4745_v9, %v1894_v11 }
0x14f6   :  { %1898 = vrot.lane.b32.xlu1 %v1896_v46, %s4905_s25 }
0x14fa   :  { %1883 = vrot.lane.b32.xlu1 %v1799_v26, %s4906_s16 }
0x154a   :  { %v1926_v10 = vpop.permute.xlu0 %1925 }
0x154b   :  { %v1928_v58 = vadd.f32 %v1926_v10, %v5095_v37 }
0x154d   :  { %4746 = vtanh.f32 %v1928_v58 }
0x155a   :  { %v4747_v36 = vpop.eup %4746 }
0x155b   :  { %1932 = vrot.lane.b32.xlu1 %v4747_v36, %s4906_s16 }
0x1568   :  { %v1899_v61 = vpop.permute.xlu1 %1898 }
0x1569   :  { %v1901_v19 = vadd.f32 %v1899_v61, %v1868_v18  ;;  %v114_v61 = vld [vmem:[%s6507_s1 + $0x5a0] sm:$0xff] }
0x156a   :  { %4460 = vmatprep.subr.mxu1 %v114_v61 }
0x156b   :  { %4748 = vtanh.f32 %v1901_v19  ;;  %v113_v19 = vld [vmem:[%s6507_s1 + $0x588] sm:$0xff] }
0x156c   :  { %v1884_v62 = vpop.permute.xlu1 %1883 }
0x156d   :  { %v1886_v1 = vadd.f32 %v1884_v62, %v1799_v26 }
0x156f   :  { %v4017_v17 = vmul.f32 -1.442695, %v1886_v1 }
0x1571   :  { %4750 = vpow2.f32 %v4017_v17 }
0x1578   :  { %v4749_v47 = vpop.eup %4748 }
0x1579   :  { %1905 = vrot.lane.b32.xlu0 %v4749_v47, %s4906_s16  ;;  %v112_v47 = vld [vmem:[%s6507_s1 + $0x570] sm:$0xff] }
0x157e   :  { %v4751_v4 = vpop.eup %4750 }
0x157f   :  { %v1890_v38 = vadd.f32 1.0, %v4751_v4  ;;  %v2141_v4 = vrot.slane %v5754_v41, 6 }
0x1581   :  { %4752 = vrcp.f32 %v1890_v38 }
0x158e   :  { %v4753_v60 = vpop.eup %4752 }
0x158f   :  { %v1903_v2 = vsub.f32 1.0, %v4753_v60  ;;  %v1909_v13 = vmul.f32 %v4753_v60, %v5754_v41 }
0x15cd   :  { %v1933_v37 = vpop.permute.xlu1 %1932 }
0x15ce   :  { %v1935_v43 = vmul.f32 %v1933_v37, %v1930_v56 }
0x15d0   :  { %v5808_v6 = vadd.f32 %v1938_v54, %v1935_v43 }
0x15d2   :  { %1941 = vrot.lane.b32.xlu0 %v5808_v6, %s4906_s16 }
0x15eb   :  { %v1906_v8 = vpop.permute.xlu0 %1905 }
0x15ec   :  { %v1908_v55 = vmul.f32 %v1906_v8, %v1903_v2 }
0x15ee   :  { %v5813_v35 = vadd.f32 %v1909_v13, %v1908_v55  ;;  %v2154_v55 = vsel %vm2148_vm3, %v5688_v44, %v2141_v4  ;;  %v5910_v4 = vld [vmem:[%s6507_s1 + $0x128] sm:$0xff] }
0x15f0   :  { %v1945_v14 = vrot.slane %v5813_v35, 2  ;;  %v2143_v2 = vrot.slane %v5813_v35, 4 }
0x15f2   :  { %1946 = vrot.lane.b32.xlu1 %v1945_v14, %s4905_s25  ;;  %v2155_v14 = vsel %vm2150_vm4, %v2154_v55, %v2143_v2  ;;  %v5930_v55 = vld [vmem:[%s6507_s1 + $0x108] sm:$0xff] }
0x1644   :  { %v5817_v49 = vpop.permute.xlu0 %1941 }
0x1664   :  { %v1947_v20 = vpop.permute.xlu1 %1946 }
0x1665   :  { %v1949_v21 = vsel %vm385_vm1, %v5817_v49, %v1947_v20 }
0x1666   :  { %v1951_v22 = vrot.slane %v1949_v21, 6 }
0x1668   :  { %4019 = vmatmul.mubr.msk.f32.vlgmr.msra.gmra.mxu1 %vm281_vm2, %v1951_v22  ;;  %4458 = vmatmul.mubr.msk.f32.vlgmr.msra.gmra.mxu0 %vm281_vm2, %v1951_v22 }
0x1669   :  { %2510 = vmatprep.mubr.f32.mxu0 %v4904_v23  ;;  %4461 = vmatpush3.msra.mxu1 %v114_v61 }
0x166a   :  { %4462 = vmatprep.subr.mxu1 %v113_v19 }
0x166b   :  { %4463 = vmatpush3.msra.mxu1 %v113_v19 }
0x166c   :  { %4464 = vmatprep.subr.mxu1 %v112_v47 }
0x166d   :  { %4465 = vmatpush3.msra.mxu1 %v112_v47 }
0x1728   :  { %v2020_v24 = vpop.f32.mrf.mxu1  ;;  %v2091_v25 = vpop.f32.mrf.mxu0 }
0x1729   :  { %v2021_v26 = vadd.f32 %v2020_v24, %v5108_v42  ;;  %v2149_v42 = vsel %vm2148_vm3, %v5329_v16, %v2135_v30  ;;  %v2092_v58 = vadd.f32 %v2091_v25, %v5320_v48  ;;  %v111_v48 = vld [vmem:[%s6507_s1 + $0x558] sm:$0xff] }
0x172a   :  { %v2022_v27 = vpop.f32.mrf.mxu1  ;;  %v4459_v28 = vpop.f32.mrf.mxu0  ;;  %4466 = vmatprep.subr.mxu1 %v111_v48 }
0x172b   :  { %v2023_v29 = vadd.f32 %v2022_v27, %v5303_v53  ;;  %2096 = vrot.lane.b32.xlu0 %v2021_v26, %s4906_s16  ;;  %v2151_v53 = vsel %vm2150_vm4, %v2149_v42, %v2137_v31  ;;  %4467 = vmatpush3.msra.mxu1 %v111_v48 }
0x172c   :  { %v2153_v33 = vsel %vm2152_vm5, %v2151_v53, %v2139_v32  ;;  %4471 = vmatprep.subr.mxu1 %v4904_v23 }
0x172d   :  { %2117 = vrot.lane.b32.xlu1 %v2023_v29, %s4908_s26 }
0x1731   :  { %2107 = vrot.lane.b32.xlu1 %v2023_v29, %s4906_s16 }
0x1735   :  { %2159 = vrot.lane.b32.xlu1 %v2153_v33, %s4908_s26 }
0x179d   :  { %v2097_v34 = vpop.permute.xlu0 %2096 }
0x179e   :  { %v2099_v63 = vadd.f32 %v2097_v34, %v2023_v29 }
0x179f   :  { %v2118_v0 = vpop.permute.xlu1 %2117 }
0x17a0   :  { %v4021_v3 = vmul.f32 -1.442695, %v2099_v63 }
0x17a2   :  { %4754 = vpow2.f32 %v4021_v3 }
0x17a3   :  { %v2108_v5 = vpop.permute.xlu1 %2107 }
0x17a4   :  { %v2110_v1 = vadd.f32 %v2108_v5, %v2023_v29 }
0x17a6   :  { %v4022_v17 = vmul.f32 -1.442695, %v2110_v1  ;;  %v4917_v1 = vmov 0  }
0x17a7   :  { %v2160_v7 = vpop.permute.xlu1 %2159  ;;  %4627 = vset.pattern.permute.xlu0 %v4917_v1 }
0x17a8   :  { %4468 = vmatprep.mubr.msk.f32.mxu1 %vm385_vm1, %v2160_v7 }
0x17af   :  { %v4755_v9 = vpop.eup %4754 }
0x17b0   :  { %v2103_v11 = vadd.f32 1.0, %v4755_v9 }
0x17b2   :  { %4756 = vrcp.f32 %v2103_v11 }
0x17bf   :  { %v4757_v46 = vpop.eup %4756 }
0x17c0   :  { %v2120_v10 = vmul.f32 %v4757_v46, %v2118_v0  ;;  %v15_v0 = vld [vmem:[%s6508_s0 + $0x1c] sm:$0x3] }
0x17c1   :  { %vm2285_vm13 = vcmp.gt.f32.partialorder %v15_v0, 0.5 }
0x17c2   :  { %2122 = vrot.lane.b32.xlu0 %v2120_v10, %s4905_s25 }
0x1834   :  { %v2123_v36 = vpop.permute.xlu0 %2122 }
0x1835   :  { %v2125_v18 = vadd.f32 %v2123_v36, %v2092_v58 }
0x1837   :  { %4758 = vtanh.f32 %v2125_v18 }
0x1838   :  { %4760 = vpow2.f32 %v4022_v17  ;;  %v5876_v17 = vld [vmem:[%s6507_s1 + $0x170] sm:$0xff] }
0x1839   :  { %2462 = vmatprep.subr.mxu0 %v5876_v17 }
0x1844   :  { %v4759_v62 = vpop.eup %4758 }
0x1845   :  { %2129 = vrot.lane.b32.xlu0 %v4759_v62, %s4906_s16  ;;  %v4761_v12 = vpop.eup %4760  ;;  %v4916_v62 = vmov 1  }
0x1846   :  { %v2114_v56 = vadd.f32 1.0, %v4761_v12  ;;  %4628 = vset.pattern.permute.xlu1 %v4916_v62  ;;  %v5881_v12 = vld [vmem:[%s6507_s1 + $0x168] sm:$0xff] }
0x1847   :  { %2463 = vmatpush1.msra.mxu0 %v5881_v12 }
0x1848   :  { %4762 = vrcp.f32 %v2114_v56  ;;  %v5886_v56 = vld [vmem:[%s6507_s1 + $0x158] sm:$0xff] }
0x1849   :  { %2464 = vmatprep.subr.mxu0 %v5886_v56 }
0x1855   :  { %v4763_v37 = vpop.eup %4762 }
0x1856   :  { %v2127_v43 = vsub.f32 1.0, %v4763_v37  ;;  %v2133_v38 = vmul.f32 %v4763_v37, %v5813_v35  ;;  %v5892_v37 = vld [vmem:[%s6507_s1 + $0x150] sm:$0xff] }
0x1857   :  { %2465 = vmatpush1.msra.mxu0 %v5892_v37 }
0x18b7   :  { %v2130_v54 = vpop.permute.xlu0 %2129 }
0x18b8   :  { %v2132_v60 = vmul.f32 %v2130_v54, %v2127_v43  ;;  %v5898_v43 = vld [vmem:[%s6507_s1 + $0x140] sm:$0xff]  ;;  %v5904_v54 = vld [vmem:[%s6507_s1 + $0x138] sm:$0xff] }
0x18b9   :  { %2466 = vmatprep.subr.mxu0 %v5898_v43 }
0x18ba   :  { %v5857_v8 = vadd.f32 %v2133_v38, %v2132_v60  ;;  %v5916_v38 = vld [vmem:[%s6507_s1 + $0x120] sm:$0xff]  ;;  %2467 = vmatpush1.msra.mxu0 %v5904_v54  ;;  %v5922_v60 = vld [vmem:[%s6507_s1 + $0x110] sm:$0xff] }
0x18bb   :  { %2468 = vmatprep.subr.mxu0 %v5910_v4 }
0x18bc   :  { %v2146_v13 = vrot.slane %v5857_v8, 2  ;;  %2469 = vmatpush1.msra.mxu0 %v5916_v38 }
0x18bd   :  { %2470 = vmatprep.subr.mxu0 %v5922_v60 }
0x18be   :  { %v2156_v20 = vsel %vm2152_vm5, %v2155_v14, %v2146_v13  ;;  %2471 = vmatpush1.msra.mxu0 %v5930_v55  ;;  %v5936_v14 = vld [vmem:[%s6507_s1 + $0xf8] sm:$0xff] }
0x18bf   :  { %2161 = vrot.lane.b32.xlu0 %v2156_v20, %s4908_s26  ;;  %2472 = vmatprep.subr.mxu0 %v5936_v14 }
0x1931   :  { %v2162_v21 = vpop.permute.xlu0 %2161 }
0x1932   :  { %4469 = vmatmul.mubr.msk.f32.vlgmr.msra.gmra.mxu1 %vm385_vm1, %v2162_v21  ;;  %v5942_v21 = vld [vmem:[%s6507_s1 + $0xf0] sm:$0xff] }
0x1933   :  { %4479 = vmatprep.mubr.msk.f32.mxu1 %vm4907_vm0, %v4904_v23  ;;  %2473 = vmatpush1.msra.mxu0 %v5942_v21 }
0x19f2   :  { %v4470_v22 = vpop.f32.mrf.mxu1 }
0x19f3   :  { %2256 = vrot.lane.b32.xlu0 %v4470_v22, %s4909_s5  ;;  %v2259_v24 = vrot.slane %v4470_v22, 2  ;;  %v2263_v28 = vrot.slane %v4470_v22, 4  ;;  %v2267_v30 = vrot.slane %v4470_v22, 6 }
0x19f4   :  { %v2233_v25 = vpop.f32.mrf.mxu1 }
0x19f5   :  { %2260 = vrot.lane.b32.xlu1 %v2259_v24, %s4910_s6  ;;  %v2247_v26 = vrot.slane %v2233_v25, 4  ;;  %v2243_v27 = vrot.slane %v2233_v25, 2  ;;  %v2251_v29 = vrot.slane %v2233_v25, 6  ;;  %v5948_v24 = vld [vmem:[%s6507_s1 + $0xe0] sm:$0xff] }
0x19f6   :  { %2474 = vmatprep.subr.mxu0 %v5948_v24 }
0x19f7   :  { %2248 = vrot.lane.b32.xlu0 %v2247_v26, %s4911_s7  ;;  %v5959_v26 = vld [vmem:[%s6507_s1 + $0xc8] sm:$0xff] }
0x19f9   :  { %2244 = vrot.lane.b32.xlu1 %v2243_v27, %s4912_s8  ;;  %v5965_v27 = vld [vmem:[%s6507_s1 + $0xc0] sm:$0xff] }
0x19fb   :  { %2264 = vrot.lane.b32.xlu0 %v2263_v28, %s4913_s9  ;;  %v4918_v28 = vmov 2  }
0x19fd   :  { %2252 = vrot.lane.b32.xlu1 %v2251_v29, %s4914_s10  ;;  %v4919_v29 = vmov 7  }
0x1a01   :  { %2268 = vrot.lane.b32.xlu1 %v2267_v30, %s4915_s11  ;;  %v4920_v30 = vmov 3  }
0x1a65   :  { %v2257_v31 = vpop.permute.xlu0 %2256 }
0x1a67   :  { %v2261_v32 = vpop.permute.xlu1 %2260 }
0x1a69   :  { %v2249_v53 = vpop.permute.xlu0 %2248 }
0x1a6b   :  { %v2245_v42 = vpop.permute.xlu1 %2244 }
0x1a6c   :  { %v2272_v33 = vsel %vm2271_vm6, %v2233_v25, %v2245_v42  ;;  %v5954_v25 = vld [vmem:[%s6507_s1 + $0xd8] sm:$0xff]  ;;  %v4923_v42 = vmov 6  }
0x1a6d   :  { %v2274_v34 = vsel %vm2273_vm7, %v2272_v33, %v2249_v53  ;;  %v2265_v7 = vpop.permute.xlu0 %2264  ;;  %2475 = vmatpush1.msra.mxu0 %v5954_v25  ;;  %v105_v53 = vld [vmem:[%s6507_s1 + $0x4c8] sm:$0xff]  ;;  %v104_v33 = vld [vmem:[%s6507_s1 + $0x4b0] sm:$0xff] }
0x1a6e   :  { %2476 = vmatprep.subr.mxu0 %v5959_v26 }
0x1a6f   :  { %v2253_v63 = vpop.permute.xlu1 %2252  ;;  %2477 = vmatpush1.msra.mxu0 %v5965_v27 }
0x1a70   :  { %v2276_v3 = vsel %vm2275_vm8, %v2274_v34, %v2253_v63  ;;  %4482 = vmatprep.subr.mxu0 %v4904_v23  ;;  %v103_v34 = vld [vmem:[%s6507_s1 + $0x498] sm:$0xff] }
0x1a71   :  { %v2278_v5 = vsel %vm2277_vm9, %v2276_v3, %v2257_v31  ;;  %v4921_v31 = vmov 4  }
0x1a72   :  { %v2280_v9 = vsel %vm2279_vm10, %v2278_v5, %v2261_v32  ;;  %v4922_v32 = vmov 5  }
0x1a73   :  { %v2282_v11 = vsel %vm2281_vm11, %v2280_v9, %v2265_v7  ;;  %v2269_v46 = vpop.permute.xlu1 %2268 }
0x1a74   :  { %v2284_v10 = vsel %vm2283_vm12, %v2282_v11, %v2269_v46 }
0x1a75   :  { %v2286_v58 = vsel %vm2285_vm13, %v2284_v10, -1e+09 }
0x1a76   :  { %v2288_v36 = vsel %vm2287_vm14, %v2286_v58, -inf }
0x1a77   :  { %2289 = vmax.xlane.f32.xlu0 %v2288_v36 }
0x1b00   :  { %v2290_v18 = vpop.xlane.xlu0 %2289 }
0x1b01   :  { %v2291_v61 = vsub.f32 %v2286_v58, %v2290_v18 }
0x1b03   :  { %v2292_v19 = vmul.f32 1.442695, %v2291_v61 }
0x1b05   :  { %4764 = vpow2.f32 %v2292_v19 }
0x1b12   :  { %v4765_v47 = vpop.eup %4764 }
0x1b13   :  { %v2294_v48 = vsel %vm2287_vm14, %v4765_v47, 0.0 }
0x1b14   :  { %2295 = vadd.xlane.f32.xlu1 %v2294_v48 }
0x1b9d   :  { %v2296_v2 = vpop.xlane.xlu1 %2295 }
0x1b9e   :  { %4766 = vrcp.f32 %v2296_v2 }
0x1bab   :  { %v4767_v20 = vpop.eup %4766 }
0x1bac   :  { %v2298_v22 = vmul.f32 %v4767_v20, %v4765_v47 }
0x1bae   :  { %2306 = vperm.xlu1 %4628, %v2298_v22   ;;  %2301 = vperm.xlu0 %4627, %v2298_v22  }
0x1bb2   :  { %4629 = vset.pattern.permute.xlu1 %v4918_v28  ;;  %2438 = vrot.lane.b32.xlu0 %v2146_v13, %s4905_s25  ;;  %v106_v13 = vld [vmem:[%s6507_s1 + $0x4e0] sm:$0xff] }
0x1bb3   :  { %2311 = vperm.xlu1 %4629, %v2298_v22   ;;  %4635 = vset.pattern.permute.xlu0 %v4919_v29 }
0x1bb4   :  { %4472 = vmatpush3.msra.mxu1 %v106_v13 }
0x1bb5   :  { %4473 = vmatprep.subr.mxu1 %v4904_v23 }
0x1bb6   :  { %4474 = vmatpush3.msra.mxu1 %v105_v53 }
0x1bb7   :  { %4630 = vset.pattern.permute.xlu1 %v4920_v30  ;;  %4475 = vmatprep.subr.mxu1 %v4904_v23 }
0x1bb8   :  { %2316 = vperm.xlu1 %4630, %v2298_v22   ;;  %4476 = vmatpush3.msra.mxu1 %v104_v33 }
0x1bb9   :  { %4477 = vmatprep.subr.mxu1 %v4904_v23 }
0x1bba   :  { %4478 = vmatpush3.msra.mxu1 %v103_v34 }
0x1bbb   :  { %2572 = vmatprep.subr.mxu1 %v5876_v17 }
0x1bbc   :  { %4631 = vset.pattern.permute.xlu1 %v4921_v31  ;;  %v69_v31 = vld [vmem:[%s6507_s1 + $0x183] ss:$0 sm:$0xff] }
0x1bbd   :  { %2321 = vperm.xlu1 %4631, %v2298_v22  }
0x1bc1   :  { %4632 = vset.pattern.permute.xlu1 %v4922_v32 }
0x1bc2   :  { %2326 = vperm.xlu1 %4632, %v2298_v22  }
0x1bc6   :  { %4633 = vset.pattern.permute.xlu1 %v4923_v42 }
0x1bc7   :  { %2331 = vperm.xlu1 %4633, %v2298_v22  }
0x1bcb   :  { %4634 = vset.pattern.permute.xlu1 %v4919_v29 }
0x1bcc   :  { %2336 = vperm.xlu1 %4634, %v2298_v22  }
0x1c29   :  { %v2307_v63 = vpop.permute.xlu1 %2306  ;;  %v2302_v0 = vpop.permute.xlu0 %2301 }
0x1c2a   :  { %v2309_v18 = vmul.f32 %v2307_v63, %v5390_v15  ;;  %v2304_v61 = vmul.f32 %v2302_v0, %v5329_v16  ;;  %v2541_v0 = vrot.slane %v5808_v6, 6  ;;  %v6057_v6 = vld [vmem:[%s6507_s1 + $0x148] sm:$0xff] }
0x1c2c   :  { %v2340_v20 = vadd.f32 %v2309_v18, %v2304_v61  ;;  %v6071_v18 = vld [vmem:[%s6507_s1 + $0x118] sm:$0xff] }
0x1c2d   :  { %v2439_v3 = vpop.permute.xlu0 %2438 }
0x1c2e   :  { %v2441_v5 = vsel %vm385_vm1, %v5817_v49, %v2439_v3  ;;  %v2312_v7 = vpop.permute.xlu1 %2311 }
0x1c2f   :  { %v2443_v9 = vrot.slane %v2441_v5, 6  ;;  %v2314_v19 = vmul.f32 %v2312_v7, %v5451_v57  ;;  %v6024_v57 = vld [vmem:[%s6507_s1 + $0x181] ss:$8 sm:$0x7] }
0x1c31   :  { %4026 = vmatmul.mubr.msk.f32.vlgmr.msra.gmra.mxu0 %vm281_vm2, %v2443_v9 }
0x1c32   :  { %4498 = vmatprep.mubr.msk.f32.mxu0 %vm4907_vm0, %v4904_v23 }
0x1c33   :  { %v2317_v11 = vpop.permute.xlu1 %2316 }
0x1c34   :  { %v2319_v36 = vmul.f32 %v2317_v11, %v5517_v59 }
0x1c36   :  { %v2341_v48 = vadd.f32 %v2319_v36, %v2314_v19  ;;  %v6064_v36 = vld [vmem:[%s6507_s1 + $0x130] sm:$0xff]  ;;  %v6078_v19 = vld [vmem:[%s6507_s1 + $0x100] sm:$0xff] }
0x1c38   :  { %v2322_v46 = vpop.permute.xlu1 %2321  ;;  %v2344_v59 = vadd.f32 %v2341_v48, %v2340_v20 }
0x1c39   :  { %v2324_v62 = vmul.f32 %v2322_v46, %v5688_v44  ;;  %v6029_v44 = vrot.slane %v6024_v57, %v268_v40 }
0x1c3d   :  { %v2327_v10 = vpop.permute.xlu1 %2326 }
0x1c3e   :  { %v2329_v49 = vmul.f32 %v2327_v10, %v5754_v41  ;;  %v6045_v10 = vld [vmem:[%s6507_s1 + $0x178] sm:$0xff] }
0x1c3f   :  { %4483 = vmatpush3.msra.mxu0 %v6045_v10 }
0x1c40   :  { %v2342_v22 = vadd.f32 %v2329_v49, %v2324_v62  ;;  %4484 = vmatprep.subr.mxu0 %v4904_v23  ;;  %v6086_v49 = vld [vmem:[%s6507_s1 + $0xe8] sm:$0xff] }
0x1c42   :  { %v2332_v58 = vpop.permute.xlu1 %2331 }
0x1c43   :  { %v2334_v1 = vmul.f32 %v2332_v58, %v5813_v35  ;;  %v6050_v58 = vld [vmem:[%s6507_s1 + $0x160] sm:$0xff] }
0x1c44   :  { %4485 = vmatpush3.msra.mxu0 %v6050_v58 }
0x1c45   :  { %4486 = vmatprep.subr.mxu0 %v4904_v23 }
0x1c46   :  { %4487 = vmatpush3.msra.mxu0 %v6057_v6 }
0x1c47   :  { %v2337_v47 = vpop.permute.xlu1 %2336  ;;  %4488 = vmatprep.subr.mxu0 %v4904_v23 }
0x1c48   :  { %v2339_v2 = vmul.f32 %v2337_v47, %v5857_v8  ;;  %4489 = vmatpush3.msra.mxu0 %v6064_v36  ;;  %v6097_v47 = vld [vmem:[%s6507_s1 + $0xd0] sm:$0xff] }
0x1c49   :  { %4490 = vmatprep.subr.mxu0 %v4904_v23 }
0x1c4a   :  { %v2343_v28 = vadd.f32 %v2339_v2, %v2334_v1  ;;  %4491 = vmatpush3.msra.mxu0 %v6071_v18 }
0x1c4b   :  { %4492 = vmatprep.subr.mxu0 %v4904_v23 }
0x1c4c   :  { %v2345_v29 = vadd.f32 %v2343_v28, %v2342_v22  ;;  %4493 = vmatpush3.msra.mxu0 %v6078_v19 }
0x1c4d   :  { %4494 = vmatprep.subr.mxu0 %v4904_v23 }
0x1c4e   :  { %v2346_v15 = vadd.f32 %v2345_v29, %v2344_v59  ;;  %4495 = vmatpush3.msra.mxu0 %v6086_v49  ;;  %v6146_v59 = vrot.slane %v6024_v57, %v272_v51 }
0x1c4f   :  { %4496 = vmatprep.subr.mxu0 %v4904_v23 }
0x1c50   :  { %2348 = vrot.lane.b32.xlu1 %v2346_v15, %s4908_s26  ;;  %4497 = vmatpush3.msra.mxu0 %v6097_v47 }
0x1c51   :  { %4501 = vmatprep.subr.mxu0 %v4904_v23 }
0x1cc2   :  { %v2349_v16 = vpop.permute.xlu1 %2348 }
0x1cc3   :  { %4480 = vmatmul.mubr.msk.f32.vlgmr.msra.gmra.mxu1 %vm385_vm1, %v2349_v16 }
0x1cc4   :  { %2573 = vmatpush1.msra.mxu1 %v5881_v12  ;;  %2620 = vmatprep.mubr.f32.mxu1 %v4904_v23 }
0x1cc5   :  { %2574 = vmatprep.subr.mxu1 %v5886_v56 }
0x1cc6   :  { %2575 = vmatpush1.msra.mxu1 %v5892_v37 }
0x1cc7   :  { %2576 = vmatprep.subr.mxu1 %v5898_v43 }
0x1cc8   :  { %2577 = vmatpush1.msra.mxu1 %v5904_v54 }
0x1cc9   :  { %2578 = vmatprep.subr.mxu1 %v5910_v4 }
0x1cca   :  { %2579 = vmatpush1.msra.mxu1 %v5916_v38 }
0x1ccb   :  { %2580 = vmatprep.subr.mxu1 %v5922_v60 }
0x1ccc   :  { %2581 = vmatpush1.msra.mxu1 %v5930_v55 }
0x1ccd   :  { %2582 = vmatprep.subr.mxu1 %v5936_v14 }
0x1cce   :  { %2583 = vmatpush1.msra.mxu1 %v5942_v21 }
0x1ccf   :  { %2584 = vmatprep.subr.mxu1 %v5948_v24 }
0x1cd0   :  { %2585 = vmatpush1.msra.mxu1 %v5954_v25 }
0x1cd1   :  { %2586 = vmatprep.subr.mxu1 %v5959_v26 }
0x1cd2   :  { %2587 = vmatpush1.msra.mxu1 %v5965_v27 }
0x1cd3   :  { %2800 = vmatprep.subr.mxu1 %v5876_v17 }
0x1cf1   :  { %v2512_v41 = vpop.f32.mrf.mxu0 }
0x1cf2   :  { %v2513_v35 = vadd.f32 %v2512_v41, %v6029_v44 }
0x1cf3   :  { %v2514_v30 = vpop.f32.mrf.mxu0 }
0x1cf4   :  { %2525 = vrot.lane.b32.xlu0 %v2513_v35, %s4905_s25 }
0x1d66   :  { %v2526_v5 = vpop.permute.xlu0 %2525 }
0x1d83   :  { %v2418_v32 = vpop.f32.mrf.mxu1 }
0x1d84   :  { %v6036_v42 = vadd.f32 %v2418_v32, %v69_v31 }
0x1d85   :  { %v4481_v13 = vpop.f32.mrf.mxu1 }
0x1d86   :  { %v2516_v53 = vadd.f32 %v6036_v42, %v5298_v52  ;;  %v2738_v32 = vrot.slane %v6036_v42, 6 }
0x1d88   :  { %v2517_v33 = vadd.f32 %v2516_v53, %v2513_v35  ;;  %v2740_v51 = vadd.f32 %v2738_v32, %v5298_v52 }
0x1d8a   :  { %v4027_v40 = vmul.f32 -1.442695, %v2517_v33 }
0x1d8c   :  { %4768 = vpow2.f32 %v4027_v40 }
0x1d99   :  { %v4769_v34 = vpop.eup %4768 }
0x1d9a   :  { %v2521_v63 = vadd.f32 1.0, %v4769_v34 }
0x1d9c   :  { %4770 = vrcp.f32 %v2521_v63 }
0x1da9   :  { %v4771_v3 = vpop.eup %4770 }
0x1daa   :  { %v2528_v7 = vmul.f32 %v4771_v3, %v2526_v5  ;;  %v2543_v9 = vmul.f32 %v4771_v3, %v2541_v0  ;;  %v2535_v48 = vsub.f32 1.0, %v4771_v3 }
0x1dac   :  { %2530 = vrot.lane.b32.xlu1 %v2528_v7, %s4905_s25 }
0x1e1e   :  { %v2531_v11 = vpop.permute.xlu1 %2530 }
0x1e1f   :  { %v2533_v46 = vadd.f32 %v2531_v11, %v2516_v53 }
0x1e21   :  { %4772 = vtanh.f32 %v2533_v46 }
0x1e2e   :  { %v4773_v61 = vpop.eup %4772 }
0x1e2f   :  { %2537 = vrot.lane.b32.xlu0 %v4773_v61, %s4906_s16 }
0x1e33   :  { %2549 = vrot.lane.b32.xlu0 %v5857_v8, %s4905_s25 }
0x1ea1   :  { %v2538_v62 = vpop.permute.xlu0 %2537 }
0x1ea2   :  { %v2540_v1 = vmul.f32 %v2538_v62, %v2535_v48 }
0x1ea4   :  { %v6101_v2 = vadd.f32 %v2543_v9, %v2540_v1 }
0x1ea5   :  { %v2550_v20 = vpop.permute.xlu0 %2549 }
0x1ea6   :  { %2546 = vrot.lane.b32.xlu1 %v6101_v2, %s4906_s16 }
0x1f18   :  { %v2547_v22 = vpop.permute.xlu1 %2546 }
0x1f19   :  { %v2552_v28 = vsel %vm385_vm1, %v2547_v22, %v2550_v20  ;;  %v6164_v22 = vrot.slane %v6024_v57, %v276_v45 }
0x1f1a   :  { %4028 = vmatmul.mubr.msk.f32.vlgmr.msra.gmra.mxu1 %vm281_vm2, %v2552_v28  ;;  %4499 = vmatmul.mubr.msk.f32.vlgmr.msra.gmra.mxu0 %vm281_vm2, %v2552_v28 }
0x1f1b   :  { %2801 = vmatpush1.msra.mxu1 %v5881_v12  ;;  %4502 = vmatpush3.msra.mxu0 %v6045_v10 }
0x1f1c   :  { %2802 = vmatprep.subr.mxu1 %v5886_v56  ;;  %4503 = vmatprep.subr.mxu0 %v4904_v23 }
0x1f1d   :  { %2803 = vmatpush1.msra.mxu1 %v5892_v37  ;;  %4504 = vmatpush3.msra.mxu0 %v6050_v58 }
0x1f1e   :  { %2804 = vmatprep.subr.mxu1 %v5898_v43  ;;  %4505 = vmatprep.subr.mxu0 %v4904_v23 }
0x1f1f   :  { %2805 = vmatpush1.msra.mxu1 %v5904_v54  ;;  %4506 = vmatpush3.msra.mxu0 %v6057_v6 }
0x1f20   :  { %2806 = vmatprep.subr.mxu1 %v5910_v4  ;;  %4507 = vmatprep.subr.mxu0 %v4904_v23 }
0x1f21   :  { %2807 = vmatpush1.msra.mxu1 %v5916_v38  ;;  %4508 = vmatpush3.msra.mxu0 %v6064_v36 }
0x1f22   :  { %2808 = vmatprep.subr.mxu1 %v5922_v60  ;;  %4509 = vmatprep.subr.mxu0 %v4904_v23 }
0x1f23   :  { %2809 = vmatpush1.msra.mxu1 %v5930_v55  ;;  %4510 = vmatpush3.msra.mxu0 %v6071_v18 }
0x1f24   :  { %2810 = vmatprep.subr.mxu1 %v5936_v14  ;;  %4511 = vmatprep.subr.mxu0 %v4904_v23 }
0x1f25   :  { %2811 = vmatpush1.msra.mxu1 %v5942_v21  ;;  %4512 = vmatpush3.msra.mxu0 %v6078_v19 }
0x1f26   :  { %2812 = vmatprep.subr.mxu1 %v5948_v24  ;;  %4513 = vmatprep.subr.mxu0 %v4904_v23 }
0x1f27   :  { %2813 = vmatpush1.msra.mxu1 %v5954_v25  ;;  %4514 = vmatpush3.msra.mxu0 %v6086_v49 }
0x1f28   :  { %2814 = vmatprep.subr.mxu1 %v5959_v26  ;;  %4515 = vmatprep.subr.mxu0 %v4904_v23 }
0x1f29   :  { %2815 = vmatpush1.msra.mxu1 %v5965_v27  ;;  %2848 = vmatprep.mubr.f32.mxu1 %v4904_v23 }
0x1f2a   :  { %4516 = vmatpush3.msra.mxu0 %v6097_v47  ;;  %4517 = vmatprep.mubr.msk.f32.mxu0 %vm4907_vm0, %v4904_v23 }
0x1f2b   :  { %3027 = vmatprep.subr.mxu1 %v5876_v17  ;;  %4520 = vmatprep.subr.mxu0 %v4904_v23 }
0x1fda   :  { %v2622_v29 = vpop.f32.mrf.mxu1  ;;  %v2693_v15 = vpop.f32.mrf.mxu0 }
0x1fdb   :  { %v2623_v16 = vadd.f32 %v2622_v29, %v6029_v44  ;;  %v2694_v28 = vadd.f32 %v2693_v15, %v6164_v22 }
0x1fdc   :  { %v2624_v41 = vpop.f32.mrf.mxu1  ;;  %v4500_v35 = vpop.f32.mrf.mxu0 }
0x1fdd   :  { %v2625_v30 = vadd.f32 %v2624_v41, %v6146_v59  ;;  %2698 = vrot.lane.b32.xlu1 %v2623_v16, %s4906_s16  ;;  %v2741_v31 = vrot.slane %v2623_v16, 6 }
0x1fdf   :  { %2719 = vrot.lane.b32.xlu0 %v2625_v30, %s4908_s26  ;;  %v2743_v13 = vadd.f32 %v2741_v31, %v2740_v51 }
0x1fe1   :  { %2750 = vrot.lane.b32.xlu1 %v2741_v31, %s4905_s25  ;;  %v4032_v53 = vmul.f32 -1.442695, %v2743_v13  ;;  %v2766_v13 = vrot.slane %v6101_v2, 6 }
0x1fe3   :  { %4774 = vpow2.f32 %v4032_v53 }
0x1ff0   :  { %v4775_v33 = vpop.eup %4774 }
0x1ff1   :  { %v2747_v40 = vadd.f32 1.0, %v4775_v33 }
0x1ff3   :  { %4776 = vrcp.f32 %v2747_v40 }
0x2000   :  { %v4777_v3 = vpop.eup %4776 }
0x2001   :  { %v2760_v53 = vsub.f32 1.0, %v4777_v3  ;;  %v2768_v40 = vmul.f32 %v4777_v3, %v2766_v13 }
0x204f   :  { %v2699_v34 = vpop.permute.xlu1 %2698 }
0x2050   :  { %v2701_v63 = vadd.f32 %v2699_v34, %v2625_v30 }
0x2051   :  { %v2720_v61 = vpop.permute.xlu0 %2719 }
0x2052   :  { %v4030_v0 = vmul.f32 -1.442695, %v2701_v63 }
0x2053   :  { %v2751_v5 = vpop.permute.xlu1 %2750 }
0x2054   :  { %4778 = vpow2.f32 %v4030_v0  ;;  %v2753_v7 = vmul.f32 %v4777_v3, %v2751_v5 }
0x2056   :  { %2755 = vrot.lane.b32.xlu1 %v2753_v7, %s4905_s25 }
0x2061   :  { %v4779_v9 = vpop.eup %4778 }
0x2062   :  { %v2705_v11 = vadd.f32 1.0, %v4779_v9 }
0x2064   :  { %4780 = vrcp.f32 %v2705_v11 }
0x2071   :  { %v4781_v46 = vpop.eup %4780 }
0x2072   :  { %v2722_v48 = vmul.f32 %v4781_v46, %v2720_v61 }
0x2074   :  { %2724 = vrot.lane.b32.xlu0 %v2722_v48, %s4905_s25 }
0x2078   :  { %2709 = vrot.lane.b32.xlu0 %v2625_v30, %s4906_s16 }
0x20c8   :  { %v2756_v62 = vpop.permute.xlu1 %2755 }
0x20c9   :  { %v2758_v1 = vadd.f32 %v2756_v62, %v2740_v51 }
0x20cb   :  { %4782 = vtanh.f32 %v2758_v1 }
0x20d8   :  { %v4783_v20 = vpop.eup %4782 }
0x20d9   :  { %2762 = vrot.lane.b32.xlu0 %v4783_v20, %s4906_s16 }
0x20e6   :  { %v2725_v29 = vpop.permute.xlu0 %2724 }
0x20e7   :  { %v2727_v16 = vadd.f32 %v2725_v29, %v2694_v28  ;;  %v2965_v29 = vrot.slane %v6036_v42, 4 }
0x20e9   :  { %4784 = vtanh.f32 %v2727_v16  ;;  %v2967_v16 = vadd.f32 %v2965_v29, %v5298_v52 }
0x20ea   :  { %v2710_v35 = vpop.permute.xlu0 %2709 }
0x20eb   :  { %v2712_v31 = vadd.f32 %v2710_v35, %v2625_v30 }
0x20ed   :  { %v4031_v51 = vmul.f32 -1.442695, %v2712_v31 }
0x20ef   :  { %4786 = vpow2.f32 %v4031_v51 }
0x20f6   :  { %v4785_v41 = vpop.eup %4784 }
0x20f7   :  { %2731 = vrot.lane.b32.xlu1 %v4785_v41, %s4906_s16 }
0x20fc   :  { %v4787_v57 = vpop.eup %4786 }
0x20fd   :  { %v2716_v15 = vadd.f32 1.0, %v4787_v57 }
0x20ff   :  { %4788 = vrcp.f32 %v2716_v15 }
0x210c   :  { %v4789_v34 = vpop.eup %4788 }
0x210d   :  { %v2729_v63 = vsub.f32 1.0, %v4789_v34  ;;  %v2735_v30 = vmul.f32 %v4789_v34, %v5857_v8 }
0x214b   :  { %v2763_v33 = vpop.permute.xlu0 %2762 }
0x214c   :  { %v2765_v39 = vmul.f32 %v2763_v33, %v2760_v53 }
0x214e   :  { %v6169_v45 = vadd.f32 %v2768_v40, %v2765_v39 }
0x2150   :  { %2771 = vrot.lane.b32.xlu1 %v6169_v45, %s4906_s16 }
0x2169   :  { %v2732_v0 = vpop.permute.xlu1 %2731 }
0x216a   :  { %v2734_v5 = vmul.f32 %v2732_v0, %v2729_v63 }
0x216c   :  { %v6174_v7 = vadd.f32 %v2735_v30, %v2734_v5 }
0x216e   :  { %v2775_v2 = vrot.slane %v6174_v7, 6 }
0x2170   :  { %2776 = vrot.lane.b32.xlu0 %v2775_v2, %s4905_s25 }
0x21c2   :  { %v2772_v3 = vpop.permute.xlu1 %2771 }
0x21e2   :  { %v2777_v9 = vpop.permute.xlu0 %2776 }
0x21e3   :  { %v2779_v11 = vsel %vm385_vm1, %v2772_v3, %v2777_v9 }
0x21e4   :  { %v2781_v46 = vrot.slane %v2779_v11, 2 }
0x21e6   :  { %4033 = vmatmul.mubr.msk.f32.vlgmr.msra.gmra.mxu1 %vm281_vm2, %v2781_v46  ;;  %4518 = vmatmul.mubr.msk.f32.vlgmr.msra.gmra.mxu0 %vm281_vm2, %v2781_v46 }
0x21e7   :  { %3028 = vmatpush1.msra.mxu1 %v5881_v12  ;;  %4521 = vmatpush3.msra.mxu0 %v6045_v10 }
0x21e8   :  { %3029 = vmatprep.subr.mxu1 %v5886_v56  ;;  %4522 = vmatprep.subr.mxu0 %v4904_v23 }
0x21e9   :  { %3030 = vmatpush1.msra.mxu1 %v5892_v37  ;;  %4523 = vmatpush3.msra.mxu0 %v6050_v58 }
0x21ea   :  { %3031 = vmatprep.subr.mxu1 %v5898_v43  ;;  %4524 = vmatprep.subr.mxu0 %v4904_v23 }
0x21eb   :  { %3032 = vmatpush1.msra.mxu1 %v5904_v54  ;;  %4525 = vmatpush3.msra.mxu0 %v6057_v6 }
0x21ec   :  { %3033 = vmatprep.subr.mxu1 %v5910_v4  ;;  %4526 = vmatprep.subr.mxu0 %v4904_v23 }
0x21ed   :  { %3034 = vmatpush1.msra.mxu1 %v5916_v38  ;;  %4527 = vmatpush3.msra.mxu0 %v6064_v36 }
0x21ee   :  { %3035 = vmatprep.subr.mxu1 %v5922_v60  ;;  %4528 = vmatprep.subr.mxu0 %v4904_v23 }
0x21ef   :  { %3036 = vmatpush1.msra.mxu1 %v5930_v55  ;;  %4529 = vmatpush3.msra.mxu0 %v6071_v18 }
0x21f0   :  { %3037 = vmatprep.subr.mxu1 %v5936_v14  ;;  %4530 = vmatprep.subr.mxu0 %v4904_v23 }
0x21f1   :  { %3038 = vmatpush1.msra.mxu1 %v5942_v21  ;;  %4531 = vmatpush3.msra.mxu0 %v6078_v19 }
0x21f2   :  { %3039 = vmatprep.subr.mxu1 %v5948_v24  ;;  %4532 = vmatprep.subr.mxu0 %v4904_v23 }
0x21f3   :  { %3040 = vmatpush1.msra.mxu1 %v5954_v25  ;;  %4533 = vmatpush3.msra.mxu0 %v6086_v49 }
0x21f4   :  { %3041 = vmatprep.subr.mxu1 %v5959_v26  ;;  %4534 = vmatprep.subr.mxu0 %v4904_v23 }
0x21f5   :  { %3042 = vmatpush1.msra.mxu1 %v5965_v27  ;;  %3075 = vmatprep.mubr.f32.mxu1 %v4904_v23 }
0x21f6   :  { %4535 = vmatpush3.msra.mxu0 %v6097_v47  ;;  %4536 = vmatprep.mubr.msk.f32.mxu0 %vm4907_vm0, %v4904_v23 }
0x21f7   :  { %3254 = vmatprep.subr.mxu1 %v5876_v17  ;;  %4539 = vmatprep.subr.mxu0 %v4904_v23 }
0x22a6   :  { %v2850_v8 = vpop.f32.mrf.mxu1  ;;  %v2921_v61 = vpop.f32.mrf.mxu0 }
0x22a7   :  { %v2851_v48 = vadd.f32 %v2850_v8, %v6029_v44  ;;  %v2922_v9 = vadd.f32 %v2921_v61, %v6164_v22 }
0x22a8   :  { %v2852_v62 = vpop.f32.mrf.mxu1  ;;  %v4519_v1 = vpop.f32.mrf.mxu0 }
0x22a9   :  { %v2853_v20 = vadd.f32 %v2852_v62, %v6146_v59  ;;  %2926 = vrot.lane.b32.xlu1 %v2851_v48, %s4906_s16  ;;  %v2968_v28 = vrot.slane %v2851_v48, 4 }
0x22ab   :  { %2947 = vrot.lane.b32.xlu0 %v2853_v20, %s4908_s26  ;;  %v2970_v41 = vadd.f32 %v2968_v28, %v2967_v16 }
0x22ad   :  { %2977 = vrot.lane.b32.xlu1 %v2968_v28, %s4905_s25  ;;  %v4037_v35 = vmul.f32 -1.442695, %v2970_v41  ;;  %v2993_v28 = vrot.slane %v6169_v45, 6 }
0x22af   :  { %4790 = vpow2.f32 %v4037_v35 }
0x22bc   :  { %v4791_v31 = vpop.eup %4790 }
0x22bd   :  { %v2974_v51 = vadd.f32 1.0, %v4791_v31 }
0x22bf   :  { %4792 = vrcp.f32 %v2974_v51 }
0x22cc   :  { %v4793_v39 = vpop.eup %4792 }
0x22cd   :  { %v2987_v29 = vsub.f32 1.0, %v4793_v39  ;;  %v2995_v35 = vmul.f32 %v4793_v39, %v2993_v28 }
0x231b   :  { %v2927_v13 = vpop.permute.xlu1 %2926 }
0x231c   :  { %v2929_v53 = vadd.f32 %v2927_v13, %v2853_v20 }
0x231d   :  { %v2948_v0 = vpop.permute.xlu0 %2947 }
0x231e   :  { %v4035_v33 = vmul.f32 -1.442695, %v2929_v53 }
0x231f   :  { %v2978_v40 = vpop.permute.xlu1 %2977 }
0x2320   :  { %4794 = vpow2.f32 %v4035_v33  ;;  %v2980_v57 = vmul.f32 %v4793_v39, %v2978_v40 }
0x2322   :  { %2982 = vrot.lane.b32.xlu1 %v2980_v57, %s4905_s25 }
0x232d   :  { %v4795_v15 = vpop.eup %4794 }
0x232e   :  { %v2933_v34 = vadd.f32 1.0, %v4795_v15 }
0x2330   :  { %4796 = vrcp.f32 %v2933_v34 }
0x233d   :  { %v4797_v63 = vpop.eup %4796 }
0x233e   :  { %v2950_v30 = vmul.f32 %v4797_v63, %v2948_v0 }
0x2340   :  { %2952 = vrot.lane.b32.xlu0 %v2950_v30, %s4905_s25 }
0x2344   :  { %2937 = vrot.lane.b32.xlu0 %v2853_v20, %s4906_s16 }
0x2394   :  { %v2983_v5 = vpop.permute.xlu1 %2982 }
0x2395   :  { %v2985_v2 = vadd.f32 %v2983_v5, %v2967_v16 }
0x2397   :  { %4798 = vtanh.f32 %v2985_v2 }
0x23a4   :  { %v4799_v3 = vpop.eup %4798 }
0x23a5   :  { %2989 = vrot.lane.b32.xlu0 %v4799_v3, %s4906_s16 }
0x23b2   :  { %v2953_v11 = vpop.permute.xlu0 %2952 }
0x23b3   :  { %v2955_v46 = vadd.f32 %v2953_v11, %v2922_v9 }
0x23b5   :  { %4800 = vtanh.f32 %v2955_v46  ;;  %v3192_v46 = vrot.slane %v6036_v42, 2 }
0x23b6   :  { %v2938_v48 = vpop.permute.xlu0 %2937 }
0x23b7   :  { %v2940_v62 = vadd.f32 %v2938_v48, %v2853_v20 }
0x23b9   :  { %v4036_v1 = vmul.f32 -1.442695, %v2940_v62 }
0x23bb   :  { %4802 = vpow2.f32 %v4036_v1 }
0x23c2   :  { %v4801_v8 = vpop.eup %4800 }
0x23c3   :  { %2959 = vrot.lane.b32.xlu1 %v4801_v8, %s4906_s16 }
0x23c8   :  { %v4803_v61 = vpop.eup %4802 }
0x23c9   :  { %v2944_v51 = vadd.f32 1.0, %v4803_v61 }
0x23cb   :  { %4804 = vrcp.f32 %v2944_v51 }
0x23d8   :  { %v4805_v13 = vpop.eup %4804 }
0x23d9   :  { %v2957_v53 = vsub.f32 1.0, %v4805_v13  ;;  %v2963_v20 = vmul.f32 %v4805_v13, %v6174_v7 }
0x2417   :  { %v2990_v16 = vpop.permute.xlu0 %2989 }
0x2418   :  { %v2992_v41 = vmul.f32 %v2990_v16, %v2987_v29 }
0x241a   :  { %v6230_v31 = vadd.f32 %v2995_v35, %v2992_v41 }
0x241c   :  { %2998 = vrot.lane.b32.xlu1 %v6230_v31, %s4906_s16 }
0x2435   :  { %v2960_v33 = vpop.permute.xlu1 %2959 }
0x2436   :  { %v2962_v40 = vmul.f32 %v2960_v33, %v2957_v53 }
0x2438   :  { %v6235_v57 = vadd.f32 %v2963_v20, %v2962_v40 }
0x243a   :  { %v3002_v45 = vrot.slane %v6235_v57, 4 }
0x243c   :  { %3003 = vrot.lane.b32.xlu0 %v3002_v45, %s4905_s25 }
0x248e   :  { %v2999_v39 = vpop.permute.xlu1 %2998 }
0x24ae   :  { %v3004_v15 = vpop.permute.xlu0 %3003 }
0x24af   :  { %v3006_v34 = vsel %vm385_vm1, %v2999_v39, %v3004_v15 }
0x24b0   :  { %v3008_v63 = vrot.slane %v3006_v34, 4 }
0x24b2   :  { %4038 = vmatmul.mubr.msk.f32.vlgmr.msra.gmra.mxu1 %vm281_vm2, %v3008_v63  ;;  %4537 = vmatmul.mubr.msk.f32.vlgmr.msra.gmra.mxu0 %vm281_vm2, %v3008_v63 }
0x24b3   :  { %3255 = vmatpush1.msra.mxu1 %v5881_v12  ;;  %4540 = vmatpush3.msra.mxu0 %v6045_v10 }
0x24b4   :  { %3256 = vmatprep.subr.mxu1 %v5886_v56  ;;  %4541 = vmatprep.subr.mxu0 %v4904_v23 }
0x24b5   :  { %3257 = vmatpush1.msra.mxu1 %v5892_v37  ;;  %4542 = vmatpush3.msra.mxu0 %v6050_v58 }
0x24b6   :  { %3258 = vmatprep.subr.mxu1 %v5898_v43  ;;  %4543 = vmatprep.subr.mxu0 %v4904_v23 }
0x24b7   :  { %3259 = vmatpush1.msra.mxu1 %v5904_v54  ;;  %4544 = vmatpush3.msra.mxu0 %v6057_v6 }
0x24b8   :  { %3260 = vmatprep.subr.mxu1 %v5910_v4  ;;  %4545 = vmatprep.subr.mxu0 %v4904_v23 }
0x24b9   :  { %3261 = vmatpush1.msra.mxu1 %v5916_v38  ;;  %4546 = vmatpush3.msra.mxu0 %v6064_v36 }
0x24ba   :  { %3262 = vmatprep.subr.mxu1 %v5922_v60  ;;  %4547 = vmatprep.subr.mxu0 %v4904_v23 }
0x24bb   :  { %3263 = vmatpush1.msra.mxu1 %v5930_v55  ;;  %4548 = vmatpush3.msra.mxu0 %v6071_v18 }
0x24bc   :  { %3264 = vmatprep.subr.mxu1 %v5936_v14  ;;  %4549 = vmatprep.subr.mxu0 %v4904_v23 }
0x24bd   :  { %3265 = vmatpush1.msra.mxu1 %v5942_v21  ;;  %4550 = vmatpush3.msra.mxu0 %v6078_v19 }
0x24be   :  { %3266 = vmatprep.subr.mxu1 %v5948_v24  ;;  %4551 = vmatprep.subr.mxu0 %v4904_v23 }
0x24bf   :  { %3267 = vmatpush1.msra.mxu1 %v5954_v25  ;;  %4552 = vmatpush3.msra.mxu0 %v6086_v49 }
0x24c0   :  { %3268 = vmatprep.subr.mxu1 %v5959_v26  ;;  %4553 = vmatprep.subr.mxu0 %v4904_v23 }
0x24c1   :  { %3269 = vmatpush1.msra.mxu1 %v5965_v27  ;;  %3302 = vmatprep.mubr.f32.mxu1 %v4904_v23 }
0x24c2   :  { %4554 = vmatpush3.msra.mxu0 %v6097_v47  ;;  %4555 = vmatprep.mubr.msk.f32.mxu0 %vm4907_vm0, %v4904_v23 }
0x24c3   :  { %3475 = vmatprep.subr.mxu1 %v5876_v17  ;;  %4558 = vmatprep.subr.mxu0 %v4904_v23  ;;  %v3194_v17 = vadd.f32 %v3192_v46, %v5298_v52 }
0x2572   :  { %v3077_v0 = vpop.f32.mrf.mxu1  ;;  %v3148_v30 = vpop.f32.mrf.mxu0 }
0x2573   :  { %v3078_v5 = vadd.f32 %v3077_v0, %v6029_v44  ;;  %v3149_v39 = vadd.f32 %v3148_v30, %v6164_v22 }
0x2574   :  { %v3079_v2 = vpop.f32.mrf.mxu1  ;;  %v4538_v3 = vpop.f32.mrf.mxu0 }
0x2575   :  { %v3080_v9 = vadd.f32 %v3079_v2, %v6146_v59  ;;  %3153 = vrot.lane.b32.xlu1 %v3078_v5, %s4906_s16  ;;  %v3195_v11 = vrot.slane %v3078_v5, 2  ;;  %v3220_v3 = vrot.slane %v6230_v31, 6 }
0x2577   :  { %3174 = vrot.lane.b32.xlu0 %v3080_v9, %s4908_s26  ;;  %v3197_v8 = vadd.f32 %v3195_v11, %v3194_v17 }
0x2579   :  { %3204 = vrot.lane.b32.xlu1 %v3195_v11, %s4905_s25  ;;  %v4042_v48 = vmul.f32 -1.442695, %v3197_v8 }
0x257b   :  { %4806 = vpow2.f32 %v4042_v48 }
0x2588   :  { %v4807_v62 = vpop.eup %4806 }
0x2589   :  { %v3201_v1 = vadd.f32 1.0, %v4807_v62 }
0x258b   :  { %4808 = vrcp.f32 %v3201_v1 }
0x2598   :  { %v4809_v41 = vpop.eup %4808 }
0x2599   :  { %v3214_v11 = vsub.f32 1.0, %v4809_v41  ;;  %v3222_v8 = vmul.f32 %v4809_v41, %v3220_v3 }
0x25e7   :  { %v3154_v28 = vpop.permute.xlu1 %3153 }
0x25e8   :  { %v3156_v29 = vadd.f32 %v3154_v28, %v3080_v9 }
0x25e9   :  { %v3175_v52 = vpop.permute.xlu0 %3174 }
0x25ea   :  { %v4040_v16 = vmul.f32 -1.442695, %v3156_v29 }
0x25eb   :  { %v3205_v35 = vpop.permute.xlu1 %3204 }
0x25ec   :  { %4810 = vpow2.f32 %v4040_v16  ;;  %v3207_v61 = vmul.f32 %v4809_v41, %v3205_v35 }
0x25ee   :  { %3209 = vrot.lane.b32.xlu1 %v3207_v61, %s4905_s25 }
0x25f9   :  { %v4811_v51 = vpop.eup %4810 }
0x25fa   :  { %v3160_v13 = vadd.f32 1.0, %v4811_v51 }
0x25fc   :  { %4812 = vrcp.f32 %v3160_v13 }
0x2609   :  { %v4813_v53 = vpop.eup %4812 }
0x260a   :  { %v3177_v33 = vmul.f32 %v4813_v53, %v3175_v52 }
0x260c   :  { %3179 = vrot.lane.b32.xlu0 %v3177_v33, %s4905_s25 }
0x2610   :  { %3164 = vrot.lane.b32.xlu0 %v3080_v9, %s4906_s16 }
0x2660   :  { %v3210_v20 = vpop.permute.xlu1 %3209 }
0x2661   :  { %v3212_v40 = vadd.f32 %v3210_v20, %v3194_v17 }
0x2663   :  { %4814 = vtanh.f32 %v3212_v40 }
0x2670   :  { %v4815_v45 = vpop.eup %4814 }
0x2671   :  { %3216 = vrot.lane.b32.xlu0 %v4815_v45, %s4906_s16 }
0x267e   :  { %v3180_v15 = vpop.permute.xlu0 %3179 }
0x267f   :  { %v3182_v34 = vadd.f32 %v3180_v15, %v3149_v39 }
0x2681   :  { %4816 = vtanh.f32 %v3182_v34 }
0x2682   :  { %v3165_v0 = vpop.permute.xlu0 %3164 }
0x2683   :  { %v3167_v5 = vadd.f32 %v3165_v0, %v3080_v9 }
0x2685   :  { %v4041_v2 = vmul.f32 -1.442695, %v3167_v5 }
0x2687   :  { %4818 = vpow2.f32 %v4041_v2 }
0x268e   :  { %v4817_v63 = vpop.eup %4816 }
0x268f   :  { %3186 = vrot.lane.b32.xlu1 %v4817_v63, %s4906_s16 }
0x2694   :  { %v4819_v30 = vpop.eup %4818 }
0x2695   :  { %v3171_v62 = vadd.f32 1.0, %v4819_v30 }
0x2697   :  { %4820 = vrcp.f32 %v3171_v62 }
0x26a4   :  { %v4821_v1 = vpop.eup %4820 }
0x26a5   :  { %v3184_v28 = vsub.f32 1.0, %v4821_v1  ;;  %v3190_v9 = vmul.f32 %v4821_v1, %v6235_v57 }
0x26e3   :  { %v3217_v46 = vpop.permute.xlu0 %3216 }
0x26e4   :  { %v3219_v17 = vmul.f32 %v3217_v46, %v3214_v11 }
0x26e6   :  { %v6291_v48 = vadd.f32 %v3222_v8, %v3219_v17 }
0x26e8   :  { %3225 = vrot.lane.b32.xlu1 %v6291_v48, %s4906_s16  ;;  %v3443_v30 = vrot.slane %v6291_v48, 6 }
0x2701   :  { %v3187_v29 = vpop.permute.xlu1 %3186 }
0x2702   :  { %v3189_v16 = vmul.f32 %v3187_v29, %v3184_v28 }
0x2704   :  { %v6296_v35 = vadd.f32 %v3190_v9, %v3189_v16 }
0x2706   :  { %v3229_v31 = vrot.slane %v6296_v35, 2 }
0x2708   :  { %3230 = vrot.lane.b32.xlu0 %v3229_v31, %s4905_s25 }
0x275a   :  { %v3226_v41 = vpop.permute.xlu1 %3225 }
0x277a   :  { %v3231_v61 = vpop.permute.xlu0 %3230 }
0x277b   :  { %v3233_v51 = vsel %vm385_vm1, %v3226_v41, %v3231_v61 }
0x277c   :  { %v3235_v13 = vrot.slane %v3233_v51, 6 }
0x277e   :  { %4043 = vmatmul.mubr.msk.f32.vlgmr.msra.gmra.mxu1 %vm281_vm2, %v3235_v13  ;;  %4556 = vmatmul.mubr.msk.f32.vlgmr.msra.gmra.mxu0 %vm281_vm2, %v3235_v13 }
0x277f   :  { %3476 = vmatpush1.msra.mxu1 %v5881_v12  ;;  %4559 = vmatpush3.msra.mxu0 %v6045_v10  ;;  %v4888_v12 = vld [vmem:[%s6507_s1 + $0x170] sm:$0xff] }
0x2780   :  { %3477 = vmatprep.subr.mxu1 %v5886_v56  ;;  %4560 = vmatprep.subr.mxu0 %v4904_v23 }
0x2781   :  { %3478 = vmatpush1.msra.mxu1 %v5892_v37  ;;  %4561 = vmatpush3.msra.mxu0 %v6050_v58 }
0x2782   :  { %3479 = vmatprep.subr.mxu1 %v5898_v43  ;;  %4562 = vmatprep.subr.mxu0 %v4904_v23 }
0x2783   :  { %3480 = vmatpush1.msra.mxu1 %v5904_v54  ;;  %4563 = vmatpush3.msra.mxu0 %v6057_v6 }
0x2784   :  { %3481 = vmatprep.subr.mxu1 %v5910_v4  ;;  %4564 = vmatprep.subr.mxu0 %v4904_v23 }
0x2785   :  { %3482 = vmatpush1.msra.mxu1 %v5916_v38  ;;  %4565 = vmatpush3.msra.mxu0 %v6064_v36 }
0x2786   :  { %3483 = vmatprep.subr.mxu1 %v5922_v60  ;;  %4566 = vmatprep.subr.mxu0 %v4904_v23  ;;  %v3419_v60 = vadd.f32 %v5295_v50, %v6036_v42 }
0x2787   :  { %3484 = vmatpush1.msra.mxu1 %v5930_v55  ;;  %4567 = vmatpush3.msra.mxu0 %v6071_v18 }
0x2788   :  { %3485 = vmatprep.subr.mxu1 %v5936_v14  ;;  %4568 = vmatprep.subr.mxu0 %v4904_v23 }
0x2789   :  { %3486 = vmatpush1.msra.mxu1 %v5942_v21  ;;  %4569 = vmatpush3.msra.mxu0 %v6078_v19 }
0x278a   :  { %3487 = vmatprep.subr.mxu1 %v5948_v24  ;;  %4570 = vmatprep.subr.mxu0 %v4904_v23 }
0x278b   :  { %3488 = vmatpush1.msra.mxu1 %v5954_v25  ;;  %4571 = vmatpush3.msra.mxu0 %v6086_v49 }
0x278c   :  { %3489 = vmatprep.subr.mxu1 %v5959_v26  ;;  %4572 = vmatprep.subr.mxu0 %v4904_v23 }
0x278d   :  { %3490 = vmatpush1.msra.mxu1 %v5965_v27  ;;  %3523 = vmatprep.mubr.f32.mxu1 %v4904_v23 }
0x278e   :  { %4573 = vmatpush3.msra.mxu0 %v6097_v47  ;;  %4574 = vmatprep.mubr.msk.f32.mxu0 %vm4907_vm0, %v4904_v23 }
0x278f   :  { %3700 = vmatprep.subr.mxu1 %v4888_v12  ;;  %4577 = vmatprep.subr.mxu0 %v4904_v23 }
0x283e   :  { %v3304_v56 = vpop.f32.mrf.mxu1  ;;  %v3375_v37 = vpop.f32.mrf.mxu0 }
0x283f   :  { %v3305_v43 = vadd.f32 %v3304_v56, %v6029_v44  ;;  %v3376_v5 = vadd.f32 %v3375_v37, %v6164_v22 }
0x2840   :  { %v3306_v54 = vpop.f32.mrf.mxu1  ;;  %v4557_v4 = vpop.f32.mrf.mxu0 }
0x2841   :  { %v3307_v38 = vadd.f32 %v3306_v54, %v6146_v59  ;;  %3380 = vrot.lane.b32.xlu1 %v3305_v43, %s4906_s16  ;;  %v3420_v55 = vadd.f32 %v3419_v60, %v3305_v43  ;;  %v4889_v54 = vld [vmem:[%s6507_s1 + $0x168] sm:$0xff]  ;;  %v4890_v4 = vld [vmem:[%s6507_s1 + $0x158] sm:$0xff] }
0x2843   :  { %3401 = vrot.lane.b32.xlu0 %v3307_v38, %s4908_s26  ;;  %v4047_v14 = vmul.f32 -1.442695, %v3420_v55  ;;  %v4894_v55 = vld [vmem:[%s6507_s1 + $0x128] sm:$0xff] }
0x2845   :  { %3427 = vrot.lane.b32.xlu1 %v3305_v43, %s4905_s25  ;;  %4822 = vpow2.f32 %v4047_v14  ;;  %v4896_v14 = vld [vmem:[%s6507_s1 + $0x110] sm:$0xff] }
0x2852   :  { %v4823_v21 = vpop.eup %4822 }
0x2853   :  { %v3424_v24 = vadd.f32 1.0, %v4823_v21  ;;  %v4898_v21 = vld [vmem:[%s6507_s1 + $0xf8] sm:$0xff] }
0x2855   :  { %4824 = vrcp.f32 %v3424_v24  ;;  %v4900_v24 = vld [vmem:[%s6507_s1 + $0xe0] sm:$0xff] }
0x2862   :  { %v4825_v53 = vpop.eup %4824 }
0x2863   :  { %v3437_v62 = vsub.f32 1.0, %v4825_v53  ;;  %v3445_v29 = vmul.f32 %v4825_v53, %v3443_v30 }
0x28b3   :  { %v3381_v25 = vpop.permute.xlu1 %3380 }
0x28b4   :  { %v3383_v26 = vadd.f32 %v3381_v25, %v3307_v38  ;;  %v4902_v25 = vld [vmem:[%s6507_s1 + $0xc8] sm:$0xff] }
0x28b5   :  { %v3402_v39 = vpop.permute.xlu0 %3401 }
0x28b6   :  { %v4045_v27 = vmul.f32 -1.442695, %v3383_v26 }
0x28b7   :  { %v3428_v52 = vpop.permute.xlu1 %3427 }
0x28b8   :  { %4826 = vpow2.f32 %v4045_v27  ;;  %v3430_v33 = vmul.f32 %v4825_v53, %v3428_v52 }
0x28ba   :  { %3432 = vrot.lane.b32.xlu1 %v3430_v33, %s4905_s25 }
0x28c5   :  { %v4827_v20 = vpop.eup %4826 }
0x28c6   :  { %v3387_v40 = vadd.f32 1.0, %v4827_v20 }
0x28c8   :  { %4828 = vrcp.f32 %v3387_v40 }
0x28d5   :  { %v4829_v45 = vpop.eup %4828 }
0x28d6   :  { %v3404_v15 = vmul.f32 %v4829_v45, %v3402_v39 }
0x28d8   :  { %3406 = vrot.lane.b32.xlu0 %v3404_v15, %s4905_s25 }
0x28dc   :  { %3391 = vrot.lane.b32.xlu0 %v3307_v38, %s4906_s16 }
0x292c   :  { %v3433_v34 = vpop.permute.xlu1 %3432 }
0x292d   :  { %v3435_v63 = vadd.f32 %v3433_v34, %v3419_v60  ;;  %v4892_v60 = vld [vmem:[%s6507_s1 + $0x140] sm:$0xff] }
0x292f   :  { %4830 = vtanh.f32 %v3435_v63 }
0x293c   :  { %v4831_v0 = vpop.eup %4830 }
0x293d   :  { %3439 = vrot.lane.b32.xlu0 %v4831_v0, %s4906_s16 }
0x294a   :  { %v3407_v2 = vpop.permute.xlu0 %3406 }
0x294b   :  { %v3409_v3 = vadd.f32 %v3407_v2, %v3376_v5 }
0x294d   :  { %4832 = vtanh.f32 %v3409_v3 }
0x294e   :  { %v3392_v46 = vpop.permute.xlu0 %3391 }
0x294f   :  { %v3394_v17 = vadd.f32 %v3392_v46, %v3307_v38  ;;  %v4891_v38 = vld [vmem:[%s6507_s1 + $0x150] sm:$0xff] }
0x2951   :  { %v4046_v8 = vmul.f32 -1.442695, %v3394_v17 }
0x2953   :  { %4834 = vpow2.f32 %v4046_v8 }
0x295a   :  { %v4833_v11 = vpop.eup %4832 }
0x295b   :  { %3413 = vrot.lane.b32.xlu1 %v4833_v11, %s4906_s16 }
0x2960   :  { %v4835_v16 = vpop.eup %4834 }
0x2961   :  { %v3398_v31 = vadd.f32 1.0, %v4835_v16 }
0x2963   :  { %4836 = vrcp.f32 %v3398_v31 }
0x2970   :  { %v4837_v41 = vpop.eup %4836 }
0x2971   :  { %v3411_v61 = vsub.f32 1.0, %v4837_v41  ;;  %v3417_v13 = vmul.f32 %v4837_v41, %v6296_v35 }
0x29af   :  { %v3440_v1 = vpop.permute.xlu0 %3439 }
0x29b0   :  { %v3442_v28 = vmul.f32 %v3440_v1, %v3437_v62 }
0x29b2   :  { %v6354_v9 = vadd.f32 %v3445_v29, %v3442_v28 }
0x29b4   :  { %3448 = vrot.lane.b32.xlu1 %v6354_v9, %s4906_s16  ;;  %v3666_v41 = vrot.slane %v6354_v9, 6 }
0x29cd   :  { %v3414_v51 = vpop.permute.xlu1 %3413 }
0x29ce   :  { %v3416_v12 = vmul.f32 %v3414_v51, %v3411_v61 }
0x29d0   :  { %v6359_v56 = vadd.f32 %v3417_v13, %v3416_v12 }
0x29d2   :  { %3452 = vrot.lane.b32.xlu0 %v6359_v56, %s4905_s25 }
0x2a26   :  { %v3449_v48 = vpop.permute.xlu1 %3448 }
0x2a44   :  { %v3453_v37 = vpop.permute.xlu0 %3452 }
0x2a45   :  { %v3455_v43 = vsel %vm385_vm1, %v3449_v48, %v3453_v37 }
0x2a46   :  { %4048 = vmatmul.mubr.msk.f32.vlgmr.msra.gmra.mxu1 %vm281_vm2, %v3455_v43  ;;  %4575 = vmatmul.mubr.msk.f32.vlgmr.msra.gmra.mxu0 %vm281_vm2, %v3455_v43 }
0x2a47   :  { %3701 = vmatpush1.msra.mxu1 %v4889_v54  ;;  %4578 = vmatpush3.msra.mxu0 %v6045_v10  ;;  %v4893_v10 = vld [vmem:[%s6507_s1 + $0x138] sm:$0xff] }
0x2a48   :  { %3702 = vmatprep.subr.mxu1 %v4890_v4  ;;  %4579 = vmatprep.subr.mxu0 %v4904_v23 }
0x2a49   :  { %3703 = vmatpush1.msra.mxu1 %v4891_v38  ;;  %4580 = vmatpush3.msra.mxu0 %v6050_v58  ;;  %v4895_v58 = vld [vmem:[%s6507_s1 + $0x120] sm:$0xff] }
0x2a4a   :  { %3704 = vmatprep.subr.mxu1 %v4892_v60  ;;  %4581 = vmatprep.subr.mxu0 %v4904_v23 }
0x2a4b   :  { %3705 = vmatpush1.msra.mxu1 %v4893_v10  ;;  %4582 = vmatpush3.msra.mxu0 %v6057_v6  ;;  %v4897_v6 = vld [vmem:[%s6507_s1 + $0x108] sm:$0xff] }
0x2a4c   :  { %3706 = vmatprep.subr.mxu1 %v4894_v55  ;;  %4583 = vmatprep.subr.mxu0 %v4904_v23 }
0x2a4d   :  { %3707 = vmatpush1.msra.mxu1 %v4895_v58  ;;  %4584 = vmatpush3.msra.mxu0 %v6064_v36  ;;  %v4899_v36 = vld [vmem:[%s6507_s1 + $0xf0] sm:$0xff] }
0x2a4e   :  { %3708 = vmatprep.subr.mxu1 %v4896_v14  ;;  %4585 = vmatprep.subr.mxu0 %v4904_v23 }
0x2a4f   :  { %3709 = vmatpush1.msra.mxu1 %v4897_v6  ;;  %4586 = vmatpush3.msra.mxu0 %v6071_v18  ;;  %v4901_v18 = vld [vmem:[%s6507_s1 + $0xd8] sm:$0xff] }
0x2a50   :  { %3710 = vmatprep.subr.mxu1 %v4898_v21  ;;  %4587 = vmatprep.subr.mxu0 %v4904_v23 }
0x2a51   :  { %3711 = vmatpush1.msra.mxu1 %v4899_v36  ;;  %4588 = vmatpush3.msra.mxu0 %v6078_v19  ;;  %v4903_v19 = vld [vmem:[%s6507_s1 + $0xc0] sm:$0xff] }
0x2a52   :  { %3712 = vmatprep.subr.mxu1 %v4900_v24  ;;  %4589 = vmatprep.subr.mxu0 %v4904_v23 }
0x2a53   :  { %3713 = vmatpush1.msra.mxu1 %v4901_v18  ;;  %4590 = vmatpush3.msra.mxu0 %v6086_v49 }
0x2a54   :  { %3714 = vmatprep.subr.mxu1 %v4902_v25  ;;  %4591 = vmatprep.subr.mxu0 %v4904_v23 }
0x2a55   :  { %3715 = vmatpush1.msra.mxu1 %v4903_v19  ;;  %3748 = vmatprep.mubr.f32.mxu1 %v4904_v23 }
0x2a56   :  { %4592 = vmatpush3.msra.mxu0 %v6097_v47  ;;  %4593 = vmatprep.mubr.msk.f32.mxu0 %vm4907_vm0, %v4904_v23  ;;  %v3640_v47 = vadd.f32 %v5295_v50, %v2738_v32 }
0x2b06   :  { %v3525_v49 = vpop.f32.mrf.mxu1  ;;  %v3596_v26 = vpop.f32.mrf.mxu0 }
0x2b07   :  { %v3526_v27 = vadd.f32 %v3525_v49, %v6029_v44  ;;  %v3597_v30 = vadd.f32 %v3596_v26, %v6164_v22  ;;  %v3865_v26 = vrot.slane %v6235_v57, 6 }
0x2b08   :  { %v3527_v53 = vpop.f32.mrf.mxu1  ;;  %v4576_v52 = vpop.f32.mrf.mxu0 }
0x2b09   :  { %v3528_v33 = vadd.f32 %v3527_v53, %v6146_v59  ;;  %3601 = vrot.lane.b32.xlu1 %v3526_v27, %s4906_s16  ;;  %v3641_v20 = vrot.slane %v3526_v27, 6  ;;  %v3867_v27 = vrot.slane %v6296_v35, 4  ;;  %v3869_v53 = vrot.slane %v6359_v56, 2 }
0x2b0a   :  { %v3874_v52 = vsel %vm2148_vm3, %v6174_v7, %v3865_v26 }
0x2b0b   :  { %3622 = vrot.lane.b32.xlu0 %v3528_v33, %s4908_s26  ;;  %v3643_v23 = vadd.f32 %v3641_v20, %v3640_v47 }
0x2b0d   :  { %3650 = vrot.lane.b32.xlu1 %v3641_v20, %s4905_s25  ;;  %v4052_v40 = vmul.f32 -1.442695, %v3643_v23 }
0x2b0f   :  { %4838 = vpow2.f32 %v4052_v40 }
0x2b1c   :  { %v4839_v45 = vpop.eup %4838 }
0x2b1d   :  { %v3647_v39 = vadd.f32 1.0, %v4839_v45 }
0x2b1f   :  { %4840 = vrcp.f32 %v3647_v39 }
0x2b2c   :  { %v4841_v0 = vpop.eup %4840 }
0x2b2d   :  { %v3660_v61 = vsub.f32 1.0, %v4841_v0  ;;  %v3668_v12 = vmul.f32 %v4841_v0, %v3666_v41 }
0x2b7b   :  { %v3602_v15 = vpop.permute.xlu1 %3601 }
0x2b7c   :  { %v3604_v34 = vadd.f32 %v3602_v15, %v3528_v33 }
0x2b7d   :  { %v3623_v50 = vpop.permute.xlu0 %3622 }
0x2b7e   :  { %v4050_v63 = vmul.f32 -1.442695, %v3604_v34 }
0x2b7f   :  { %v3651_v5 = vpop.permute.xlu1 %3650 }
0x2b80   :  { %4842 = vpow2.f32 %v4050_v63  ;;  %v3653_v2 = vmul.f32 %v4841_v0, %v3651_v5  ;;  %v110_v63 = vld [vmem:[%s6507_s1 + $0x540] sm:$0xff]  ;;  %v109_v0 = vld [vmem:[%s6507_s1 + $0x528] sm:$0xff]  ;;  %v108_v5 = vld [vmem:[%s6507_s1 + $0x510] sm:$0xff] }
0x2b81   :  { %4596 = vmatprep.subr.mxu1 %v110_v63 }
0x2b82   :  { %3655 = vrot.lane.b32.xlu1 %v3653_v2, %s4905_s25 }
0x2b8d   :  { %v4843_v3 = vpop.eup %4842 }
0x2b8e   :  { %v3608_v11 = vadd.f32 1.0, %v4843_v3 }
0x2b90   :  { %4844 = vrcp.f32 %v3608_v11 }
0x2b9d   :  { %v4845_v42 = vpop.eup %4844 }
0x2b9e   :  { %v3625_v32 = vmul.f32 %v4845_v42, %v3623_v50 }
0x2ba0   :  { %3627 = vrot.lane.b32.xlu0 %v3625_v32, %s4905_s25 }
0x2ba4   :  { %3612 = vrot.lane.b32.xlu0 %v3528_v33, %s4906_s16 }
0x2bf4   :  { %v3656_v46 = vpop.permute.xlu1 %3655 }
0x2bf5   :  { %v3658_v17 = vadd.f32 %v3656_v46, %v3640_v47 }
0x2bf7   :  { %4846 = vtanh.f32 %v3658_v17 }
0x2c04   :  { %v4847_v8 = vpop.eup %4846 }
0x2c05   :  { %3662 = vrot.lane.b32.xlu0 %v4847_v8, %s4906_s16 }
0x2c12   :  { %v3628_v62 = vpop.permute.xlu0 %3627 }
0x2c13   :  { %v3630_v1 = vadd.f32 %v3628_v62, %v3597_v30 }
0x2c15   :  { %4848 = vtanh.f32 %v3630_v1 }
0x2c16   :  { %v3613_v29 = vpop.permute.xlu0 %3612 }
0x2c17   :  { %v3615_v16 = vadd.f32 %v3613_v29, %v3528_v33 }
0x2c19   :  { %v4051_v31 = vmul.f32 -1.442695, %v3615_v16 }
0x2c1b   :  { %4850 = vpow2.f32 %v4051_v31 }
0x2c22   :  { %v4849_v28 = vpop.eup %4848 }
0x2c23   :  { %3634 = vrot.lane.b32.xlu1 %v4849_v28, %s4906_s16 }
0x2c28   :  { %v4851_v37 = vpop.eup %4850 }
0x2c29   :  { %v3619_v43 = vadd.f32 1.0, %v4851_v37 }
0x2c2b   :  { %4852 = vrcp.f32 %v3619_v43 }
0x2c38   :  { %v4853_v54 = vpop.eup %4852 }
0x2c39   :  { %v3632_v4 = vsub.f32 1.0, %v4853_v54  ;;  %v3638_v60 = vmul.f32 %v4853_v54, %v6359_v56 }
0x2c77   :  { %v3663_v51 = vpop.permute.xlu0 %3662 }
0x2c78   :  { %v3665_v13 = vmul.f32 %v3663_v51, %v3660_v61 }
0x2c7a   :  { %v6444_v48 = vadd.f32 %v3668_v12, %v3665_v13  ;;  %v70_v13 = vld [vmem:[%s6507_s1 + $0x184] ss:$0 sm:$0xff] }
0x2c7c   :  { %3671 = vrot.lane.b32.xlu1 %v6444_v48, %s4906_s16  ;;  %v3963_v29 = vrot.slane %v6444_v48, 2 }
0x2c95   :  { %v3635_v38 = vpop.permute.xlu1 %3634 }
0x2c96   :  { %v3637_v10 = vmul.f32 %v3635_v38, %v3632_v4 }
0x2c98   :  { %v6449_v55 = vadd.f32 %v3638_v60, %v3637_v10 }
0x2c9a   :  { %v3675_v9 = vrot.slane %v6449_v55, 6 }
0x2c9c   :  { %3676 = vrot.lane.b32.xlu0 %v3675_v9, %s4905_s25 }
0x2cee   :  { %v3672_v58 = vpop.permute.xlu1 %3671 }
0x2d0e   :  { %v3677_v14 = vpop.permute.xlu0 %3676 }
0x2d0f   :  { %v3679_v6 = vsel %vm385_vm1, %v3672_v58, %v3677_v14 }
0x2d10   :  { %v3681_v21 = vrot.slane %v3679_v6, 2 }
0x2d12   :  { %4053 = vmatmul.mubr.msk.f32.vlgmr.msra.gmra.mxu1 %vm281_vm2, %v3681_v21  ;;  %4594 = vmatmul.mubr.msk.f32.vlgmr.msra.gmra.mxu0 %vm281_vm2, %v3681_v21 }
0x2d13   :  { %4597 = vmatpush3.msra.mxu1 %v110_v63 }
0x2d14   :  { %4598 = vmatprep.subr.mxu1 %v109_v0 }
0x2d15   :  { %4599 = vmatpush3.msra.mxu1 %v109_v0 }
0x2d16   :  { %4600 = vmatprep.subr.mxu1 %v108_v5 }
0x2d17   :  { %4601 = vmatpush3.msra.mxu1 %v108_v5 }
0x2dd2   :  { %v3750_v36 = vpop.f32.mrf.mxu1  ;;  %v3821_v24 = vpop.f32.mrf.mxu0 }
0x2dd3   :  { %v3751_v18 = vadd.f32 %v3750_v36, %v6029_v44  ;;  %v3875_v44 = vsel %vm2150_vm4, %v3874_v52, %v3867_v27  ;;  %v3822_v39 = vadd.f32 %v3821_v24, %v6164_v22  ;;  %v107_v22 = vld [vmem:[%s6507_s1 + $0x4f8] sm:$0xff] }
0x2dd4   :  { %v3752_v25 = vpop.f32.mrf.mxu1  ;;  %v4595_v19 = vpop.f32.mrf.mxu0  ;;  %v3876_v33 = vsel %vm2152_vm5, %v3875_v44, %v3869_v53  ;;  %4602 = vmatprep.subr.mxu1 %v107_v22 }
0x2dd5   :  { %v3753_v49 = vadd.f32 %v3752_v25, %v6146_v59  ;;  %3826 = vrot.lane.b32.xlu1 %v3751_v18, %s4906_s16  ;;  %4603 = vmatpush3.msra.mxu1 %v107_v22 }
0x2dd7   :  { %3847 = vrot.lane.b32.xlu0 %v3753_v49, %s4908_s26 }
0x2ddb   :  { %3837 = vrot.lane.b32.xlu0 %v3753_v49, %s4906_s16 }
0x2ddf   :  { %3880 = vrot.lane.b32.xlu0 %v3876_v33, %s4908_s26 }
0x2e47   :  { %v3827_v59 = vpop.permute.xlu1 %3826 }
0x2e48   :  { %v3829_v20 = vadd.f32 %v3827_v59, %v3753_v49 }
0x2e49   :  { %v3848_v47 = vpop.permute.xlu0 %3847 }
0x2e4a   :  { %v4055_v23 = vmul.f32 -1.442695, %v3829_v20 }
0x2e4c   :  { %4854 = vpow2.f32 %v4055_v23 }
0x2e4d   :  { %v3838_v57 = vpop.permute.xlu0 %3837 }
0x2e4e   :  { %v3840_v3 = vadd.f32 %v3838_v57, %v3753_v49 }
0x2e50   :  { %v4056_v11 = vmul.f32 -1.442695, %v3840_v3 }
0x2e51   :  { %v3881_v35 = vpop.permute.xlu0 %3880 }
0x2e52   :  { %4604 = vmatprep.mubr.msk.f32.mxu1 %vm385_vm1, %v3881_v35 }
0x2e59   :  { %v4855_v56 = vpop.eup %4854 }
0x2e5a   :  { %v3833_v40 = vadd.f32 1.0, %v4855_v56 }
0x2e5c   :  { %4856 = vrcp.f32 %v3833_v40 }
0x2e69   :  { %v4857_v45 = vpop.eup %4856 }
0x2e6a   :  { %v3850_v7 = vmul.f32 %v4857_v45, %v3848_v47 }
0x2e6c   :  { %3852 = vrot.lane.b32.xlu1 %v3850_v7, %s4905_s25 }
0x2ede   :  { %v3853_v15 = vpop.permute.xlu1 %3852 }
0x2edf   :  { %v3855_v34 = vadd.f32 %v3853_v15, %v3822_v39 }
0x2ee1   :  { %4858 = vtanh.f32 %v3855_v34 }
0x2ee2   :  { %4860 = vpow2.f32 %v4056_v11 }
0x2eee   :  { %v4859_v2 = vpop.eup %4858 }
0x2eef   :  { %3859 = vrot.lane.b32.xlu1 %v4859_v2, %s4906_s16  ;;  %v4861_v42 = vpop.eup %4860 }
0x2ef0   :  { %v3844_v50 = vadd.f32 1.0, %v4861_v42 }
0x2ef2   :  { %4862 = vrcp.f32 %v3844_v50 }
0x2eff   :  { %v4863_v32 = vpop.eup %4862 }
0x2f00   :  { %v3857_v46 = vsub.f32 1.0, %v4863_v32  ;;  %v3863_v8 = vmul.f32 %v4863_v32, %v6449_v55 }
0x2f61   :  { %v3860_v17 = vpop.permute.xlu1 %3859 }
0x2f62   :  { %v3862_v30 = vmul.f32 %v3860_v17, %v3857_v46 }
0x2f64   :  { %v3864_v62 = vadd.f32 %v3863_v8, %v3862_v30 }
0x2f66   :  { %v3872_v1 = vrot.slane %v3864_v62, 6 }
0x2f68   :  { %3965 = vrot.lane.b32.xlu0 %v3872_v1, %s4905_s25  ;;  %v3877_v28 = vsel %vm2148_vm3, %v6449_v55, %v3872_v1 }
0x2f69   :  { %3882 = vrot.lane.b32.xlu1 %v3877_v28, %s4908_s26 }
0x2fda   :  { %v3966_v16 = vpop.permute.xlu0 %3965 }
0x2fdb   :  { %v3968_v31 = vsel %vm2148_vm3, %v3963_v29, %v3966_v16  ;;  %v3883_v41 = vpop.permute.xlu1 %3882 }
0x2fdc   :  { %4605 = vmatmul.mubr.msk.f32.vlgmr.msra.gmra.mxu1 %vm385_vm1, %v3883_v41  ;;  %3970 = vrot.lane.b32.xlu1 %v3968_v31, %s4906_s16 }
0x304e   :  { %v3971_v61 = vpop.permute.xlu1 %3970 }
0x304f   :  { %v3973_v51 = vsel %vm385_vm1, %v3971_v61, 0.0 }
0x3050   :  { %3976 = vst [vmem:[%s6509_s2 + $0xc] sm:$0xf] %v3973_v51 }
0x309c   :  { %v4606_v12 = vpop.f32.mrf.mxu1 }
0x309d   :  { %v3960_v48 = vadd.f32 %v4606_v12, %v70_v13 }
0x309e   :  { %v3954_v37 = vpop.f32.mrf.mxu1 }
0x309f   :  { %3975 = vst [vmem:[%s6509_s2 + $0x8] sm:$0xf] %v3960_v48  ;;  %v3955_v43 = vadd.f32 %v3954_v37, %v70_v13 }
0x30a1   :  { %3974 = vst [vmem:[%s6509_s2] sm:$0xff] %v3955_v43 }

</bundles_post_ra>
